<compile_context>
chip_gen: v5e
topology: v5e:2x2
jax: 0.10.0
libtpu: 0.0.40
codegen_flags: <defaults>
</compile_context>

<pallas_src>
import jax
import jax.numpy as jnp
from jax import lax
from jax.experimental import pallas as pl
from jax.experimental.pallas import tpu as pltpu


# Hyperparameters (args.*) — small, module-consistent.
NUM_NODES = 16          # nodes per graph (N)
NUM_FEATURES = 32       # number_of_features (F)
FIRST_GCN = 32          # args.first_gcn_dimensions  (D1)
SECOND_GCN = 32         # args.second_gcn_dimensions (D2)
FIRST_DENSE = 16        # args.first_dense_neurons   (Fd)
SECOND_DENSE = 8        # args.second_dense_neurons  (Sd)
GRAPHS_PER_STEP = 16    # P: graphs packed per grid step (P * N = 256 rows)


def _sage_kernel(a_ref, x_ref, w1_ref, b1_ref, w2_ref, b2_ref,
                 w3_ref, b3_ref, w4_ref, b4_ref, eye_ref,
                 ge_ref, pen_ref):
    """One grid step = GRAPHS_PER_STEP graphs packed into a 256-row slab.

    a_ref : (P, N, N)   per-graph normalized adjacencies (bf16, packed).
    x_ref : (P*N, F)    packed node features (bf16).
    ge_ref: (P, Sd, D2) per-graph pooled embeddings (f32).
    pen_ref:(P, 1)      per-graph regularization penalties (f32).
    """
    p, n, _ = a_ref.shape
    pn = p * n
    d1 = w1_ref.shape[1]
    d2 = w2_ref.shape[1]
    sd = w4_ref.shape[1]
    f32 = jnp.float32
    bf16 = jnp.bfloat16

    a = a_ref[...]                                   # (P, N, N)  bf16
    x = x_ref[...]                                   # (P*N, F)   bf16

    # --- GCNConv 1: relu( A_hat @ (X @ W1) + b1 ), dense chain at M = 256 ----
    xw1 = jnp.dot(x, w1_ref[...], preferred_element_type=f32)          # (PN, D1)
    agg1 = jnp.einsum('pij,pjd->pid', a,
                      xw1.astype(bf16).reshape(p, n, d1),
                      preferred_element_type=f32)                      # (P, N, D1)
    h1 = jnp.maximum(agg1.reshape(pn, d1) + b1_ref[...], 0.0)          # f32

    # --- GCNConv 2: A_hat @ (h1 @ W2) + b2 ------------------------------------
    hw2 = jnp.dot(h1.astype(bf16), w2_ref[...], preferred_element_type=f32)
    agg2 = jnp.einsum('pij,pjd->pid', a,
                      hw2.astype(bf16).reshape(p, n, d2),
                      preferred_element_type=f32)                      # (P, N, D2)
    h2 = agg2.reshape(pn, d2) + b2_ref[...]                            # (PN, D2) f32

    # --- Dense head: tanh Linear + attention logits, still packed ------------
    f1 = jnp.tanh(jnp.dot(h2.astype(bf16), w3_ref[...],
                          preferred_element_type=f32) + b3_ref[...])   # (PN, Fd)
    logits = (jnp.dot(f1.astype(bf16), w4_ref[...],
                      preferred_element_type=f32) + b4_ref[...])       # (PN, Sd)

    # --- Softmax over nodes, batched over all P graphs in the slab -----------
    lg = logits.reshape(p, n, sd)                    # (P, N, Sd) f32
    m = jnp.max(lg, axis=1, keepdims=True)
    e = jnp.exp(lg - m)
    denom = jnp.sum(e, axis=1, keepdims=True)
    inv = pl.reciprocal(denom, approx=True)          # EUP
    inv = inv * (2.0 - denom * inv)                  # one Newton step -> ~exact
    att = e * inv                                    # (P, N, Sd) f32

    # --- Pooling + penalty: batched dot_generals contracting the node axis ---
    h2_3 = h2.reshape(p, n, d2)                      # (P, N, D2) f32
    ge = jnp.einsum('pns,pnd->psd', att, h2_3,
                    preferred_element_type=f32)      # (P, Sd, D2)
    ge_ref[...] = ge                                 # single store

    gram = jnp.einsum('pns,pnt->pst', att, att,
                      preferred_element_type=f32)    # (P, Sd, Sd)
    diff = gram - eye_ref[...][None, :, :]
    row_norm = jnp.sqrt(jnp.sum(diff * diff, axis=2))            # (P, Sd)
    pen_ref[...] = jnp.sum(row_norm, axis=1, keepdims=True)      # (P, 1), single store


@jax.jit
def sage_forward_batched(a_hats, feats, params):
    """a_hats: (G, N, N) GCN-normalized adjacencies; feats: (G, N, F).

    Returns (graph_embeddings (G, Sd*D2), penalties (G,))."""
    w1, b1, w2, b2, w3, b3, w4, b4 = params
    g, n, f = feats.shape
    d1 = w1.shape[1]
    d2 = w2.shape[1]
    fd = w3.shape[1]
    sd = w4.shape[1]
    p = GRAPHS_PER_STEP

    # Pad graph count up to a multiple of P (padded graphs are all-zero; their
    # outputs are finite garbage and are sliced away below).
    g_pad = ((g + p - 1) // p) * p
    if g_pad != g:
        a_hats = jnp.pad(a_hats, ((0, g_pad - g), (0, 0), (0, 0)))
        feats = jnp.pad(feats, ((0, g_pad - g), (0, 0), (0, 0)))
    gp = g_pad // p
    pn = p * n

    # Packed (not block-diagonalized) adjacency + stacked features, bf16 in HBM.
    a_pk = a_hats.reshape(gp, p, n, n).astype(jnp.bfloat16)
    x_pk = feats.reshape(gp, pn, f).astype(jnp.bfloat16)
    w1b = w1.astype(jnp.bfloat16)
    w2b = w2.astype(jnp.bfloat16)
    w3b = w3.astype(jnp.bfloat16)
    w4b = w4.astype(jnp.bfloat16)
    eye_sd = jnp.eye(sd, dtype=jnp.float32)

    def const_spec(shape):
        nd = len(shape)
        return pl.BlockSpec(shape, lambda i: (0,) * nd)

    in_specs = [
        pl.BlockSpec((None, p, n, n), lambda i: (i, 0, 0, 0)),   # packed A_hat
        pl.BlockSpec((None, pn, f), lambda i: (i, 0, 0)),        # packed features
        const_spec(w1b.shape), const_spec(b1.shape),
        const_spec(w2b.shape), const_spec(b2.shape),
        const_spec(w3b.shape), const_spec(b3.shape),
        const_spec(w4b.shape), const_spec(b4.shape),
        const_spec(eye_sd.shape),
    ]
    out_specs = (
        pl.BlockSpec((p, sd, d2), lambda i: (i, 0, 0)),
        pl.BlockSpec((p, 1), lambda i: (i, 0)),
    )
    out_shape = (jax.ShapeDtypeStruct((g_pad, sd, d2), jnp.float32),
                 jax.ShapeDtypeStruct((g_pad, 1), jnp.float32))

    # Advisory cost hint so XLA schedules the custom call sensibly.
    flops = gp * 2 * (pn * f * d1 + p * n * n * d1
                      + pn * d1 * d2 + p * n * n * d2
                      + pn * d2 * fd + pn * fd * sd
                      + p * n * sd * d2 + p * n * sd * sd)
    transcendentals = gp * (pn * fd + pn * sd + p * sd)
    bytes_accessed = (a_pk.size * 2 + x_pk.size * 2
                      + (w1.size + w2.size + w3.size + w4.size) * 2
                      + (b1.size + b2.size + b3.size + b4.size + eye_sd.size) * 4
                      + (g_pad * sd * d2 + g_pad) * 4)
    cost = pl.CostEstimate(flops=int(flops),
                           transcendentals=int(transcendentals),
                           bytes_accessed=int(bytes_accessed))

    ge, pen = pl.pallas_call(
        _sage_kernel,
        grid=(gp,),
        in_specs=in_specs,
        out_specs=out_specs,
        out_shape=out_shape,
        compiler_params=pltpu.CompilerParams(
            dimension_semantics=("parallel",)),       # v7x: shard slabs across TCs
        cost_estimate=cost,
    )(a_pk, x_pk, w1b, b1, w2b, b2, w3b, b3, w4b, b4, eye_sd)

    graph_embeddings = ge[:g].reshape(g, sd * d2)     # per-graph .view(1, -1)
    penalties = pen[:g, 0]
    return graph_embeddings, penalties


def sage_forward(a_hat, features, params):
    """Single-graph API matching the PyTorch module's forward()."""
    ge, pen = sage_forward_batched(a_hat[None], features[None], params)
    return ge.reshape(1, -1), pen[0]


def build_normalized_adjacency(edges, num_nodes):
    """Dense GCN-normalized adjacency D^{-1/2}(A+I)D^{-1/2} (plain-JAX glue)."""
    src, dst = edges[0], edges[1]
    a = jnp.zeros((num_nodes, num_nodes), jnp.float32)
    a = a.at[src, dst].set(1.0)
    a = a.at[dst, src].set(1.0)                      # treat edges as undirected
    a = a + jnp.eye(num_nodes, dtype=jnp.float32)    # self loops
    deg = jnp.sum(a, axis=1)
    d_inv_sqrt = jnp.where(deg > 0, 1.0 / jnp.sqrt(deg), 0.0)
    return a * d_inv_sqrt[:, None] * d_inv_sqrt[None, :]


def _sage_reference(a_hat, x, params, matmul_dtype=jnp.float32):
    """Pure-JAX per-graph reference.

    matmul_dtype=bf16 mirrors the kernel's precision policy (bf16 MXU inputs,
    f32 accumulation, f32 elementwise) for a tight correctness check;
    matmul_dtype=f32 is the original full-f32 module semantics."""
    w1, b1, w2, b2, w3, b3, w4, b4 = params
    hi = lax.Precision.HIGHEST

    def mm(a, b):
        return jnp.dot(a.astype(matmul_dtype), b.astype(matmul_dtype),
                       preferred_element_type=jnp.float32, precision=hi)

    h1 = jax.nn.relu(mm(a_hat, mm(x, w1)) + b1)
    h2 = mm(a_hat, mm(h1, w2)) + b2
    f1 = jnp.tanh(mm(h2, w3) + b3)
    att = jax.nn.softmax(mm(f1, w4) + b4, axis=0)
    ge = jnp.dot(att.T, h2, precision=hi).reshape(-1)
    diff = (jnp.dot(att.T, att, precision=hi)
            - jnp.eye(att.shape[1], dtype=jnp.float32))
    pen = jnp.sum(jnp.sqrt(jnp.sum(diff * diff, axis=1)))
    return ge, pen


if __name__ == "__main__":
    num_graphs = 32   # 2 grid steps of 16 graphs -> both v7x TensorCores get work

    key = jax.random.PRNGKey(0)
    keys = jax.random.split(key, 12)

    # Deterministic synthetic graphs: node features + random (undirected) edges.
    feats = jax.random.normal(
        keys[0], (num_graphs, NUM_NODES, NUM_FEATURES), jnp.float32)
    src = jax.random.randint(keys[1], (num_graphs, 32), 0, NUM_NODES)
    dst = jax.random.randint(keys[2], (num_graphs, 32), 0, NUM_NODES)
    edges = jnp.stack([src, dst], axis=1)            # (G, 2, E)
    a_hats = jax.vmap(lambda e: build_normalized_adjacency(e, NUM_NODES))(edges)

    def glorot(k, shape):
        fan_in, fan_out = shape
        lim = jnp.sqrt(6.0 / (fan_in + fan_out))
        return jax.random.uniform(k, shape, jnp.float32, -lim, lim)

    # GCNConv weights (in, out); biases stored as (1, out) for broadcasting.
    w1 = glorot(keys[3], (NUM_FEATURES, FIRST_GCN))
    b1 = jnp.zeros((1, FIRST_GCN), jnp.float32)
    w2 = glorot(keys[4], (FIRST_GCN, SECOND_GCN))
    b2 = jnp.zeros((1, SECOND_GCN), jnp.float32)
    # torch.nn.Linear does x @ W^T + b; store already-transposed (in, out).
    w3 = glorot(keys[5], (SECOND_GCN, FIRST_DENSE))
    b3 = 0.01 * jax.random.normal(keys[6], (1, FIRST_DENSE), jnp.float32)
    w4 = glorot(keys[7], (FIRST_DENSE, SECOND_DENSE))
    b4 = 0.01 * jax.random.normal(keys[8], (1, SECOND_DENSE), jnp.float32)

    params = (w1, b1, w2, b2, w3, b3, w4, b4)

    ge_k, pen_k = sage_forward_batched(a_hats, feats, params)
    jax.block_until_ready((ge_k, pen_k))

    assert ge_k.shape == (num_graphs, SECOND_DENSE * SECOND_GCN)
    assert pen_k.shape == (num_graphs,)

    # Tight check vs a reference with the same precision policy as the kernel
    # (bf16 matmul inputs, f32 accumulation, f32 elementwise).
    ref_bf = jax.jit(jax.vmap(
        lambda a, x: _sage_reference(a, x, params, jnp.bfloat16)))
    ge_bf, pen_bf = ref_bf(a_hats, feats)
    assert jnp.allclose(ge_k, ge_bf, rtol=2e-3, atol=2e-3)
    assert jnp.allclose(pen_k, pen_bf, rtol=2e-3, atol=2e-3)

    # Loose sanity check vs the full-f32 module semantics (bounds bf16 drift).
    ref_f32 = jax.jit(jax.vmap(
        lambda a, x: _sage_reference(a, x, params, jnp.float32)))
    ge_r, pen_r = ref_f32(a_hats, feats)
    assert jnp.allclose(ge_k, ge_r, rtol=1e-1, atol=1e-1)
    assert jnp.allclose(pen_k, pen_r, rtol=1e-1, atol=1e-1)

    # Single-graph API (matches the torch module's forward()) agrees with the
    # batched path for graph 0.
    ge_1, pen_1 = sage_forward(a_hats[0], feats[0], params)
    jax.block_until_ready((ge_1, pen_1))
    assert ge_1.shape == (1, SECOND_DENSE * SECOND_GCN)
    assert jnp.allclose(ge_1[0], ge_k[0], rtol=1e-5, atol=1e-5)

    print("KERNEL_OK")
</pallas_src>

<mosaic_0001>
module attributes {stable_mosaic.version = 11 : i64} {
  func.func @_sage_kernel(%arg0: i32, %arg1: memref<1x16x16x16xbf16, #tpu.memory_space<vmem>>, %arg2: memref<1x256x32xbf16, #tpu.memory_space<vmem>>, %arg3: memref<32x32xbf16, #tpu.memory_space<vmem>>, %arg4: memref<1x32xf32, #tpu.memory_space<vmem>>, %arg5: memref<32x32xbf16, #tpu.memory_space<vmem>>, %arg6: memref<1x32xf32, #tpu.memory_space<vmem>>, %arg7: memref<32x16xbf16, #tpu.memory_space<vmem>>, %arg8: memref<1x16xf32, #tpu.memory_space<vmem>>, %arg9: memref<16x8xbf16, #tpu.memory_space<vmem>>, %arg10: memref<1x8xf32, #tpu.memory_space<vmem>>, %arg11: memref<8x8xf32, #tpu.memory_space<vmem>>, %arg12: memref<16x8x32xf32, #tpu.memory_space<vmem>>, %arg13: memref<16x1xf32, #tpu.memory_space<vmem>>) attributes {dimension_semantics = [#tpu.dimension_semantics<parallel>], iteration_bounds = array<i64: 2>, scalar_prefetch = 0 : i64, scratch_operands = 0 : i64, tpu.core_type = #tpu.core_type<tc>, window_params = [{transform_indices = @transform_0, window_bounds = array<i64: 1, 16, 16, 16>}, {transform_indices = @transform_1, window_bounds = array<i64: 1, 256, 32>}, {pipeline_mode = #tpu.pipeline_mode<synchronous>, transform_indices = @transform_2, window_bounds = array<i64: 32, 32>}, {pipeline_mode = #tpu.pipeline_mode<synchronous>, transform_indices = @transform_3, window_bounds = array<i64: 1, 32>}, {pipeline_mode = #tpu.pipeline_mode<synchronous>, transform_indices = @transform_4, window_bounds = array<i64: 32, 32>}, {pipeline_mode = #tpu.pipeline_mode<synchronous>, transform_indices = @transform_5, window_bounds = array<i64: 1, 32>}, {pipeline_mode = #tpu.pipeline_mode<synchronous>, transform_indices = @transform_6, window_bounds = array<i64: 32, 16>}, {pipeline_mode = #tpu.pipeline_mode<synchronous>, transform_indices = @transform_7, window_bounds = array<i64: 1, 16>}, {pipeline_mode = #tpu.pipeline_mode<synchronous>, transform_indices = @transform_8, window_bounds = array<i64: 16, 8>}, {pipeline_mode = #tpu.pipeline_mode<synchronous>, transform_indices = @transform_9, window_bounds = array<i64: 1, 8>}, {pipeline_mode = #tpu.pipeline_mode<synchronous>, transform_indices = @transform_10, window_bounds = array<i64: 8, 8>}, {transform_indices = @transform_11, window_bounds = array<i64: 16, 8, 32>}, {transform_indices = @transform_12, window_bounds = array<i64: 16, 1>}]} {
    %c0 = arith.constant 0 : index
    %c0_0 = arith.constant 0 : index
    %c0_1 = arith.constant 0 : index
    %c0_2 = arith.constant 0 : index
    %0 = vector.load %arg1[%c0, %c0_0, %c0_1, %c0_2] : memref<1x16x16x16xbf16, #tpu.memory_space<vmem>>, vector<1x16x16x16xbf16>
    %1 = vector.shape_cast %0 : vector<1x16x16x16xbf16> to vector<16x16x16xbf16>
    %c0_3 = arith.constant 0 : index
    %c0_4 = arith.constant 0 : index
    %c0_5 = arith.constant 0 : index
    %2 = vector.load %arg2[%c0_3, %c0_4, %c0_5] : memref<1x256x32xbf16, #tpu.memory_space<vmem>>, vector<1x256x32xbf16>
    %3 = vector.shape_cast %2 : vector<1x256x32xbf16> to vector<256x32xbf16>
    %c0_6 = arith.constant 0 : index
    %c0_7 = arith.constant 0 : index
    %4 = vector.load %arg3[%c0_6, %c0_7] : memref<32x32xbf16, #tpu.memory_space<vmem>>, vector<32x32xbf16>
    %cst = arith.constant dense<0.000000e+00> : vector<256x32xf32>
    %5 = tpu.matmul %3, %4, %cst {dimension_numbers = #tpu.dot_dimension_numbers<[1], [0], [0], [1], [0, 0, 1, 1], [], []>} : vector<256x32xbf16>, vector<32x32xbf16>, vector<256x32xf32> -> vector<256x32xf32>
    %6 = arith.truncf %5 : vector<256x32xf32> to vector<256x32xbf16>
    %7 = vector.shape_cast %6 : vector<256x32xbf16> to vector<16x16x32xbf16>
    "tpu.trace_start"() <{level = 10 : i32, message = "pij,pjd->pid"}> : () -> ()
    %cst_8 = arith.constant dense<0.000000e+00> : vector<16x16x32xf32>
    %8 = tpu.matmul %1, %7, %cst_8 {dimension_numbers = #tpu.dot_dimension_numbers<[2], [1], [1], [2], [0, 0, 0, 1, 1, 2], [0], [0]>} : vector<16x16x16xbf16>, vector<16x16x32xbf16>, vector<16x16x32xf32> -> vector<16x16x32xf32>
    "tpu.trace_stop"() : () -> ()
    %9 = vector.shape_cast %8 : vector<16x16x32xf32> to vector<256x32xf32>
    %c0_9 = arith.constant 0 : index
    %c0_10 = arith.constant 0 : index
    %10 = vector.load %arg4[%c0_9, %c0_10] : memref<1x32xf32, #tpu.memory_space<vmem>>, vector<1x32xf32>
    %11 = vector.broadcast %10 : vector<1x32xf32> to vector<256x32xf32>
    %12 = arith.addf %9, %11 : vector<256x32xf32>
    %cst_11 = arith.constant 0.000000e+00 : f32
    %13 = vector.broadcast %cst_11 : f32 to vector<256x32xf32>
    %14 = arith.maximumf %12, %13 : vector<256x32xf32>
    %15 = arith.truncf %14 : vector<256x32xf32> to vector<256x32xbf16>
    %c0_12 = arith.constant 0 : index
    %c0_13 = arith.constant 0 : index
    %16 = vector.load %arg5[%c0_12, %c0_13] : memref<32x32xbf16, #tpu.memory_space<vmem>>, vector<32x32xbf16>
    %cst_14 = arith.constant dense<0.000000e+00> : vector<256x32xf32>
    %17 = tpu.matmul %15, %16, %cst_14 {dimension_numbers = #tpu.dot_dimension_numbers<[1], [0], [0], [1], [0, 0, 1, 1], [], []>} : vector<256x32xbf16>, vector<32x32xbf16>, vector<256x32xf32> -> vector<256x32xf32>
    %18 = arith.truncf %17 : vector<256x32xf32> to vector<256x32xbf16>
    %19 = vector.shape_cast %18 : vector<256x32xbf16> to vector<16x16x32xbf16>
    "tpu.trace_start"() <{level = 10 : i32, message = "pij,pjd->pid"}> : () -> ()
    %cst_15 = arith.constant dense<0.000000e+00> : vector<16x16x32xf32>
    %20 = tpu.matmul %1, %19, %cst_15 {dimension_numbers = #tpu.dot_dimension_numbers<[2], [1], [1], [2], [0, 0, 0, 1, 1, 2], [0], [0]>} : vector<16x16x16xbf16>, vector<16x16x32xbf16>, vector<16x16x32xf32> -> vector<16x16x32xf32>
    "tpu.trace_stop"() : () -> ()
    %21 = vector.shape_cast %20 : vector<16x16x32xf32> to vector<256x32xf32>
    %c0_16 = arith.constant 0 : index
    %c0_17 = arith.constant 0 : index
    %22 = vector.load %arg6[%c0_16, %c0_17] : memref<1x32xf32, #tpu.memory_space<vmem>>, vector<1x32xf32>
    %23 = vector.broadcast %22 : vector<1x32xf32> to vector<256x32xf32>
    %24 = arith.addf %21, %23 : vector<256x32xf32>
    %25 = arith.truncf %24 : vector<256x32xf32> to vector<256x32xbf16>
    %c0_18 = arith.constant 0 : index
    %c0_19 = arith.constant 0 : index
    %26 = vector.load %arg7[%c0_18, %c0_19] : memref<32x16xbf16, #tpu.memory_space<vmem>>, vector<32x16xbf16>
    %cst_20 = arith.constant dense<0.000000e+00> : vector<256x16xf32>
    %27 = tpu.matmul %25, %26, %cst_20 {dimension_numbers = #tpu.dot_dimension_numbers<[1], [0], [0], [1], [0, 0, 1, 1], [], []>} : vector<256x32xbf16>, vector<32x16xbf16>, vector<256x16xf32> -> vector<256x16xf32>
    %c0_21 = arith.constant 0 : index
    %c0_22 = arith.constant 0 : index
    %28 = vector.load %arg8[%c0_21, %c0_22] : memref<1x16xf32, #tpu.memory_space<vmem>>, vector<1x16xf32>
    %29 = vector.broadcast %28 : vector<1x16xf32> to vector<256x16xf32>
    %30 = arith.addf %27, %29 : vector<256x16xf32>
    %31 = math.tanh %30 : vector<256x16xf32>
    %32 = arith.truncf %31 : vector<256x16xf32> to vector<256x16xbf16>
    %c0_23 = arith.constant 0 : index
    %c0_24 = arith.constant 0 : index
    %33 = vector.load %arg9[%c0_23, %c0_24] : memref<16x8xbf16, #tpu.memory_space<vmem>>, vector<16x8xbf16>
    %cst_25 = arith.constant dense<0.000000e+00> : vector<256x8xf32>
    %34 = tpu.matmul %32, %33, %cst_25 {dimension_numbers = #tpu.dot_dimension_numbers<[1], [0], [0], [1], [0, 0, 1, 1], [], []>} : vector<256x16xbf16>, vector<16x8xbf16>, vector<256x8xf32> -> vector<256x8xf32>
    %c0_26 = arith.constant 0 : index
    %c0_27 = arith.constant 0 : index
    %35 = vector.load %arg10[%c0_26, %c0_27] : memref<1x8xf32, #tpu.memory_space<vmem>>, vector<1x8xf32>
    %36 = vector.broadcast %35 : vector<1x8xf32> to vector<256x8xf32>
    %37 = arith.addf %34, %36 : vector<256x8xf32>
    %38 = vector.shape_cast %37 : vector<256x8xf32> to vector<16x16x8xf32>
    %cst_28 = arith.constant dense<0xFF800000> : vector<16x8xf32>
    %39 = vector.multi_reduction <maximumf>, %38, %cst_28 [1] : vector<16x16x8xf32> to vector<16x8xf32>
    %40 = vector.shape_cast %39 : vector<16x8xf32> to vector<16x1x8xf32>
    %41 = vector.broadcast %40 : vector<16x1x8xf32> to vector<16x16x8xf32>
    %42 = arith.subf %38, %41 : vector<16x16x8xf32>
    %43 = math.exp %42 : vector<16x16x8xf32>
    %cst_29 = arith.constant dense<0.000000e+00> : vector<16x8xf32>
    %44 = vector.multi_reduction <add>, %43, %cst_29 [1] : vector<16x16x8xf32> to vector<16x8xf32>
    %45 = vector.shape_cast %44 : vector<16x8xf32> to vector<16x1x8xf32>
    %46 = tpu.reciprocal %45 {approx = true} : vector<16x1x8xf32> -> vector<16x1x8xf32>
    %47 = arith.mulf %45, %46 : vector<16x1x8xf32>
    %cst_30 = arith.constant 2.000000e+00 : f32
    %48 = vector.broadcast %cst_30 : f32 to vector<16x1x8xf32>
    %49 = arith.subf %48, %47 : vector<16x1x8xf32>
    %50 = arith.mulf %46, %49 : vector<16x1x8xf32>
    %51 = vector.broadcast %50 : vector<16x1x8xf32> to vector<16x16x8xf32>
    %52 = arith.mulf %43, %51 : vector<16x16x8xf32>
    %53 = vector.shape_cast %24 : vector<256x32xf32> to vector<16x16x32xf32>
    "tpu.trace_start"() <{level = 10 : i32, message = "pns,pnd->psd"}> : () -> ()
    %cst_31 = arith.constant dense<0.000000e+00> : vector<16x8x32xf32>
    %54 = tpu.matmul %52, %53, %cst_31 {dimension_numbers = #tpu.dot_dimension_numbers<[1], [1], [2], [2], [0, 0, 0, 2, 1, 2], [0], [0]>} : vector<16x16x8xf32>, vector<16x16x32xf32>, vector<16x8x32xf32> -> vector<16x8x32xf32>
    "tpu.trace_stop"() : () -> ()
    %c0_32 = arith.constant 0 : index
    %c0_33 = arith.constant 0 : index
    %c0_34 = arith.constant 0 : index
    %55 = vector.load %arg12[%c0_32, %c0_33, %c0_34] : memref<16x8x32xf32, #tpu.memory_space<vmem>>, vector<16x8x32xf32>
    tpu.vector_store %arg12[%c0_32, %c0_33, %c0_34], %54 {strides = array<i32>} : memref<16x8x32xf32, #tpu.memory_space<vmem>>, vector<16x8x32xf32>,
    "tpu.trace_start"() <{level = 10 : i32, message = "pns,pnt->pst"}> : () -> ()
    %cst_35 = arith.constant dense<0.000000e+00> : vector<16x8x8xf32>
    %56 = tpu.matmul %52, %52, %cst_35 {dimension_numbers = #tpu.dot_dimension_numbers<[1], [1], [2], [2], [0, 0, 0, 2, 1, 2], [0], [0]>} : vector<16x16x8xf32>, vector<16x16x8xf32>, vector<16x8x8xf32> -> vector<16x8x8xf32>
    "tpu.trace_stop"() : () -> ()
    %c0_36 = arith.constant 0 : index
    %c0_37 = arith.constant 0 : index
    %57 = vector.load %arg11[%c0_36, %c0_37] : memref<8x8xf32, #tpu.memory_space<vmem>>, vector<8x8xf32>
    %58 = vector.shape_cast %57 : vector<8x8xf32> to vector<1x8x8xf32>
    %59 = vector.broadcast %58 : vector<1x8x8xf32> to vector<16x8x8xf32>
    %60 = arith.subf %56, %59 : vector<16x8x8xf32>
    %61 = arith.mulf %60, %60 : vector<16x8x8xf32>
    %cst_38 = arith.constant dense<0.000000e+00> : vector<16x8xf32>
    %62 = vector.multi_reduction <add>, %61, %cst_38 [2] : vector<16x8x8xf32> to vector<16x8xf32>
    %63 = math.sqrt %62 : vector<16x8xf32>
    %cst_39 = arith.constant dense<0.000000e+00> : vector<16xf32>
    %64 = vector.multi_reduction <add>, %63, %cst_39 [1] : vector<16x8xf32> to vector<16xf32>
    %65 = vector.shape_cast %64 : vector<16xf32> to vector<16x1xf32>
    %c0_40 = arith.constant 0 : index
    %c0_41 = arith.constant 0 : index
    %66 = vector.load %arg13[%c0_40, %c0_41] : memref<16x1xf32, #tpu.memory_space<vmem>>, vector<16x1xf32>
    tpu.vector_store %arg13[%c0_40, %c0_41], %65 {strides = array<i32>} : memref<16x1xf32, #tpu.memory_space<vmem>>, vector<16x1xf32>,
    return
  }
  func.func @transform_0(%arg0: i32) -> (i32, i32, i32, i32) {
    %c0_i32 = arith.constant 0 : i32
    %c0_i32_0 = arith.constant 0 : i32
    %c0_i32_1 = arith.constant 0 : i32
    %c0_i32_2 = arith.constant 0 : i32
    return %arg0, %c0_i32, %c0_i32_0, %c0_i32_1 : i32, i32, i32, i32
  }
  func.func @transform_1(%arg0: i32) -> (i32, i32, i32) {
    %c0_i32 = arith.constant 0 : i32
    %c0_i32_0 = arith.constant 0 : i32
    %c0_i32_1 = arith.constant 0 : i32
    return %arg0, %c0_i32, %c0_i32_0 : i32, i32, i32
  }
  func.func @transform_2(%arg0: i32) -> (i32, i32) {
    %c0_i32 = arith.constant 0 : i32
    %c0_i32_0 = arith.constant 0 : i32
    %c0_i32_1 = arith.constant 0 : i32
    return %c0_i32, %c0_i32_0 : i32, i32
  }
  func.func @transform_3(%arg0: i32) -> (i32, i32) {
    %c0_i32 = arith.constant 0 : i32
    %c0_i32_0 = arith.constant 0 : i32
    %c0_i32_1 = arith.constant 0 : i32
    return %c0_i32, %c0_i32_0 : i32, i32
  }
  func.func @transform_4(%arg0: i32) -> (i32, i32) {
    %c0_i32 = arith.constant 0 : i32
    %c0_i32_0 = arith.constant 0 : i32
    %c0_i32_1 = arith.constant 0 : i32
    return %c0_i32, %c0_i32_0 : i32, i32
  }
  func.func @transform_5(%arg0: i32) -> (i32, i32) {
    %c0_i32 = arith.constant 0 : i32
    %c0_i32_0 = arith.constant 0 : i32
    %c0_i32_1 = arith.constant 0 : i32
    return %c0_i32, %c0_i32_0 : i32, i32
  }
  func.func @transform_6(%arg0: i32) -> (i32, i32) {
    %c0_i32 = arith.constant 0 : i32
    %c0_i32_0 = arith.constant 0 : i32
    %c0_i32_1 = arith.constant 0 : i32
    return %c0_i32, %c0_i32_0 : i32, i32
  }
  func.func @transform_7(%arg0: i32) -> (i32, i32) {
    %c0_i32 = arith.constant 0 : i32
    %c0_i32_0 = arith.constant 0 : i32
    %c0_i32_1 = arith.constant 0 : i32
    return %c0_i32, %c0_i32_0 : i32, i32
  }
  func.func @transform_8(%arg0: i32) -> (i32, i32) {
    %c0_i32 = arith.constant 0 : i32
    %c0_i32_0 = arith.constant 0 : i32
    %c0_i32_1 = arith.constant 0 : i32
    return %c0_i32, %c0_i32_0 : i32, i32
  }
  func.func @transform_9(%arg0: i32) -> (i32, i32) {
    %c0_i32 = arith.constant 0 : i32
    %c0_i32_0 = arith.constant 0 : i32
    %c0_i32_1 = arith.constant 0 : i32
    return %c0_i32, %c0_i32_0 : i32, i32
  }
  func.func @transform_10(%arg0: i32) -> (i32, i32) {
    %c0_i32 = arith.constant 0 : i32
    %c0_i32_0 = arith.constant 0 : i32
    %c0_i32_1 = arith.constant 0 : i32
    return %c0_i32, %c0_i32_0 : i32, i32
  }
  func.func @transform_11(%arg0: i32) -> (i32, i32, i32) {
    %c0_i32 = arith.constant 0 : i32
    %c0_i32_0 = arith.constant 0 : i32
    %c0_i32_1 = arith.constant 0 : i32
    return %arg0, %c0_i32, %c0_i32_0 : i32, i32, i32
  }
  func.func @transform_12(%arg0: i32) -> (i32, i32) {
    %c0_i32 = arith.constant 0 : i32
    %c0_i32_0 = arith.constant 0 : i32
    return %arg0, %c0_i32 : i32, i32
  }
}

</mosaic_0001>

<bundles_post_ra>
// kernel: sage_forward_batched.1
= control target key start
LH: loop header
LB: loop body
LE: loop exit
PB: predicated region body
PF: predicated region fallthrough
CT: control target
= control target key end

     0   :  { %s4981_s21 = smov 0   ;;  %s6187_s0 = inlined_call_operand.vmem [shape: bf16[2,16,16,16], index: 0, kind: input, shape index: {}]   ;;  %s6188_s1 = inlined_call_operand.vmem [shape: bf16[2,256,32], index: 1, kind: input, shape index: {}]   ;;  %s6189_s2 = inlined_call_operand.vmem [shape: bf16[32,32], index: 2, kind: input, shape index: {}]   ;;  %s6190_s3 = inlined_call_operand.vmem [shape: f32[1,32], index: 3, kind: input, shape index: {}]   ;;  %s6191_s4 = inlined_call_operand.vmem [shape: bf16[32,32], index: 4, kind: input, shape index: {}]   ;;  %s6192_s5 = inlined_call_operand.vmem [shape: f32[1,32], index: 5, kind: input, shape index: {}]   ;;  %s6193_s6 = inlined_call_operand.vmem [shape: bf16[32,16], index: 6, kind: input, shape index: {}]   ;;  %s6194_s7 = inlined_call_operand.vmem [shape: f32[1,16], index: 7, kind: input, shape index: {}]   ;;  %s6195_s8 = inlined_call_operand.vmem [shape: bf16[16,8], index: 8, kind: input, shape index: {}]   ;;  %s6196_s9 = inlined_call_operand.vmem [shape: f32[1,8], index: 9, kind: input, shape index: {}]   ;;  %s6197_s10 = inlined_call_operand.vmem [shape: f32[8,8], index: 10, kind: input, shape index: {}]   ;;  %s6198_s11 = inlined_call_operand.vmem [shape: f32[32,8,32], index: 11, kind: output, shape index: {0}]   ;;  %s6199_s12 = inlined_call_operand.vmem [shape: f32[32,1], index: 12, kind: output, shape index: {1}]  }
   0x1 LB: > { %s4987_s22 = sadd.s32 4294967295, %s4914_s21   ;;  %p4366_p0 = scmp.ge.s32.totalorder %s4914_s21, 1  ;;  %s4914_s21 = sphi %s4981_s21, %s23_s21  }
   0x2   : > { %p375_p1 = scmp.lt.s32.totalorder %s4914_s21, 3 }
   0x4   : > { %p376_p2 = pnand %p4366_p0, %p375_p1 }
   0x6   : > { %379 = sbr.rel (%p376_p2) target bundleno = 1977 (0x7b9), region = 64 }
   0xb   : > { %v4696_v0 = vld [vmem:[%s6189_s2 + $0x8] sm:$0xff]  ;;  %p427_p3 = scmp.lt.s32.totalorder %s4987_s22, 1  ;;  %v4695_v1 = vld [vmem:[%s6189_s2] sm:$0xff]  ;;  %vm610_vm0 = vcmask 261120   ;;  %vm791_vm1 = vcmask 130048   ;;  %vm2224_vm2 = vcmask 64512  }
   0xc   : > { %665 = vmatpush.bf16.msra.mxu0 %v4696_v0  ;;  %s4371_s23 = sshll.u32 %s4987_s22, 4  ;;  %vm4228_vm8 = vcmask 1041409   ;;  %vm4230_vm12 = vcmask 1042434   ;;  %s4373_s30 = sshll.u32 %s4987_s22, 1 }
   0xd   : > { %s4999_s27 = scalar_select %p427_p3, %s4987_s22, 1 }
   0xe   : > { %p438_p4 = scmp.lt.s32.totalorder %s4371_s23, 31  ;;  %p444_p5 = scmp.lt.s32.totalorder %s4373_s30, 3 }
   0xf   : > { %s4661_s28 = sshll.u32 %s4999_s27, 7 }
  0x10   : > { %s5005_s13 = scalar_lea.vmem %s6188_s1, %s4661_s28  ;;  %666 = vmatpush.bf16.msra.mxu0 %v4695_v1  ;;  %s5028_s16 = scalar_lea.vmem %s6187_s0, %s4661_s28 }
  0x11   : > { %v4679_v2 = vld [vmem:[%s5005_s13] sm:$0xff]  ;;  %v4680_v3 = vld [vmem:[%s5005_s13 + $0x8] sm:$0xff]  ;;  %v4681_v4 = vld [vmem:[%s5005_s13 + $0x10] sm:$0xff]  ;;  %s6234_s23 = smov (!%p438_p4, %s4371_s23), 31  ;;  %s6236_s30 = smov (!%p444_p5, %s4373_s30), 3 }
  0x12   : > { %v4682_v5 = vld [vmem:[%s5005_s13 + $0x18] sm:$0xff]  ;;  %v4683_v6 = vld [vmem:[%s5005_s13 + $0x20] sm:$0xff]  ;;  %v4684_v7 = vld [vmem:[%s5005_s13 + $0x28] sm:$0xff]  ;;  %s4372_s24 = sshll.u32 %s6234_s23, 3 }
  0x13   : > { %4447 = vmatmul.msk.bf16.vlgmr.msra.gmra.mxu0 %vm610_vm0, %v4679_v2  ;;  %v4685_v8 = vld [vmem:[%s5005_s13 + $0x30] sm:$0xff]  ;;  %v4686_v9 = vld [vmem:[%s5005_s13 + $0x38] sm:$0xff]  ;;  %v4687_v10 = vld [vmem:[%s5005_s13 + $0x40] sm:$0xff]  ;;  %s5835_s27 = scalar_lea.vmem %s6198_s11, %s4372_s24 }
  0x14   : > { %v5031_v18 = vld [vmem:[%s5028_s16] sm:$0xff]  ;;  %v4688_v19 = vld [vmem:[%s5005_s13 + $0x48] sm:$0xff]  ;;  %v4689_v27 = vld [vmem:[%s5005_s13 + $0x50] sm:$0xff] }
  0x15   : > { %v5040_v35 = vld [vmem:[%s5028_s16 + $0x8] sm:$0xff]  ;;  %v4690_v36 = vld [vmem:[%s5005_s13 + $0x58] sm:$0xff]  ;;  %v4691_v44 = vld [vmem:[%s5005_s13 + $0x60] sm:$0xff] }
  0x16   : > { %v4692_v52 = vld [vmem:[%s5005_s13 + $0x68] sm:$0xff]  ;;  %v5051_v54 = vld [vmem:[%s5028_s16 + $0x10] sm:$0xff] }
  0x17   : > { %v4693_v61 = vld [vmem:[%s5005_s13 + $0x70] sm:$0xff] }
  0x23   : > { %4448 = vmatmul.msk.bf16.gmra.mxu0 %vm610_vm0, %v4680_v3 }
  0x33   : > { %4449 = vmatmul.msk.bf16.gmra.mxu0 %vm610_vm0, %v4681_v4 }
  0x43   : > { %4450 = vmatmul.msk.bf16.gmra.mxu0 %vm610_vm0, %v4682_v5  ;;  %v4694_v5 = vld [vmem:[%s5005_s13 + $0x78] sm:$0xff]  ;;  %s4374_s13 = sshll.u32 %s6236_s30, 3 }
  0x53   : > { %4451 = vmatmul.msk.bf16.gmra.mxu0 %vm610_vm0, %v4683_v6 }
  0x63   : > { %4452 = vmatmul.msk.bf16.gmra.mxu0 %vm610_vm0, %v4684_v7  ;;  %v5060_v7 = vld [vmem:[%s5028_s16 + $0x20] sm:$0xff] }
  0x73   : > { %4453 = vmatmul.msk.bf16.gmra.mxu0 %vm610_vm0, %v4685_v8 }
  0x83   : > { %4454 = vmatmul.msk.bf16.gmra.mxu0 %vm610_vm0, %v4686_v9 }
  0x90   : > { %v668_v11 = vpop.f32.mrf.mxu0 }
  0x91   : > { %v748_v12 = vpack.c.bf16 %v668_v11, %v668_v11 }
  0x93   : > { %4455 = vmatmul.msk.bf16.gmra.mxu0 %vm610_vm0, %v4687_v10  ;;  %v787_v15 = vunpack.c.l.b16 %v748_v12 }
  0x98   : > { %v670_v13 = vpop.f32.mrf.mxu0 }
  0x99   : > { %v749_v14 = vpack.c.bf16 %v670_v13, %v670_v13 }
  0x9b   : > { %v788_v16 = vunpack.c.l.b16 %v749_v14  ;;  %v5065_v14 = vld [vmem:[%s5028_s16 + $0x18] sm:$0xff] }
  0x9d   : > { %v789_v17 = vpack.c.b16 %v788_v16, %v787_v15  ;;  %v5070_v16 = vld [vmem:[%s5028_s16 + $0x28] sm:$0xff] }
  0x9f   : > { %802 = vmatpush.bf16.msra.mxu2 %v789_v17 }
  0xa0   : > { %v673_v20 = vpop.f32.mrf.mxu0 }
  0xa1   : > { %v750_v21 = vpack.c.bf16 %v673_v20, %v673_v20 }
  0xa2   : > { %4467 = vmatmul.msk.bf16.vlgmr.msra.gmra.mxu2 %vm791_vm1, %v5031_v18 }
  0xa3   : > { %4456 = vmatmul.msk.bf16.gmra.mxu0 %vm610_vm0, %v4688_v19  ;;  %v816_v24 = vunpack.c.l.b16 %v750_v21 }
  0xa8   : > { %v675_v22 = vpop.f32.mrf.mxu0 }
  0xa9   : > { %v751_v23 = vpack.c.bf16 %v675_v22, %v675_v22 }
  0xab   : > { %v817_v25 = vunpack.c.l.b16 %v751_v23 }
  0xad   : > { %v818_v26 = vpack.c.b16 %v817_v25, %v816_v24 }
  0xaf   : > { %830 = vmatpush.bf16.msrb.mxu2 %v818_v26 }
  0xb0   : > { %v678_v28 = vpop.f32.mrf.mxu0 }
  0xb1   : > { %v752_v29 = vpack.c.bf16 %v678_v28, %v678_v28 }
  0xb2   : > { %4472 = vmatmul.msk.bf16.vlgmr.msrb.gmra.mxu2 %vm791_vm1, %v5040_v35 }
  0xb3   : > { %4457 = vmatmul.msk.bf16.gmra.mxu0 %vm610_vm0, %v4689_v27  ;;  %v844_v32 = vunpack.c.l.b16 %v752_v29  ;;  %v5075_v27 = vld [vmem:[%s5028_s16 + $0x38] sm:$0xff] }
  0xb8   : > { %v680_v30 = vpop.f32.mrf.mxu0 }
  0xb9   : > { %v753_v31 = vpack.c.bf16 %v680_v30, %v680_v30 }
  0xbb   : > { %v845_v33 = vunpack.c.l.b16 %v753_v31  ;;  %v5080_v31 = vld [vmem:[%s5028_s16 + $0x30] sm:$0xff] }
  0xbd   : > { %v846_v34 = vpack.c.b16 %v845_v33, %v844_v32 }
  0xbf   : > { %858 = vmatpush.bf16.msra.mxu2 %v846_v34 }
  0xc0   : > { %v683_v37 = vpop.f32.mrf.mxu0 }
  0xc1   : > { %v754_v38 = vpack.c.bf16 %v683_v37, %v683_v37 }
  0xc2   : > { %4477 = vmatmul.msk.bf16.vlgmr.msra.gmra.mxu2 %vm791_vm1, %v5051_v54 }
  0xc3   : > { %4458 = vmatmul.msk.bf16.gmra.mxu0 %vm610_vm0, %v4690_v36  ;;  %v872_v41 = vunpack.c.l.b16 %v754_v38 }
  0xc8   : > { %v685_v39 = vpop.f32.mrf.mxu0 }
  0xc9   : > { %v755_v40 = vpack.c.bf16 %v685_v39, %v685_v39 }
  0xcb   : > { %v873_v42 = vunpack.c.l.b16 %v755_v40 }
  0xcd   : > { %v874_v43 = vpack.c.b16 %v873_v42, %v872_v41  ;;  %v5085_v41 = vld [vmem:[%s5028_s16 + $0x50] sm:$0xff] }
  0xcf   : > { %886 = vmatpush.bf16.msrb.mxu0 %v874_v43  ;;  %v5090_v43 = vld [vmem:[%s5028_s16 + $0x40] sm:$0xff] }
  0xd0   : > { %v688_v45 = vpop.f32.mrf.mxu0 }
  0xd1   : > { %v756_v46 = vpack.c.bf16 %v688_v45, %v688_v45 }
  0xd3   : > { %4459 = vmatmul.msk.bf16.gmra.mxu0 %vm610_vm0, %v4691_v44  ;;  %v900_v49 = vunpack.c.l.b16 %v756_v46 }
  0xd8   : > { %v690_v47 = vpop.f32.mrf.mxu0 }
  0xd9   : > { %v757_v48 = vpack.c.bf16 %v690_v47, %v690_v47 }
  0xdb   : > { %v901_v50 = vunpack.c.l.b16 %v757_v48 }
  0xdd   : > { %v902_v51 = vpack.c.b16 %v901_v50, %v900_v49 }
  0xdf   : > { %914 = vmatpush.bf16.msrb.mxu2 %v902_v51 }
  0xe0   : > { %v693_v53 = vpop.f32.mrf.mxu0 }
  0xe1   : > { %v758_v55 = vpack.c.bf16 %v693_v53, %v693_v53 }
  0xe2   : > { %4487 = vmatmul.msk.bf16.vlgmr.msrb.gmra.mxu2 %vm791_vm1, %v5060_v7 }
  0xe3   : > { %4460 = vmatmul.msk.bf16.gmra.mxu0 %vm610_vm0, %v4692_v52  ;;  %v928_v58 = vunpack.c.l.b16 %v758_v55 }
  0xe8   : > { %v695_v56 = vpop.f32.mrf.mxu0 }
  0xe9   : > { %v759_v57 = vpack.c.bf16 %v695_v56, %v695_v56 }
  0xeb   : > { %v929_v59 = vunpack.c.l.b16 %v759_v57  ;;  %v5095_v57 = vld [vmem:[%s5028_s16 + $0x48] sm:$0xff] }
  0xed   : > { %v930_v60 = vpack.c.b16 %v929_v59, %v928_v58 }
  0xef   : > { %942 = vmatpush.bf16.msra.mxu3 %v930_v60 }
  0xf0   : > { %v698_v62 = vpop.f32.mrf.mxu0 }
  0xf1   : > { %v760_v63 = vpack.c.bf16 %v698_v62, %v698_v62 }
  0xf2   : > { %4492 = vmatmul.msk.bf16.vlgmr.msra.gmra.mxu3 %vm791_vm1, %v5070_v16 }
  0xf3   : > { %4461 = vmatmul.msk.bf16.gmra.mxu0 %vm610_vm0, %v4693_v61  ;;  %v956_v2 = vunpack.c.l.b16 %v760_v63 }
  0xf8   : > { %v700_v0 = vpop.f32.mrf.mxu0 }
  0xf9   : > { %v761_v1 = vpack.c.bf16 %v700_v0, %v700_v0 }
  0xfb   : > { %v957_v3 = vunpack.c.l.b16 %v761_v1 }
  0xfd   : > { %v958_v4 = vpack.c.b16 %v957_v3, %v956_v2  ;;  %v4698_v2 = vld [vmem:[%s6191_s4 + $0x8] sm:$0xff] }
  0xff   : > { %970 = vmatpush.bf16.msra.mxu1 %v958_v4 }
 0x100   : > { %v703_v6 = vpop.f32.mrf.mxu0 }
 0x101   : > { %v762_v8 = vpack.c.bf16 %v703_v6, %v703_v6  ;;  %v4697_v6 = vld [vmem:[%s6191_s4] sm:$0xff] }
 0x102   : > { %4497 = vmatmul.msk.bf16.vlgmr.msra.gmra.mxu1 %vm791_vm1, %v5080_v31 }
 0x103   : > { %4462 = vmatmul.msk.bf16.gmra.mxu0 %vm610_vm0, %v4694_v5  ;;  %v984_v11 = vunpack.c.l.b16 %v762_v8  ;;  %v5103_v5 = vld [vmem:[%s5028_s16 + $0x68] sm:$0xff] }
 0x108   : > { %v705_v9 = vpop.f32.mrf.mxu0 }
 0x109   : > { %v763_v10 = vpack.c.bf16 %v705_v9, %v705_v9  ;;  %v5111_v9 = vld [vmem:[%s5028_s16 + $0x58] sm:$0xff] }
 0x10b   : > { %v985_v12 = vunpack.c.l.b16 %v763_v10  ;;  %v5116_v10 = vld [vmem:[%s6190_s3] ss:$0 sm:$0xff] }
 0x10d   : > { %v986_v13 = vpack.c.b16 %v985_v12, %v984_v11 }
 0x10f   : > { %998 = vmatpush.bf16.msra.mxu2 %v986_v13 }
 0x110   : > { %v708_v15 = vpop.f32.mrf.mxu0 }
 0x111   : > { %v764_v17 = vpack.c.bf16 %v708_v15, %v708_v15 }
 0x112   : > { %4502 = vmatmul.msk.bf16.vlgmr.msra.gmra.mxu2 %vm791_vm1, %v5075_v27 }
 0x113   : > { %4482 = vmatmul.msk.bf16.vlgmr.msrb.gmra.mxu0 %vm791_vm1, %v5065_v14  ;;  %v1012_v21 = vunpack.c.l.b16 %v764_v17 }
 0x118   : > { %v710_v19 = vpop.f32.mrf.mxu0 }
 0x119   : > { %v765_v20 = vpack.c.bf16 %v710_v19, %v710_v19 }
 0x11b   : > { %v1013_v22 = vunpack.c.l.b16 %v765_v20 }
 0x11d   : > { %v1014_v23 = vpack.c.b16 %v1013_v22, %v1012_v21 }
 0x11f   : > { %1026 = vmatpush.bf16.msrb.mxu3 %v1014_v23 }
 0x120   : > { %v713_v24 = vpop.f32.mrf.mxu0 }
 0x121   : > { %v766_v25 = vpack.c.bf16 %v713_v24, %v713_v24 }
 0x122   : > { %4507 = vmatmul.msk.bf16.vlgmr.msrb.gmra.mxu3 %vm791_vm1, %v5090_v43 }
 0x123   : > { %v1040_v29 = vunpack.c.l.b16 %v766_v25 }
 0x125   : > { %v804_v60 = vpop.f32.mrf.mxu2 }
 0x126   : > { %v1233_v13 = vadd.f32 %v5116_v10, %v804_v60 }
 0x128   : > { %v715_v26 = vpop.f32.mrf.mxu0  ;;  %v1265_v22 = vmax.f32 %v1233_v13, 0.0 }
 0x129   : > { %v767_v28 = vpack.c.bf16 %v715_v26, %v715_v26 }
 0x12b   : > { %v1041_v30 = vunpack.c.l.b16 %v767_v28 }
 0x12d   : > { %v1042_v32 = vpack.c.b16 %v1041_v30, %v1040_v29  ;;  %v806_v4 = vpop.f32.mrf.mxu2 }
 0x12e   : > { %v1234_v15 = vadd.f32 %v5116_v10, %v806_v4 }
 0x12f   : > { %1054 = vmatpush.bf16.msrb.mxu1 %v1042_v32 }
 0x130   : > { %v718_v33 = vpop.f32.mrf.mxu0  ;;  %v1266_v23 = vmax.f32 %v1234_v15, 0.0 }
 0x131   : > { %v768_v34 = vpack.c.bf16 %v718_v33, %v718_v33 }
 0x132   : > { %4512 = vmatmul.msk.bf16.vlgmr.msrb.gmra.mxu1 %vm791_vm1, %v5095_v57  ;;  %v1297_v25 = vpack.c.bf16 %v1266_v23, %v1265_v22 }
 0x133   : > { %v1068_v38 = vunpack.c.l.b16 %v768_v34 }
 0x135   : > { %v832_v12 = vpop.f32.mrf.mxu2 }
 0x136   : > { %v1235_v30 = vadd.f32 %v5116_v10, %v832_v12 }
 0x138   : > { %v720_v36 = vpop.f32.mrf.mxu0 }
 0x139   : > { %v769_v37 = vpack.c.bf16 %v720_v36, %v720_v36 }
 0x13b   : > { %v1069_v39 = vunpack.c.l.b16 %v769_v37 }
 0x13d   : > { %v1070_v40 = vpack.c.b16 %v1069_v39, %v1068_v38  ;;  %v834_v28 = vpop.f32.mrf.mxu2  ;;  %v1267_v39 = vmax.f32 %v1235_v30, 0.0 }
 0x13e   : > { %v1236_v32 = vadd.f32 %v5116_v10, %v834_v28 }
 0x13f   : > { %1082 = vmatpush.bf16.msrb.mxu2 %v1070_v40 }
 0x140   : > { %v723_v42 = vpop.f32.mrf.mxu0  ;;  %v1268_v40 = vmax.f32 %v1236_v32, 0.0 }
 0x141   : > { %v770_v44 = vpack.c.bf16 %v723_v42, %v723_v42  ;;  %v5126_v42 = vld [vmem:[%s5028_s16 + $0x60] sm:$0xff] }
 0x142   : > { %4517 = vmatmul.msk.bf16.vlgmr.msrb.gmra.mxu2 %vm791_vm1, %v5085_v41 }
 0x143   : > { %v1096_v47 = vunpack.c.l.b16 %v770_v44 }
 0x145   : > { %v860_v37 = vpop.f32.mrf.mxu2 }
 0x148   : > { %v725_v45 = vpop.f32.mrf.mxu0 }
 0x149   : > { %v771_v46 = vpack.c.bf16 %v725_v45, %v725_v45  ;;  %v1298_v45 = vpack.c.bf16 %v1268_v40, %v1267_v39 }
 0x14b   : > { %v1097_v48 = vunpack.c.l.b16 %v771_v46 }
 0x14d   : > { %v1098_v49 = vpack.c.b16 %v1097_v48, %v1096_v47  ;;  %v862_v46 = vpop.f32.mrf.mxu2  ;;  %v1237_v47 = vadd.f32 %v5116_v10, %v860_v37 }
 0x14e   : > { %v1238_v48 = vadd.f32 %v5116_v10, %v862_v46 }
 0x14f   : > { %1110 = vmatpush.bf16.msra.mxu3 %v1098_v49 }
 0x150   : > { %v728_v50 = vpop.f32.mrf.mxu0 }
 0x151   : > { %v772_v51 = vpack.c.bf16 %v728_v50, %v728_v50  ;;  %v1269_v50 = vmax.f32 %v1237_v47, 0.0 }
 0x152   : > { %4522 = vmatmul.msk.bf16.vlgmr.msra.gmra.mxu3 %vm791_vm1, %v5111_v9 }
 0x153   : > { %v1124_v55 = vunpack.c.l.b16 %v772_v51  ;;  %v1270_v51 = vmax.f32 %v1238_v48, 0.0 }
 0x158   : > { %v730_v52 = vpop.f32.mrf.mxu0 }
 0x159   : > { %v773_v53 = vpack.c.bf16 %v730_v52, %v730_v52  ;;  %v1299_v52 = vpack.c.bf16 %v1270_v51, %v1269_v50 }
 0x15b   : > { %v1125_v56 = vunpack.c.l.b16 %v773_v53  ;;  %v5135_v53 = vld [vmem:[%s5028_s16 + $0x70] sm:$0xff] }
 0x15d   : > { %v1126_v58 = vpack.c.b16 %v1125_v56, %v1124_v55 }
 0x15f   : > { %1138 = vmatpush.bf16.msra.mxu1 %v1126_v58 }
 0x160   : > { %v733_v59 = vpop.f32.mrf.mxu0 }
 0x161   : > { %v774_v61 = vpack.c.bf16 %v733_v59, %v733_v59 }
 0x162   : > { %4527 = vmatmul.msk.bf16.vlgmr.msra.gmra.mxu1 %vm791_vm1, %v5126_v42 }
 0x163   : > { %v1152_v0 = vunpack.c.l.b16 %v774_v61 }
 0x165   : > { %v916_v59 = vpop.f32.mrf.mxu2 }
 0x168   : > { %v735_v62 = vpop.f32.mrf.mxu0 }
 0x169   : > { %v775_v63 = vpack.c.bf16 %v735_v62, %v735_v62 }
 0x16b   : > { %v1153_v1 = vunpack.c.l.b16 %v775_v63 }
 0x16d   : > { %v1154_v3 = vpack.c.b16 %v1153_v1, %v1152_v0  ;;  %v918_v63 = vpop.f32.mrf.mxu2  ;;  %v1241_v0 = vadd.f32 %v5116_v10, %v916_v59 }
 0x16e   : > { %v1242_v1 = vadd.f32 %v5116_v10, %v918_v63 }
 0x16f   : > { %1166 = vmatpush.bf16.msra.mxu2 %v1154_v3  ;;  %v1273_v3 = vmax.f32 %v1241_v0, 0.0 }
 0x170   : > { %v738_v8 = vpop.f32.mrf.mxu0  ;;  %v1274_v4 = vmax.f32 %v1242_v1, 0.0 }
 0x171   : > { %v776_v11 = vpack.c.bf16 %v738_v8, %v738_v8 }
 0x172   : > { %4532 = vmatmul.msk.bf16.vlgmr.msra.gmra.mxu2 %vm791_vm1, %v5103_v5 }
 0x173   : > { %1383 = vmatpush.bf16.msrb.mxu2 %v4698_v2  ;;  %v1180_v19 = vunpack.c.l.b16 %v776_v11 }
 0x175   : > { %v944_v2 = vpop.f32.mrf.mxu3 }
 0x176   : > { %v1243_v11 = vadd.f32 %v5116_v10, %v944_v2 }
 0x177   : > { %1384 = vmatpush.bf16.msrb.mxu2 %v4697_v6  ;;  %v1301_v6 = vpack.c.bf16 %v1274_v4, %v1273_v3 }
 0x178   : > { %v740_v17 = vpop.f32.mrf.mxu0  ;;  %v1275_v15 = vmax.f32 %v1243_v11, 0.0 }
 0x179   : > { %v777_v20 = vpack.c.bf16 %v740_v17, %v740_v17 }
 0x17b   : > { %v1181_v21 = vunpack.c.l.b16 %v777_v20 }
 0x17d   : > { %v1182_v24 = vpack.c.b16 %v1181_v21, %v1180_v19  ;;  %v946_v8 = vpop.f32.mrf.mxu3 }
 0x17e   : > { %v1244_v12 = vadd.f32 %v5116_v10, %v946_v8 }
 0x17f   : > { %1194 = vmatpush.bf16.msrb.mxu3 %v1182_v24  ;;  %v972_v13 = vpop.f32.mrf.mxu1 }
 0x180   : > { %v743_v26 = vpop.f32.mrf.mxu0  ;;  %v1276_v17 = vmax.f32 %v1244_v12, 0.0  ;;  %v1245_v22 = vadd.f32 %v5116_v10, %v972_v13 }
 0x181   : > { %v778_v29 = vpack.c.bf16 %v743_v26, %v743_v26 }
 0x182   : > { %4551 = vmatmul.msk.bf16.vlgmr.msrb.gmra.mxu2 %vm610_vm0, %v1297_v25  ;;  %4537 = vmatmul.msk.bf16.vlgmr.msrb.gmra.mxu3 %vm791_vm1, %v5135_v53  ;;  %v1302_v20 = vpack.c.bf16 %v1276_v17, %v1275_v15  ;;  %v1277_v25 = vmax.f32 %v1245_v22, 0.0  ;;  %v5169_v17 = vld [vmem:[%s5028_s16 + $0x78] sm:$0xff]  ;;  %s447_s16 = scalar_lea.vmem %s6199_s12, %s4374_s13 }
 0x183   : > { %v1208_v34 = vunpack.c.l.b16 %v778_v29 }
 0x187   : > { %v974_v21 = vpop.f32.mrf.mxu1 }
 0x188   : > { %v745_v33 = vpop.f32.mrf.mxu0  ;;  %v1246_v23 = vadd.f32 %v5116_v10, %v974_v21 }
 0x189   : > { %v779_v36 = vpack.c.bf16 %v745_v33, %v745_v33 }
 0x18a   : > { %v1278_v26 = vmax.f32 %v1246_v23, 0.0 }
 0x18b   : > { %v1209_v38 = vunpack.c.l.b16 %v779_v36 }
 0x18c   : > { %v1303_v28 = vpack.c.bf16 %v1278_v26, %v1277_v25 }
 0x18d   : > { %v1210_v44 = vpack.c.b16 %v1209_v38, %v1208_v34 }
 0x18f   : > { %1222 = vmatpush.bf16.msrb.mxu1 %v1210_v44 }
 0x190   : > { %v888_v49 = vpop.f32.mrf.mxu0 }
 0x191   : > { %v1239_v56 = vadd.f32 %v5116_v10, %v888_v49 }
 0x192   : > { %4552 = vmatmul.msk.bf16.gmra.mxu2 %vm610_vm0, %v1298_v45  ;;  %4542 = vmatmul.msk.bf16.vlgmr.msrb.gmra.mxu1 %vm791_vm1, %v5169_v17 }
 0x193   : > { %v1271_v60 = vmax.f32 %v1239_v56, 0.0 }
 0x195   : > { %v1000_v19 = vpop.f32.mrf.mxu2 }
 0x196   : > { %v1247_v30 = vadd.f32 %v5116_v10, %v1000_v19 }
 0x198   : > { %v890_v55 = vpop.f32.mrf.mxu0  ;;  %v1279_v34 = vmax.f32 %v1247_v30, 0.0 }
 0x199   : > { %v1240_v58 = vadd.f32 %v5116_v10, %v890_v55 }
 0x19b   : > { %v1272_v61 = vmax.f32 %v1240_v58, 0.0 }
 0x19d   : > { %v1300_v62 = vpack.c.bf16 %v1272_v61, %v1271_v60  ;;  %v1002_v24 = vpop.f32.mrf.mxu2 }
 0x19e   : > { %v1248_v32 = vadd.f32 %v5116_v10, %v1002_v24 }
 0x1a0   : > { %v1280_v36 = vmax.f32 %v1248_v32, 0.0 }
 0x1a2   : > { %4553 = vmatmul.msk.bf16.gmra.mxu2 %vm610_vm0, %v1299_v52  ;;  %v1304_v38 = vpack.c.bf16 %v1280_v36, %v1279_v34 }
 0x1a5   : > { %v1028_v33 = vpop.f32.mrf.mxu3 }
 0x1a6   : > { %v1249_v44 = vadd.f32 %v5116_v10, %v1028_v33 }
 0x1a8   : > { %v1281_v47 = vmax.f32 %v1249_v44, 0.0 }
 0x1ad   : > { %v1030_v40 = vpop.f32.mrf.mxu3 }
 0x1ae   : > { %v1250_v45 = vadd.f32 %v5116_v10, %v1030_v40 }
 0x1af   : > { %v1056_v46 = vpop.f32.mrf.mxu1 }
 0x1b0   : > { %v1282_v49 = vmax.f32 %v1250_v45, 0.0  ;;  %v1251_v61 = vadd.f32 %v5116_v10, %v1056_v46 }
 0x1b2   : > { %4554 = vmatmul.msk.bf16.gmra.mxu2 %vm610_vm0, %v1300_v62  ;;  %v1305_v55 = vpack.c.bf16 %v1282_v49, %v1281_v47  ;;  %v1283_v63 = vmax.f32 %v1251_v61, 0.0 }
 0x1b7   : > { %v1058_v60 = vpop.f32.mrf.mxu1 }
 0x1b8   : > { %v1252_v62 = vadd.f32 %v5116_v10, %v1058_v60 }
 0x1ba   : > { %v1284_v1 = vmax.f32 %v1252_v62, 0.0 }
 0x1c2   : > { %4555 = vmatmul.msk.bf16.gmra.mxu2 %vm610_vm0, %v1301_v6  ;;  %v1306_v6 = vpack.c.bf16 %v1284_v1, %v1283_v63 }
 0x1c5   : > { %v1084_v29 = vpop.f32.mrf.mxu2 }
 0x1c6   : > { %v1253_v13 = vadd.f32 %v5116_v10, %v1084_v29 }
 0x1cd   : > { %v1086_v37 = vpop.f32.mrf.mxu2 }
 0x1ce   : > { %v1254_v15 = vadd.f32 %v5116_v10, %v1086_v37 }
 0x1d0   : > { %v1286_v21 = vmax.f32 %v1254_v15, 0.0 }
 0x1d2   : > { %4556 = vmatmul.msk.bf16.gmra.mxu2 %vm610_vm0, %v1302_v20  ;;  %v1285_v20 = vmax.f32 %v1253_v13, 0.0 }
 0x1d4   : > { %v1307_v25 = vpack.c.bf16 %v1286_v21, %v1285_v20 }
 0x1d5   : > { %v1112_v19 = vpop.f32.mrf.mxu3 }
 0x1d6   : > { %v1255_v32 = vadd.f32 %v5116_v10, %v1112_v19 }
 0x1d8   : > { %v1287_v36 = vmax.f32 %v1255_v32, 0.0 }
 0x1dd   : > { %v1114_v29 = vpop.f32.mrf.mxu3 }
 0x1de   : > { %v1256_v33 = vadd.f32 %v5116_v10, %v1114_v29 }
 0x1df   : > { %v1140_v34 = vpop.f32.mrf.mxu1 }
 0x1e2   : > { %4557 = vmatmul.msk.bf16.gmra.mxu2 %vm610_vm0, %v1303_v28 }
 0x1e7   : > { %v1142_v49 = vpop.f32.mrf.mxu1 }
 0x1f2   : > { %4558 = vmatmul.msk.bf16.gmra.mxu2 %vm610_vm0, %v1304_v38  ;;  %v1288_v38 = vmax.f32 %v1256_v33, 0.0 }
 0x1f4   : > { %v1308_v45 = vpack.c.bf16 %v1288_v38, %v1287_v36 }
 0x1f5   : > { %v1168_v39 = vpop.f32.mrf.mxu2 }
 0x1f6   : > { %v1259_v48 = vadd.f32 %v5116_v10, %v1168_v39 }
 0x1f8   : > { %v1291_v52 = vmax.f32 %v1259_v48, 0.0 }
 0x1fd   : > { %v1170_v50 = vpop.f32.mrf.mxu2 }
 0x1fe   : > { %v1260_v51 = vadd.f32 %v5116_v10, %v1170_v50  ;;  %v1257_v50 = vadd.f32 %v5116_v10, %v1140_v34 }
 0x200   : > { %v1292_v56 = vmax.f32 %v1260_v51, 0.0  ;;  %v1258_v51 = vadd.f32 %v5116_v10, %v1142_v49 }
 0x202   : > { %v5158_v58 = vpack.c.bf16 %v1292_v56, %v1291_v52  ;;  %4559 = vmatmul.msk.bf16.gmra.mxu2 %vm610_vm0, %v1305_v55  ;;  %v1289_v52 = vmax.f32 %v1257_v50, 0.0  ;;  %v1290_v55 = vmax.f32 %v1258_v51, 0.0 }
 0x204   : > { %v1309_v61 = vpack.c.bf16 %v1290_v55, %v1289_v52 }
 0x205   : > { %v1386_v59 = vpop.f32.mrf.mxu2 }
 0x206   : > { %v1466_v0 = vpack.c.bf16 %v1386_v59, %v1386_v59 }
 0x208   : > { %v1500_v4 = vunpack.c.l.b16 %v1466_v0 }
 0x20d   : > { %v1388_v2 = vpop.f32.mrf.mxu2 }
 0x20e   : > { %v1467_v3 = vpack.c.bf16 %v1388_v2, %v1388_v2 }
 0x210   : > { %v1501_v8 = vunpack.c.l.b16 %v1467_v3 }
 0x212   : > { %v1502_v11 = vpack.c.b16 %v1501_v8, %v1500_v4  ;;  %4560 = vmatmul.msk.bf16.gmra.mxu2 %vm610_vm0, %v1306_v6 }
 0x214   : > { %1511 = vmatpush.bf16.msra.mxu3 %v1502_v11 }
 0x215   : > { %v1391_v12 = vpop.f32.mrf.mxu2 }
 0x216   : > { %v1468_v22 = vpack.c.bf16 %v1391_v12, %v1391_v12 }
 0x217   : > { %4567 = vmatmul.msk.bf16.vlgmr.msra.gmra.mxu3 %vm791_vm1, %v5031_v18 }
 0x218   : > { %v1520_v26 = vunpack.c.l.b16 %v1468_v22 }
 0x21d   : > { %v1393_v23 = vpop.f32.mrf.mxu2 }
 0x21e   : > { %v1469_v24 = vpack.c.bf16 %v1393_v23, %v1393_v23 }
 0x220   : > { %v1521_v28 = vunpack.c.l.b16 %v1469_v24 }
 0x222   : > { %v1522_v30 = vpack.c.b16 %v1521_v28, %v1520_v26  ;;  %4561 = vmatmul.msk.bf16.gmra.mxu2 %vm610_vm0, %v1307_v25 }
 0x224   : > { %1531 = vmatpush.bf16.msra.mxu1 %v1522_v30 }
 0x225   : > { %v1396_v18 = vpop.f32.mrf.mxu2 }
 0x226   : > { %v1470_v37 = vpack.c.bf16 %v1396_v18, %v1396_v18 }
 0x227   : > { %4568 = vmatmul.msk.bf16.vlgmr.msra.gmra.mxu1 %vm791_vm1, %v5040_v35 }
 0x228   : > { %v1540_v44 = vunpack.c.l.b16 %v1470_v37 }
 0x22d   : > { %v1398_v39 = vpop.f32.mrf.mxu2 }
 0x22e   : > { %v1471_v40 = vpack.c.bf16 %v1398_v39, %v1398_v39 }
 0x230   : > { %v1541_v46 = vunpack.c.l.b16 %v1471_v40 }
 0x232   : > { %v1542_v47 = vpack.c.b16 %v1541_v46, %v1540_v44  ;;  %4562 = vmatmul.msk.bf16.gmra.mxu2 %vm610_vm0, %v1308_v45 }
 0x234   : > { %1551 = vmatpush.bf16.msrb.mxu3 %v1542_v47 }
 0x235   : > { %v1401_v48 = vpop.f32.mrf.mxu2 }
 0x236   : > { %v1472_v35 = vpack.c.bf16 %v1401_v48, %v1401_v48 }
 0x237   : > { %4569 = vmatmul.msk.bf16.vlgmr.msrb.gmra.mxu3 %vm791_vm1, %v5051_v54  ;;  %v1196_v54 = vpop.f32.mrf.mxu3 }
 0x238   : > { %v1560_v60 = vunpack.c.l.b16 %v1472_v35  ;;  %v1261_v13 = vadd.f32 %v5116_v10, %v1196_v54 }
 0x23a   : > { %v1293_v15 = vmax.f32 %v1261_v13, 0.0 }
 0x23d   : > { %v1403_v56 = vpop.f32.mrf.mxu2 }
 0x23e   : > { %v1473_v59 = vpack.c.bf16 %v1403_v56, %v1403_v56 }
 0x23f   : > { %v1198_v12 = vpop.f32.mrf.mxu3 }
 0x240   : > { %v1561_v62 = vunpack.c.l.b16 %v1473_v59 }
 0x242   : > { %v1562_v63 = vpack.c.b16 %v1561_v62, %v1560_v60  ;;  %4563 = vmatmul.msk.bf16.gmra.mxu2 %vm610_vm0, %v1309_v61 }
 0x244   : > { %1571 = vmatpush.bf16.msrb.mxu1 %v1562_v63 }
 0x245   : > { %v1406_v0 = vpop.f32.mrf.mxu2 }
 0x246   : > { %v1474_v1 = vpack.c.bf16 %v1406_v0, %v1406_v0 }
 0x247   : > { %4570 = vmatmul.msk.bf16.vlgmr.msrb.gmra.mxu1 %vm791_vm1, %v5065_v14  ;;  %v1262_v14 = vadd.f32 %v5116_v10, %v1198_v12 }
 0x248   : > { %v1580_v4 = vunpack.c.l.b16 %v1474_v1 }
 0x249   : > { %v1294_v20 = vmax.f32 %v1262_v14, 0.0 }
 0x24b   : > { %v1311_v24 = vpack.c.bf16 %v1294_v20, %v1293_v15 }
 0x24d   : > { %v1408_v2 = vpop.f32.mrf.mxu2 }
 0x24e   : > { %v1475_v3 = vpack.c.bf16 %v1408_v2, %v1408_v2 }
 0x250   : > { %v1581_v6 = vunpack.c.l.b16 %v1475_v3 }
 0x252   : > { %v1582_v8 = vpack.c.b16 %v1581_v6, %v1580_v4  ;;  %4564 = vmatmul.msk.bf16.gmra.mxu2 %vm610_vm0, %v5158_v58 }
 0x254   : > { %1591 = vmatpush.bf16.msra.mxu3 %v1582_v8 }
 0x255   : > { %v1411_v11 = vpop.f32.mrf.mxu2 }
 0x256   : > { %v1476_v19 = vpack.c.bf16 %v1411_v11, %v1411_v11 }
 0x257   : > { %4571 = vmatmul.msk.bf16.vlgmr.msra.gmra.mxu3 %vm791_vm1, %v5060_v7 }
 0x258   : > { %v1600_v23 = vunpack.c.l.b16 %v1476_v19 }
 0x25d   : > { %v1413_v21 = vpop.f32.mrf.mxu2 }
 0x25e   : > { %v1477_v22 = vpack.c.bf16 %v1413_v21, %v1413_v21 }
 0x260   : > { %v1601_v25 = vunpack.c.l.b16 %v1477_v22 }
 0x262   : > { %v1602_v26 = vpack.c.b16 %v1601_v25, %v1600_v23  ;;  %4565 = vmatmul.msk.bf16.gmra.mxu2 %vm610_vm0, %v1311_v24 }
 0x264   : > { %1611 = vmatpush.bf16.msra.mxu1 %v1602_v26  ;;  %v5215_v26 = vld [vmem:[%s6192_s5] ss:$0 sm:$0xff] }
 0x265   : > { %v1416_v58 = vpop.f32.mrf.mxu2 }
 0x266   : > { %v1478_v7 = vpack.c.bf16 %v1416_v58, %v1416_v58 }
 0x267   : > { %4572 = vmatmul.msk.bf16.vlgmr.msra.gmra.mxu1 %vm791_vm1, %v5070_v16 }
 0x268   : > { %v1620_v18 = vunpack.c.l.b16 %v1478_v7 }
 0x26d   : > { %v1418_v28 = vpop.f32.mrf.mxu2 }
 0x26e   : > { %v1479_v30 = vpack.c.bf16 %v1418_v28, %v1418_v28 }
 0x270   : > { %v1621_v29 = vunpack.c.l.b16 %v1479_v30 }
 0x272   : > { %v1622_v32 = vpack.c.b16 %v1621_v29, %v1620_v18 }
 0x274   : > { %1631 = vmatpush.bf16.msrb.mxu3 %v1622_v32 }
 0x275   : > { %v1421_v33 = vpop.f32.mrf.mxu2 }
 0x276   : > { %v1480_v34 = vpack.c.bf16 %v1421_v33, %v1421_v33 }
 0x277   : > { %4573 = vmatmul.msk.bf16.vlgmr.msrb.gmra.mxu3 %vm791_vm1, %v5080_v31  ;;  %v1224_v31 = vpop.f32.mrf.mxu1 }
 0x278   : > { %v1640_v38 = vunpack.c.l.b16 %v1480_v34 }
 0x27d   : > { %v1423_v36 = vpop.f32.mrf.mxu2 }
 0x27e   : > { %v1481_v37 = vpack.c.bf16 %v1423_v36, %v1423_v36 }
 0x27f   : > { %v1226_v59 = vpop.f32.mrf.mxu1 }
 0x280   : > { %v1641_v39 = vunpack.c.l.b16 %v1481_v37  ;;  %v1264_v61 = vadd.f32 %v5116_v10, %v1226_v59 }
 0x282   : > { %v1642_v40 = vpack.c.b16 %v1641_v39, %v1640_v38  ;;  %v1296_v63 = vmax.f32 %v1264_v61, 0.0 }
 0x284   : > { %1651 = vmatpush.bf16.msrb.mxu1 %v1642_v40 }
 0x285   : > { %v1426_v44 = vpop.f32.mrf.mxu2 }
 0x286   : > { %v1482_v16 = vpack.c.bf16 %v1426_v44, %v1426_v44 }
 0x287   : > { %4574 = vmatmul.msk.bf16.vlgmr.msrb.gmra.mxu1 %vm791_vm1, %v5075_v27  ;;  %v1263_v27 = vadd.f32 %v5116_v10, %v1224_v31 }
 0x288   : > { %v1660_v47 = vunpack.c.l.b16 %v1482_v16 }
 0x289   : > { %v1295_v62 = vmax.f32 %v1263_v27, 0.0 }
 0x28b   : > { %v1312_v54 = vpack.c.bf16 %v1296_v63, %v1295_v62 }
 0x28d   : > { %v1428_v45 = vpop.f32.mrf.mxu2  ;;  %4566 = vmatmul.msk.bf16.gmra.mxu2 %vm610_vm0, %v1312_v54 }
 0x28e   : > { %v1483_v46 = vpack.c.bf16 %v1428_v45, %v1428_v45 }
 0x290   : > { %v1661_v48 = vunpack.c.l.b16 %v1483_v46  ;;  %v4700_v46 = vld [vmem:[%s6193_s6 + $0x8] sm:$0xff] }
 0x292   : > { %v1662_v49 = vpack.c.b16 %v1661_v48, %v1660_v47 }
 0x294   : > { %1671 = vmatpush.bf16.msra.mxu3 %v1662_v49 }
 0x295   : > { %v1431_v50 = vpop.f32.mrf.mxu2 }
 0x296   : > { %v1484_v51 = vpack.c.bf16 %v1431_v50, %v1431_v50 }
 0x297   : > { %4575 = vmatmul.msk.bf16.vlgmr.msra.gmra.mxu3 %vm791_vm1, %v5090_v43 }
 0x298   : > { %v1680_v55 = vunpack.c.l.b16 %v1484_v51 }
 0x29a   : > { %v1513_v24 = vpop.f32.mrf.mxu3 }
 0x29d   : > { %v1433_v52 = vpop.f32.mrf.mxu2 }
 0x29e   : > { %v1485_v35 = vpack.c.bf16 %v1433_v52, %v1433_v52 }
 0x2a0   : > { %v1681_v56 = vunpack.c.l.b16 %v1485_v35 }
 0x2a2   : > { %v1682_v60 = vpack.c.b16 %v1681_v56, %v1680_v55  ;;  %v1515_v58 = vpop.f32.mrf.mxu3 }
 0x2a3   : > { %v1823_v7 = vadd.f32 %v5215_v26, %v1515_v58 }
 0x2a4   : > { %1691 = vmatpush.bf16.msra.mxu1 %v1682_v60  ;;  %v1533_v33 = vpop.f32.mrf.mxu1 }
 0x2a5   : > { %v1436_v0 = vpop.f32.mrf.mxu2  ;;  %2754 = vmatpush.msra.mxu0 %v1823_v7  ;;  %v1824_v37 = vadd.f32 %v5215_v26, %v1533_v33 }
 0x2a6   : > { %v1486_v43 = vpack.c.bf16 %v1436_v0, %v1436_v0 }
 0x2a7   : > { %4576 = vmatmul.msk.bf16.vlgmr.msra.gmra.mxu1 %vm791_vm1, %v5095_v57 }
 0x2a8   : > { %v1700_v3 = vunpack.c.l.b16 %v1486_v43 }
 0x2ac   : > { %v1535_v36 = vpop.f32.mrf.mxu1 }
 0x2ad   : > { %v1438_v1 = vpop.f32.mrf.mxu2  ;;  %v1825_v38 = vadd.f32 %v5215_v26, %v1535_v36 }
 0x2ae   : > { %v1487_v2 = vpack.c.bf16 %v1438_v1, %v1438_v1 }
 0x2af   : > { %v1855_v52 = vpack.c.bf16 %v1825_v38, %v1824_v37 }
 0x2b0   : > { %v1701_v4 = vunpack.c.l.b16 %v1487_v2 }
 0x2b2   : > { %v1702_v6 = vpack.c.b16 %v1701_v4, %v1700_v3 }
 0x2b4   : > { %1711 = vmatpush.bf16.msrb.mxu3 %v1702_v6 }
 0x2b5   : > { %v1441_v8 = vpop.f32.mrf.mxu2 }
 0x2b6   : > { %v1488_v10 = vpack.c.bf16 %v1441_v8, %v1441_v8 }
 0x2b7   : > { %4577 = vmatmul.msk.bf16.vlgmr.msrb.gmra.mxu3 %vm791_vm1, %v5085_v41 }
 0x2b8   : > { %v1720_v13 = vunpack.c.l.b16 %v1488_v10 }
 0x2ba   : > { %v1553_v48 = vpop.f32.mrf.mxu3 }
 0x2bb   : > { %v5234_v55 = vadd.f32 %v5215_v26, %v1553_v48 }
 0x2bd   : > { %v1443_v11 = vpop.f32.mrf.mxu2 }
 0x2be   : > { %v1489_v12 = vpack.c.bf16 %v1443_v11, %v1443_v11 }
 0x2c0   : > { %v1721_v14 = vunpack.c.l.b16 %v1489_v12 }
 0x2c2   : > { %v1722_v15 = vpack.c.b16 %v1721_v14, %v1720_v13  ;;  %v1555_v49 = vpop.f32.mrf.mxu3 }
 0x2c3   : > { %v5237_v56 = vadd.f32 %v5215_v26, %v1555_v49 }
 0x2c4   : > { %1731 = vmatpush.bf16.msrb.mxu1 %v1722_v15  ;;  %v1573_v59 = vpop.f32.mrf.mxu1 }
 0x2c5   : > { %v1446_v57 = vpop.f32.mrf.mxu2  ;;  %v5243_v62 = vadd.f32 %v5215_v26, %v1573_v59 }
 0x2c6   : > { %v1490_v19 = vpack.c.bf16 %v1446_v57, %v1446_v57 }
 0x2c7   : > { %4578 = vmatmul.msk.bf16.vlgmr.msrb.gmra.mxu1 %vm791_vm1, %v5111_v9  ;;  %v1822_v9 = vadd.f32 %v5215_v26, %v1513_v24 }
 0x2c8   : > { %v1740_v22 = vunpack.c.l.b16 %v1490_v19 }
 0x2c9   : > { %2755 = vmatpush.msra.mxu0 %v1822_v9  ;;  %v1854_v50 = vpack.c.bf16 %v1823_v7, %v1822_v9 }
 0x2cb   : > { %2809 = vmatpush.msrb.mxu0 %v1825_v38 }
 0x2cc   : > { %v1575_v61 = vpop.f32.mrf.mxu1 }
 0x2cd   : > { %v1448_v20 = vpop.f32.mrf.mxu2  ;;  %2810 = vmatpush.msrb.mxu0 %v1824_v37  ;;  %v5246_v63 = vadd.f32 %v5215_v26, %v1575_v61 }
 0x2ce   : > { %v1491_v21 = vpack.c.bf16 %v1448_v20, %v1448_v20 }
 0x2cf   : > { %v1857_v2 = vpack.c.bf16 %v5246_v63, %v5243_v62 }
 0x2d0   : > { %v1741_v23 = vunpack.c.l.b16 %v1491_v21 }
 0x2d2   : > { %v1742_v25 = vpack.c.b16 %v1741_v23, %v1740_v22 }
 0x2d4   : > { %1751 = vmatpush.bf16.msra.mxu3 %v1742_v25 }
 0x2d5   : > { %v1451_v41 = vpop.f32.mrf.mxu2 }
 0x2d6   : > { %v1492_v28 = vpack.c.bf16 %v1451_v41, %v1451_v41 }
 0x2d7   : > { %4579 = vmatmul.msk.bf16.vlgmr.msra.gmra.mxu3 %vm791_vm1, %v5126_v42 }
 0x2d8   : > { %v1760_v29 = vunpack.c.l.b16 %v1492_v28 }
 0x2da   : > { %v1593_v31 = vpop.f32.mrf.mxu3 }
 0x2db   : > { %v5254_v10 = vadd.f32 %v5215_v26, %v1593_v31 }
 0x2dd   : > { %v1453_v30 = vpop.f32.mrf.mxu2 }
 0x2de   : > { %v1493_v18 = vpack.c.bf16 %v1453_v30, %v1453_v30 }
 0x2e0   : > { %v1761_v32 = vunpack.c.l.b16 %v1493_v18 }
 0x2e2   : > { %v1762_v34 = vpack.c.b16 %v1761_v32, %v1760_v29  ;;  %v1595_v51 = vpop.f32.mrf.mxu3  ;;  %v4701_v32 = vld [vmem:[%s6195_s8] sm:$0xff] }
 0x2e3   : > { %v5257_v11 = vadd.f32 %v5215_v26, %v1595_v51 }
 0x2e4   : > { %1771 = vmatpush.bf16.msra.mxu1 %v1762_v34  ;;  %v1613_v12 = vpop.f32.mrf.mxu1 }
 0x2e5   : > { %v1456_v42 = vpop.f32.mrf.mxu2  ;;  %v1858_v13 = vpack.c.bf16 %v5257_v11, %v5254_v10  ;;  %v5263_v19 = vadd.f32 %v5215_v26, %v1613_v12 }
 0x2e6   : > { %v1494_v39 = vpack.c.bf16 %v1456_v42, %v1456_v42 }
 0x2e7   : > { %4580 = vmatmul.msk.bf16.vlgmr.msra.gmra.mxu1 %vm791_vm1, %v5103_v5  ;;  %v4699_v5 = vld [vmem:[%s6193_s6] sm:$0xff] }
 0x2e8   : > { %v1780_v16 = vunpack.c.l.b16 %v1494_v39 }
 0x2ec   : > { %v1615_v15 = vpop.f32.mrf.mxu1 }
 0x2ed   : > { %v1458_v40 = vpop.f32.mrf.mxu2 }
 0x2ee   : > { %v1495_v44 = vpack.c.bf16 %v1458_v40, %v1458_v40 }
 0x2f0   : > { %v1781_v45 = vunpack.c.l.b16 %v1495_v44 }
 0x2f2   : > { %v1782_v47 = vpack.c.b16 %v1781_v45, %v1780_v16  ;;  %v5324_v45 = vld [vmem:[%s6194_s7] ss:$0 sm:$0xff] }
 0x2f4   : > { %1791 = vmatpush.bf16.msrb.mxu3 %v1782_v47 }
 0x2f7   : > { %4581 = vmatmul.msk.bf16.vlgmr.msrb.gmra.mxu3 %vm791_vm1, %v5135_v53  ;;  %v1856_v53 = vpack.c.bf16 %v5237_v56, %v5234_v55 }
 0x2f8   : > { %1944 = vmatpush.bf16.msra.mxu3 %v4700_v46 }
 0x2fa   : > { %v1633_v35 = vpop.f32.mrf.mxu3 }
 0x2fb   : > { %v5272_v22 = vadd.f32 %v5215_v26, %v1633_v35 }
 0x2fc   : > { %1945 = vmatpush.bf16.msra.mxu3 %v4699_v5 }
 0x302   : > { %v1635_v60 = vpop.f32.mrf.mxu3 }
 0x303   : > { %v5275_v23 = vadd.f32 %v5215_v26, %v1635_v60 }
 0x304   : > { %v1653_v58 = vpop.f32.mrf.mxu1 }
 0x305   : > { %v1860_v9 = vpack.c.bf16 %v5275_v23, %v5272_v22  ;;  %v5291_v30 = vadd.f32 %v5215_v26, %v1653_v58 }
 0x307   : > { %4591 = vmatmul.msk.bf16.vlgmr.msra.gmra.mxu3 %vm610_vm0, %v1854_v50 }
 0x30c   : > { %v1655_v28 = vpop.f32.mrf.mxu1 }
 0x30d   : > { %v5294_v18 = vadd.f32 %v5215_v26, %v1655_v28 }
 0x30f   : > { %v1861_v29 = vpack.c.bf16 %v5294_v18, %v5291_v30 }
 0x310   : > { %v1461_v27 = vpop.f32.mrf.mxu2 }
 0x311   : > { %v1496_v43 = vpack.c.bf16 %v1461_v27, %v1461_v27 }
 0x313   : > { %v1800_v3 = vunpack.c.l.b16 %v1496_v43 }
 0x317   : > { %4592 = vmatmul.msk.bf16.gmra.mxu3 %vm610_vm0, %v1855_v52 }
 0x318   : > { %v1463_v54 = vpop.f32.mrf.mxu2 }
 0x319   : > { %v1497_v1 = vpack.c.bf16 %v1463_v54, %v1463_v54 }
 0x31a   : > { %v1673_v0 = vpop.f32.mrf.mxu3 }
 0x31b   : > { %v1801_v4 = vunpack.c.l.b16 %v1497_v1  ;;  %v5303_v34 = vadd.f32 %v5215_v26, %v1673_v0 }
 0x31d   : > { %v1802_v6 = vpack.c.b16 %v1801_v4, %v1800_v3 }
 0x31f   : > { %1811 = vmatpush.bf16.msrb.mxu1 %v1802_v6 }
 0x322   : > { %v1675_v8 = vpop.f32.mrf.mxu3  ;;  %4582 = vmatmul.msk.bf16.vlgmr.msrb.gmra.mxu1 %vm791_vm1, %v5169_v17  ;;  %v5266_v17 = vadd.f32 %v5215_v26, %v1615_v15 }
 0x323   : > { %2142 = vmatpush.bf16.msra.mxu1 %v4701_v32  ;;  %v5306_v42 = vadd.f32 %v5215_v26, %v1675_v8 }
 0x324   : > { %v1859_v20 = vpack.c.bf16 %v5266_v17, %v5263_v19  ;;  %v1693_v39 = vpop.f32.mrf.mxu1 }
 0x325   : > { %v1862_v40 = vpack.c.bf16 %v5306_v42, %v5303_v34  ;;  %v5328_v5 = vadd.f32 %v5215_v26, %v1693_v39 }
 0x327   : > { %4593 = vmatmul.msk.bf16.gmra.mxu3 %vm610_vm0, %v1856_v53 }
 0x32c   : > { %v1695_v46 = vpop.f32.mrf.mxu1 }
 0x32d   : > { %v5331_v48 = vadd.f32 %v5215_v26, %v1695_v46 }
 0x32f   : > { %v1863_v31 = vpack.c.bf16 %v5331_v48, %v5328_v5 }
 0x337   : > { %4594 = vmatmul.msk.bf16.gmra.mxu3 %vm610_vm0, %v1857_v2 }
 0x33a   : > { %v1713_v14 = vpop.f32.mrf.mxu3 }
 0x33b   : > { %v5340_v60 = vadd.f32 %v5215_v26, %v1713_v14 }
 0x342   : > { %v1715_v57 = vpop.f32.mrf.mxu3 }
 0x343   : > { %v5343_v27 = vadd.f32 %v5215_v26, %v1715_v57 }
 0x344   : > { %v1733_v54 = vpop.f32.mrf.mxu1 }
 0x345   : > { %v1864_v43 = vpack.c.bf16 %v5343_v27, %v5340_v60  ;;  %v5352_v12 = vadd.f32 %v5215_v26, %v1733_v54 }
 0x347   : > { %4595 = vmatmul.msk.bf16.gmra.mxu3 %vm610_vm0, %v1858_v13 }
 0x34c   : > { %v1735_v6 = vpop.f32.mrf.mxu1 }
 0x34d   : > { %v5355_v13 = vadd.f32 %v5215_v26, %v1735_v6 }
 0x34f   : > { %v1865_v57 = vpack.c.bf16 %v5355_v13, %v5352_v12 }
 0x357   : > { %4596 = vmatmul.msk.bf16.gmra.mxu3 %vm610_vm0, %v1859_v20 }
 0x35a   : > { %v1753_v21 = vpop.f32.mrf.mxu3 }
 0x35b   : > { %v5278_v24 = vadd.f32 %v5215_v26, %v1753_v21 }
 0x362   : > { %v1755_v25 = vpop.f32.mrf.mxu3 }
 0x363   : > { %v5281_v41 = vadd.f32 %v5215_v26, %v1755_v25 }
 0x364   : > { %v1773_v32 = vpop.f32.mrf.mxu1 }
 0x365   : > { %v1866_v7 = vpack.c.bf16 %v5281_v41, %v5278_v24  ;;  %3414 = vmatpush.msra.mxu2 %v5281_v41 }
 0x367   : > { %4597 = vmatmul.msk.bf16.gmra.mxu3 %vm610_vm0, %v1860_v9  ;;  %3415 = vmatpush.msra.mxu2 %v5278_v24 }
 0x377   : > { %4598 = vmatmul.msk.bf16.gmra.mxu3 %vm610_vm0, %v1861_v29 }
 0x37a   : > { %v1793_v33 = vpop.f32.mrf.mxu3 }
 0x37b   : > { %v5309_v37 = vadd.f32 %v5215_v26, %v1793_v33 }
 0x382   : > { %v1795_v36 = vpop.f32.mrf.mxu3 }
 0x383   : > { %v5312_v38 = vadd.f32 %v5215_v26, %v1795_v36 }
 0x385   : > { %v1868_v44 = vpack.c.bf16 %v5312_v38, %v5309_v37  ;;  %3524 = vmatpush.msrb.mxu2 %v5312_v38 }
 0x387   : > { %4599 = vmatmul.msk.bf16.gmra.mxu3 %vm610_vm0, %v1862_v40  ;;  %3525 = vmatpush.msrb.mxu2 %v5309_v37 }
 0x38a   : > { %v1947_v16 = vpop.f32.mrf.mxu3 }
 0x38b   : > { %v1948_v47 = vadd.f32 %v5324_v45, %v1947_v16  ;;  %v1775_v16 = vpop.f32.mrf.mxu1 }
 0x38d   : > { %4715 = vtanh.f32 %v1948_v47  ;;  %v5371_v47 = vadd.f32 %v5215_v26, %v1773_v32 }
 0x392   : > { %v1949_v49 = vpop.f32.mrf.mxu3 }
 0x393   : > { %v1950_v50 = vadd.f32 %v5324_v45, %v1949_v49  ;;  %v4716_v51 = vpop.eup %4715  ;;  %v5374_v49 = vadd.f32 %v5215_v26, %v1775_v16 }
 0x395   : > { %4717 = vtanh.f32 %v1950_v50  ;;  %v1867_v41 = vpack.c.bf16 %v5374_v49, %v5371_v47 }
 0x397   : > { %4600 = vmatmul.msk.bf16.gmra.mxu3 %vm610_vm0, %v1863_v31 }
 0x39a   : > { %v1952_v52 = vpop.f32.mrf.mxu3 }
 0x39b   : > { %v4718_v35 = vpop.eup %4717  ;;  %v1953_v53 = vadd.f32 %v5324_v45, %v1952_v52 }
 0x39c   : > { %v2059_v59 = vpack.c.bf16 %v4718_v35, %v4716_v51 }
 0x39d   : > { %4719 = vtanh.f32 %v1953_v53 }
 0x39e   : > { %4611 = vmatmul.msk.bf16.vlgmr.msra.gmra.mxu1 %vm791_vm1, %v2059_v59 }
 0x3a2   : > { %v1954_v61 = vpop.f32.mrf.mxu3 }
 0x3a3   : > { %v1955_v0 = vadd.f32 %v5324_v45, %v1954_v61  ;;  %v4720_v1 = vpop.eup %4719  ;;  %v1813_v61 = vpop.f32.mrf.mxu1 }
 0x3a5   : > { %4721 = vtanh.f32 %v1955_v0 }
 0x3a7   : > { %4601 = vmatmul.msk.bf16.gmra.mxu3 %vm610_vm0, %v1864_v43 }
 0x3aa   : > { %v1957_v2 = vpop.f32.mrf.mxu3 }
 0x3ab   : > { %v4722_v3 = vpop.eup %4721  ;;  %v1958_v8 = vadd.f32 %v5324_v45, %v1957_v2  ;;  %v1815_v2 = vpop.f32.mrf.mxu1 }
 0x3ac   : > { %v2060_v4 = vpack.c.bf16 %v4722_v3, %v4720_v1  ;;  %v5393_v6 = vadd.f32 %v5215_v26, %v1815_v2 }
 0x3ad   : > { %4723 = vtanh.f32 %v1958_v8 }
 0x3ae   : > { %4612 = vmatmul.msk.bf16.gmra.mxu1 %vm791_vm1, %v2060_v4  ;;  %v5390_v4 = vadd.f32 %v5215_v26, %v1813_v61 }
 0x3b0   : > { %v1869_v38 = vpack.c.bf16 %v5393_v6, %v5390_v4 }
 0x3b2   : > { %v1959_v14 = vpop.f32.mrf.mxu3 }
 0x3b3   : > { %v1960_v15 = vadd.f32 %v5324_v45, %v1959_v14  ;;  %v4724_v20 = vpop.eup %4723 }
 0x3b5   : > { %4725 = vtanh.f32 %v1960_v15 }
 0x3b7   : > { %4602 = vmatmul.msk.bf16.gmra.mxu3 %vm610_vm0, %v1865_v57 }
 0x3ba   : > { %v1962_v21 = vpop.f32.mrf.mxu3 }
 0x3bb   : > { %v4726_v25 = vpop.eup %4725  ;;  %v1963_v9 = vadd.f32 %v5324_v45, %v1962_v21 }
 0x3bc   : > { %v2061_v58 = vpack.c.bf16 %v4726_v25, %v4724_v20 }
 0x3bd   : > { %4727 = vtanh.f32 %v1963_v9 }
 0x3be   : > { %4613 = vmatmul.msk.bf16.gmra.mxu1 %vm791_vm1, %v2061_v58 }
 0x3c2   : > { %v1964_v28 = vpop.f32.mrf.mxu3 }
 0x3c3   : > { %v1965_v29 = vadd.f32 %v5324_v45, %v1964_v28  ;;  %v4728_v33 = vpop.eup %4727 }
 0x3c5   : > { %4729 = vtanh.f32 %v1965_v29 }
 0x3c7   : > { %4603 = vmatmul.msk.bf16.gmra.mxu3 %vm610_vm0, %v1866_v7 }
 0x3ca   : > { %v1967_v36 = vpop.f32.mrf.mxu3 }
 0x3cb   : > { %v4730_v39 = vpop.eup %4729  ;;  %v1968_v46 = vadd.f32 %v5324_v45, %v1967_v36 }
 0x3cc   : > { %v2062_v40 = vpack.c.bf16 %v4730_v39, %v4728_v33 }
 0x3cd   : > { %4731 = vtanh.f32 %v1968_v46 }
 0x3ce   : > { %4614 = vmatmul.msk.bf16.gmra.mxu1 %vm791_vm1, %v2062_v40 }
 0x3d2   : > { %v1969_v50 = vpop.f32.mrf.mxu3 }
 0x3d3   : > { %v1970_v24 = vadd.f32 %v5324_v45, %v1969_v50  ;;  %v4732_v7 = vpop.eup %4731  ;;  %v5408_v50 = vld [vmem:[%s6196_s9] ss:$0 sm:$0xff] }
 0x3d5   : > { %4733 = vtanh.f32 %v1970_v24 }
 0x3d7   : > { %4604 = vmatmul.msk.bf16.gmra.mxu3 %vm610_vm0, %v1867_v41 }
 0x3da   : > { %v1972_v31 = vpop.f32.mrf.mxu3 }
 0x3db   : > { %v4734_v51 = vpop.eup %4733  ;;  %v1973_v35 = vadd.f32 %v5324_v45, %v1972_v31 }
 0x3dc   : > { %v2063_v52 = vpack.c.bf16 %v4734_v51, %v4732_v7 }
 0x3dd   : > { %4735 = vtanh.f32 %v1973_v35 }
 0x3de   : > { %4615 = vmatmul.msk.bf16.gmra.mxu1 %vm791_vm1, %v2063_v52 }
 0x3e2   : > { %v1974_v59 = vpop.f32.mrf.mxu3 }
 0x3e3   : > { %v1975_v53 = vadd.f32 %v5324_v45, %v1974_v59  ;;  %v4736_v0 = vpop.eup %4735 }
 0x3e5   : > { %4737 = vtanh.f32 %v1975_v53 }
 0x3e7   : > { %4605 = vmatmul.msk.bf16.gmra.mxu3 %vm610_vm0, %v1868_v44 }
 0x3ea   : > { %v1977_v54 = vpop.f32.mrf.mxu3 }
 0x3eb   : > { %v4738_v43 = vpop.eup %4737  ;;  %v1978_v3 = vadd.f32 %v5324_v45, %v1977_v54 }
 0x3ec   : > { %v2064_v1 = vpack.c.bf16 %v4738_v43, %v4736_v0 }
 0x3ed   : > { %4739 = vtanh.f32 %v1978_v3 }
 0x3ee   : > { %4616 = vmatmul.msk.bf16.gmra.mxu1 %vm791_vm1, %v2064_v1 }
 0x3f2   : > { %v1979_v8 = vpop.f32.mrf.mxu3 }
 0x3f3   : > { %v1980_v37 = vadd.f32 %v5324_v45, %v1979_v8  ;;  %v4740_v44 = vpop.eup %4739 }
 0x3f5   : > { %4741 = vtanh.f32 %v1980_v37 }
 0x3f7   : > { %4606 = vmatmul.msk.bf16.gmra.mxu3 %vm610_vm0, %v1869_v38 }
 0x3fa   : > { %v1982_v14 = vpop.f32.mrf.mxu3 }
 0x3fb   : > { %v4742_v15 = vpop.eup %4741  ;;  %v1983_v20 = vadd.f32 %v5324_v45, %v1982_v14 }
 0x3fc   : > { %v2065_v57 = vpack.c.bf16 %v4742_v15, %v4740_v44 }
 0x3fd   : > { %4743 = vtanh.f32 %v1983_v20 }
 0x3fe   : > { %4617 = vmatmul.msk.bf16.gmra.mxu1 %vm791_vm1, %v2065_v57 }
 0x402   : > { %v1984_v26 = vpop.f32.mrf.mxu3 }
 0x403   : > { %v1985_v21 = vadd.f32 %v5324_v45, %v1984_v26  ;;  %v4744_v25 = vpop.eup %4743 }
 0x405   : > { %4745 = vtanh.f32 %v1985_v21 }
 0x40a   : > { %v1987_v58 = vpop.f32.mrf.mxu3 }
 0x40b   : > { %v4746_v9 = vpop.eup %4745  ;;  %v1988_v29 = vadd.f32 %v5324_v45, %v1987_v58 }
 0x40c   : > { %v2066_v28 = vpack.c.bf16 %v4746_v9, %v4744_v25 }
 0x40d   : > { %4747 = vtanh.f32 %v1988_v29 }
 0x40e   : > { %4618 = vmatmul.msk.bf16.gmra.mxu1 %vm791_vm1, %v2066_v28 }
 0x412   : > { %v1989_v32 = vpop.f32.mrf.mxu3 }
 0x413   : > { %v1990_v33 = vadd.f32 %v5324_v45, %v1989_v32  ;;  %v4748_v36 = vpop.eup %4747 }
 0x415   : > { %4749 = vtanh.f32 %v1990_v33 }
 0x41a   : > { %v1992_v39 = vpop.f32.mrf.mxu3 }
 0x41b   : > { %v4750_v40 = vpop.eup %4749  ;;  %v2144_v16 = vpop.f32.mrf.mxu1  ;;  %v1993_v24 = vadd.f32 %v5324_v45, %v1992_v39 }
 0x41c   : > { %v2067_v46 = vpack.c.bf16 %v4750_v40, %v4748_v36  ;;  %v2145_v41 = vadd.f32 %v5408_v50, %v2144_v16 }
 0x41d   : > { %4751 = vtanh.f32 %v1993_v24 }
 0x41e   : > { %4619 = vmatmul.msk.bf16.gmra.mxu1 %vm791_vm1, %v2067_v46  ;;  %v2225_v35 = vsel %vm2224_vm2, %v2145_v41, -inf }
 0x422   : > { %v1994_v7 = vpop.f32.mrf.mxu3 }
 0x423   : > { %v1995_v31 = vadd.f32 %v5324_v45, %v1994_v7  ;;  %v2146_v51 = vpop.f32.mrf.mxu1  ;;  %v4752_v0 = vpop.eup %4751 }
 0x424   : > { %v2147_v52 = vadd.f32 %v5408_v50, %v2146_v51 }
 0x425   : > { %4753 = vtanh.f32 %v1995_v31 }
 0x426   : > { %v2226_v59 = vsel %vm2224_vm2, %v2147_v52, -inf }
 0x427   : > { %v2227_v53 = vmax.f32 %v2225_v35, %v2226_v59 }
 0x429   : > { %v2228_v61 = vrot.slane %v2227_v53, 4 }
 0x42a   : > { %v1997_v54 = vpop.f32.mrf.mxu3 }
 0x42b   : > { %v4754_v43 = vpop.eup %4753  ;;  %v2229_v1 = vmax.f32 %v2227_v53, %v2228_v61  ;;  %v2149_v2 = vpop.f32.mrf.mxu1  ;;  %v1998_v38 = vadd.f32 %v5324_v45, %v1997_v54 }
 0x42c   : > { %v2068_v3 = vpack.c.bf16 %v4754_v43, %v4752_v0  ;;  %v2150_v14 = vadd.f32 %v5408_v50, %v2149_v2 }
 0x42d   : > { %v2230_v8 = vrot.slane %v2229_v1, 2  ;;  %4755 = vtanh.f32 %v1998_v38 }
 0x42e   : > { %4620 = vmatmul.msk.bf16.gmra.mxu1 %vm791_vm1, %v2068_v3  ;;  %v2234_v9 = vsel %vm2224_vm2, %v2150_v14, -inf }
 0x42f   : > { %v2231_v37 = vmax.f32 %v2229_v1, %v2230_v8 }
 0x431   : > { %v2232_v44 = vrot.slane %v2231_v37, 1 }
 0x432   : > { %v1999_v15 = vpop.f32.mrf.mxu3 }
 0x433   : > { %v2233_v57 = vmax.f32 %v2231_v37, %v2232_v44  ;;  %v2000_v20 = vadd.f32 %v5324_v45, %v1999_v15  ;;  %v2151_v26 = vpop.f32.mrf.mxu1  ;;  %v4756_v39 = vpop.eup %4755 }
 0x434   : > { %v2152_v21 = vadd.f32 %v5408_v50, %v2151_v26 }
 0x435   : > { %v2369_v25 = vsub.f32 %v2145_v41, %v2233_v57  ;;  %v2370_v58 = vsub.f32 %v2147_v52, %v2233_v57  ;;  %4757 = vtanh.f32 %v2000_v20 }
 0x436   : > { %v2235_v28 = vsel %vm2224_vm2, %v2152_v21, -inf }
 0x437   : > { %v2401_v29 = vmul.f32 1.442695, %v2369_v25  ;;  %v2403_v32 = vmul.f32 1.442695, %v2370_v58  ;;  %v2236_v33 = vmax.f32 %v2234_v9, %v2235_v28 }
 0x439   : > { %4759 = vpow2.f32 %v2403_v32  ;;  %v2237_v36 = vrot.slane %v2236_v33, 4 }
 0x43a   : > { %v2002_v40 = vpop.f32.mrf.mxu3  ;;  %4761 = vpow2.f32 %v2401_v29 }
 0x43b   : > { %v4758_v16 = vpop.eup %4757  ;;  %v2238_v46 = vmax.f32 %v2236_v33, %v2237_v36  ;;  %v2154_v24 = vpop.f32.mrf.mxu1  ;;  %v2003_v59 = vadd.f32 %v5324_v45, %v2002_v40 }
 0x43c   : > { %v2069_v7 = vpack.c.bf16 %v4758_v16, %v4756_v39  ;;  %v2155_v0 = vadd.f32 %v5408_v50, %v2154_v24 }
 0x43d   : > { %v2239_v31 = vrot.slane %v2238_v46, 2  ;;  %4763 = vtanh.f32 %v2003_v59 }
 0x43e   : > { %4621 = vmatmul.msk.bf16.gmra.mxu1 %vm791_vm1, %v2069_v7  ;;  %v2243_v15 = vsel %vm2224_vm2, %v2155_v0, -inf }
 0x43f   : > { %v5425_v41 = vpop.eup %4759  ;;  %v2240_v51 = vmax.f32 %v2238_v46, %v2239_v31 }
 0x440   : > { %v5427_v52 = vpop.eup %4761  ;;  %v2466_v35 = vsel %vm2224_vm2, %v5425_v41, 0.0 }
 0x441   : > { %v2241_v53 = vrot.slane %v2240_v51, 1  ;;  %v2465_v61 = vsel %vm2224_vm2, %v5427_v52, 0.0 }
 0x442   : > { %v2004_v54 = vpop.f32.mrf.mxu3  ;;  %v2467_v43 = vadd.f32 %v2466_v35, %v2465_v61 }
 0x443   : > { %v2242_v1 = vmax.f32 %v2240_v51, %v2241_v53  ;;  %v2005_v2 = vadd.f32 %v5324_v45, %v2004_v54  ;;  %v2156_v3 = vpop.f32.mrf.mxu1  ;;  %v4764_v29 = vpop.eup %4763 }
 0x444   : > { %v2157_v8 = vadd.f32 %v5408_v50, %v2156_v3  ;;  %v2468_v37 = vrot.slane %v2467_v43, 4 }
 0x445   : > { %v2371_v38 = vsub.f32 %v2150_v14, %v2242_v1  ;;  %v2372_v44 = vsub.f32 %v2152_v21, %v2242_v1  ;;  %4765 = vtanh.f32 %v2005_v2 }
 0x446   : > { %v2244_v57 = vsel %vm2224_vm2, %v2157_v8, -inf  ;;  %v2469_v20 = vadd.f32 %v2468_v37, %v2467_v43 }
 0x447   : > { %v2405_v26 = vmul.f32 1.442695, %v2371_v38  ;;  %v2407_v25 = vmul.f32 1.442695, %v2372_v44  ;;  %v2245_v58 = vmax.f32 %v2243_v15, %v2244_v57 }
 0x448   : > { %v2470_v9 = vrot.slane %v2469_v20, 2 }
 0x449   : > { %4767 = vpow2.f32 %v2407_v25  ;;  %v2246_v28 = vrot.slane %v2245_v58, 4 }
 0x44a   : > { %v2007_v32 = vpop.f32.mrf.mxu3  ;;  %v2471_v33 = vadd.f32 %v2470_v9, %v2469_v20  ;;  %4769 = vpow2.f32 %v2405_v26 }
 0x44b   : > { %v4766_v36 = vpop.eup %4765  ;;  %v2247_v39 = vmax.f32 %v2245_v58, %v2246_v28  ;;  %v2159_v14 = vpop.f32.mrf.mxu1  ;;  %v2008_v35 = vadd.f32 %v5324_v45, %v2007_v32 }
 0x44c   : > { %v2070_v21 = vpack.c.bf16 %v4766_v36, %v4764_v29  ;;  %v2472_v40 = vrot.slane %v2471_v33, 1  ;;  %v5450_v61 = vadd.f32 %v5408_v50, %v2159_v14 }
 0x44d   : > { %v2248_v16 = vrot.slane %v2247_v39, 2 }
 0x44e   : > { %4622 = vmatmul.msk.bf16.gmra.mxu1 %vm791_vm1, %v2070_v21  ;;  %v2473_v46 = vadd.f32 %v2472_v40, %v2471_v33  ;;  %v2252_v20 = vsel %vm2224_vm2, %v5450_v61, -inf }
 0x44f   : > { %v5440_v24 = vpop.eup %4767  ;;  %v2249_v7 = vmax.f32 %v2247_v39, %v2248_v16 }
 0x450   : > { %v5442_v31 = vpop.eup %4769  ;;  %v2475_v51 = vsel %vm2224_vm2, %v5440_v24, 0.0  ;;  %4771 = vrcp.f32 %v2473_v46 }
 0x451   : > { %v2250_v59 = vrot.slane %v2249_v7, 1  ;;  %v2474_v53 = vsel %vm2224_vm2, %v5442_v31, 0.0  ;;  %4773 = vtanh.f32 %v2008_v35 }
 0x452   : > { %v2009_v54 = vpop.f32.mrf.mxu3  ;;  %v2476_v43 = vadd.f32 %v2475_v51, %v2474_v53 }
 0x453   : > { %v2251_v1 = vmax.f32 %v2249_v7, %v2250_v59  ;;  %v2010_v2 = vadd.f32 %v5324_v45, %v2009_v54  ;;  %v2161_v3 = vpop.f32.mrf.mxu1 }
 0x454   : > { %v2162_v37 = vadd.f32 %v5408_v50, %v2161_v3  ;;  %v2477_v38 = vrot.slane %v2476_v43, 4 }
 0x455   : > { %v2373_v44 = vsub.f32 %v2155_v0, %v2251_v1  ;;  %v2374_v15 = vsub.f32 %v2157_v8, %v2251_v1  ;;  %4775 = vtanh.f32 %v2010_v2 }
 0x456   : > { %v4772_v57 = vpop.eup %4771  ;;  %v2253_v26 = vsel %vm2224_vm2, %v2162_v37, -inf  ;;  %v2478_v25 = vadd.f32 %v2477_v38, %v2476_v43 }
 0x457   : > { %v2409_v58 = vmul.f32 1.442695, %v2373_v44  ;;  %v2411_v9 = vmul.f32 1.442695, %v2374_v15  ;;  %v2254_v28 = vmax.f32 %v2252_v20, %v2253_v26  ;;  %v2625_v29 = vmul.f32 %v4772_v57, %v2473_v46  ;;  %v4774_v39 = vpop.eup %4773 }
 0x458   : > { %v2479_v32 = vrot.slane %v2478_v25, 2 }
 0x459   : > { %4777 = vpow2.f32 %v2411_v9  ;;  %v2255_v33 = vrot.slane %v2254_v28, 4  ;;  %v2641_v36 = vsub.f32 2.0, %v2625_v29 }
 0x45a   : > { %v2012_v14 = vpop.f32.mrf.mxu3  ;;  %v2480_v0 = vadd.f32 %v2479_v32, %v2478_v25  ;;  %4779 = vpow2.f32 %v2409_v58 }
 0x45b   : > { %v4776_v8 = vpop.eup %4775  ;;  %v2256_v21 = vmax.f32 %v2254_v28, %v2255_v33  ;;  %v2164_v40 = vpop.f32.mrf.mxu1  ;;  %v2657_v16 = vmul.f32 %v4772_v57, %v2641_v36  ;;  %v2013_v2 = vadd.f32 %v5324_v45, %v2012_v14 }
 0x45c   : > { %v2071_v7 = vpack.c.bf16 %v4776_v8, %v4774_v39  ;;  %v2481_v51 = vrot.slane %v2480_v0, 1  ;;  %v5472_v38 = vadd.f32 %v5408_v50, %v2164_v40 }
 0x45d   : > { %v2257_v35 = vrot.slane %v2256_v21, 2  ;;  %v5458_v59 = vmul.f32 %v5427_v52, %v2657_v16  ;;  %v5478_v29 = vmul.f32 %v5425_v41, %v2657_v16 }
 0x45e   : > { %4623 = vmatmul.msk.bf16.gmra.mxu1 %vm791_vm1, %v2071_v7  ;;  %v2482_v46 = vadd.f32 %v2481_v51, %v2480_v0  ;;  %v2261_v33 = vsel %vm2224_vm2, %v5472_v38, -inf }
 0x45f   : > { %v5461_v53 = vpop.eup %4777  ;;  %v2258_v54 = vmax.f32 %v2256_v21, %v2257_v35  ;;  %2705 = vxpose.xlu0.b32.start [1/2] (short) (narrow) %v5458_v59, 8 }
 0x460   : > { %v5464_v43 = vpop.eup %4779  ;;  %v2484_v1 = vsel %vm2224_vm2, %v5461_v53, 0.0  ;;  %4781 = vrcp.f32 %v2482_v46 }
 0x461   : > { %v2259_v3 = vrot.slane %v2258_v54, 1  ;;  %v2483_v52 = vsel %vm2224_vm2, %v5464_v43, 0.0  ;;  %4783 = vtanh.f32 %v2013_v2 }
 0x462   : > { %v2014_v44 = vpop.f32.mrf.mxu3  ;;  %v2485_v15 = vadd.f32 %v2484_v1, %v2483_v52 }
 0x463   : > { %v2260_v57 = vmax.f32 %v2258_v54, %v2259_v3  ;;  %v2015_v20 = vadd.f32 %v5324_v45, %v2014_v44  ;;  %v2166_v26 = vpop.f32.mrf.mxu1 }
 0x464   : > { %v2167_v25 = vadd.f32 %v5408_v50, %v2166_v26  ;;  %v2486_v58 = vrot.slane %v2485_v15, 4 }
 0x465   : > { %v2375_v9 = vsub.f32 %v5450_v61, %v2260_v57  ;;  %v2376_v28 = vsub.f32 %v2162_v37, %v2260_v57  ;;  %4785 = vtanh.f32 %v2015_v20 }
 0x466   : > { %v4782_v32 = vpop.eup %4781  ;;  %v2262_v36 = vsel %vm2224_vm2, %v2167_v25, -inf  ;;  %v2487_v39 = vadd.f32 %v2486_v58, %v2485_v15 }
 0x467   : > { %v2413_v14 = vmul.f32 1.442695, %v2375_v9  ;;  %v2415_v0 = vmul.f32 1.442695, %v2376_v28  ;;  %v2263_v8 = vmax.f32 %v2261_v33, %v2262_v36  ;;  %2706 = vxpose.xlu0.b32.end [2/2] (short) (narrow) %v5478_v29, 8  ;;  %v2626_v21 = vmul.f32 %v4782_v32, %v2482_v46  ;;  %v4784_v7 = vpop.eup %4783 }
 0x468   : > { %v2488_v40 = vrot.slane %v2487_v39, 2 }
 0x469   : > { %4787 = vpow2.f32 %v2415_v0  ;;  %v2264_v61 = vrot.slane %v2263_v8, 4  ;;  %v2642_v37 = vsub.f32 2.0, %v2626_v21 }
 0x46a   : > { %v2017_v41 = vpop.f32.mrf.mxu3  ;;  %v2489_v16 = vadd.f32 %v2488_v40, %v2487_v39  ;;  %4789 = vpow2.f32 %v2413_v14 }
 0x46b   : > { %v4786_v51 = vpop.eup %4785  ;;  %v2265_v35 = vmax.f32 %v2263_v8, %v2264_v61  ;;  %v2169_v54 = vpop.f32.mrf.mxu1  ;;  %v2658_v1 = vmul.f32 %v4782_v32, %v2642_v37  ;;  %v2018_v58 = vadd.f32 %v5324_v45, %v2017_v41 }
 0x46c   : > { %v2072_v2 = vpack.c.bf16 %v4786_v51, %v4784_v7  ;;  %v2490_v3 = vrot.slane %v2489_v16, 1  ;;  %v5499_v28 = vadd.f32 %v5408_v50, %v2169_v54 }
 0x46d   : > { %v2266_v52 = vrot.slane %v2265_v35, 2  ;;  %v5485_v44 = vmul.f32 %v5442_v31, %v2658_v1  ;;  %v5505_v61 = vmul.f32 %v5440_v24, %v2658_v1 }
 0x46e   : > { %4624 = vmatmul.msk.bf16.gmra.mxu1 %vm791_vm1, %v2072_v2  ;;  %v2491_v46 = vadd.f32 %v2490_v3, %v2489_v16  ;;  %v2270_v7 = vsel %vm2224_vm2, %v5499_v28, -inf }
 0x46f   : > { %v5488_v15 = vpop.eup %4787  ;;  %v2267_v57 = vmax.f32 %v2265_v35, %v2266_v52  ;;  %2760 = vxpose.xlu1.b32.start [1/2] (short) (narrow) %v5485_v44, 8 }
 0x470   : > { %v5491_v20 = vpop.eup %4789  ;;  %v2493_v26 = vsel %vm2224_vm2, %v5488_v15, 0.0  ;;  %4791 = vrcp.f32 %v2491_v46 }
 0x471   : > { %v2268_v9 = vrot.slane %v2267_v57, 1  ;;  %v2492_v31 = vsel %vm2224_vm2, %v5491_v20, 0.0  ;;  %4793 = vtanh.f32 %v2018_v58 }
 0x472   : > { %v2019_v32 = vpop.f32.mrf.mxu3  ;;  %v2494_v33 = vadd.f32 %v2493_v26, %v2492_v31 }
 0x473   : > { %v2269_v36 = vmax.f32 %v2267_v57, %v2268_v9  ;;  %v2020_v39 = vadd.f32 %v5324_v45, %v2019_v32  ;;  %v2171_v14 = vpop.f32.mrf.mxu1 }
 0x474   : > { %v2172_v0 = vadd.f32 %v5408_v50, %v2171_v14  ;;  %v2495_v8 = vrot.slane %v2494_v33, 4 }
 0x475   : > { %v2377_v21 = vsub.f32 %v5472_v38, %v2269_v36  ;;  %v2378_v40 = vsub.f32 %v2167_v25, %v2269_v36  ;;  %4795 = vtanh.f32 %v2020_v39 }
 0x476   : > { %v4792_v37 = vpop.eup %4791  ;;  %v2271_v41 = vsel %vm2224_vm2, %v2172_v0, -inf  ;;  %v2496_v16 = vadd.f32 %v2495_v8, %v2494_v33 }
 0x477   : > { %v2417_v51 = vmul.f32 1.442695, %v2377_v21  ;;  %v2419_v35 = vmul.f32 1.442695, %v2378_v40  ;;  %v2272_v54 = vmax.f32 %v2270_v7, %v2271_v41  ;;  %2761 = vxpose.xlu1.b32.end [2/2] (short) (narrow) %v5505_v61, 8  ;;  %v2627_v2 = vmul.f32 %v4792_v37, %v2491_v46  ;;  %v4794_v52 = vpop.eup %4793 }
 0x478   : > { %v2497_v3 = vrot.slane %v2496_v16, 2 }
 0x479   : > { %4797 = vpow2.f32 %v2417_v51  ;;  %v2273_v38 = vrot.slane %v2272_v54, 4  ;;  %v2643_v25 = vsub.f32 2.0, %v2627_v2 }
 0x47a   : > { %4799 = vpow2.f32 %v2419_v35  ;;  %v2022_v24 = vpop.f32.mrf.mxu3  ;;  %v2498_v1 = vadd.f32 %v2497_v3, %v2496_v16 }
 0x47b   : > { %v4796_v57 = vpop.eup %4795  ;;  %v2274_v26 = vmax.f32 %v2272_v54, %v2273_v38  ;;  %v2174_v58 = vpop.f32.mrf.mxu1  ;;  %v2659_v9 = vmul.f32 %v4792_v37, %v2643_v25  ;;  %v2023_v40 = vadd.f32 %v5324_v45, %v2022_v24 }
 0x47c   : > { %v2073_v31 = vpack.c.bf16 %v4796_v57, %v4794_v52  ;;  %v2499_v32 = vrot.slane %v2498_v1, 1  ;;  %v2175_v41 = vadd.f32 %v5408_v50, %v2174_v58 }
 0x47d   : > { %v2275_v33 = vrot.slane %v2274_v26, 2  ;;  %v5512_v36 = vmul.f32 %v5464_v43, %v2659_v9  ;;  %v5530_v52 = vmul.f32 %v5461_v53, %v2659_v9 }
 0x47e   : > { %4625 = vmatmul.msk.bf16.gmra.mxu1 %vm791_vm1, %v2073_v31  ;;  %v2500_v46 = vadd.f32 %v2499_v32, %v2498_v1  ;;  %v2279_v1 = vsel %vm2224_vm2, %v2175_v41, -inf }
 0x47f   : > { %v5515_v39 = vpop.eup %4797  ;;  %v2276_v14 = vmax.f32 %v2274_v26, %v2275_v33  ;;  %2815 = vxpose.xlu2.b32.start [1/2] (short) (narrow) %v5512_v36, 8 }
 0x480   : > { %v5518_v8 = vpop.eup %4799  ;;  %v2501_v21 = vsel %vm2224_vm2, %v5515_v39, 0.0  ;;  %4801 = vrcp.f32 %v2500_v46 }
 0x481   : > { %v2502_v43 = vsel %vm2224_vm2, %v5518_v8, 0.0  ;;  %v2277_v37 = vrot.slane %v2276_v14, 1  ;;  %4803 = vtanh.f32 %v2023_v40 }
 0x482   : > { %v2503_v7 = vadd.f32 %v2502_v43, %v2501_v21  ;;  %v2024_v16 = vpop.f32.mrf.mxu3 }
 0x483   : > { %v2278_v51 = vmax.f32 %v2276_v14, %v2277_v37  ;;  %v2025_v35 = vadd.f32 %v5324_v45, %v2024_v16  ;;  %v2176_v54 = vpop.f32.mrf.mxu1 }
 0x484   : > { %v2504_v2 = vrot.slane %v2503_v7, 4  ;;  %v2177_v3 = vadd.f32 %v5408_v50, %v2176_v54 }
 0x485   : > { %v2379_v38 = vsub.f32 %v5499_v28, %v2278_v51  ;;  %v2380_v25 = vsub.f32 %v2172_v0, %v2278_v51  ;;  %4805 = vtanh.f32 %v2025_v35 }
 0x486   : > { %v4802_v24 = vpop.eup %4801  ;;  %v2280_v57 = vsel %vm2224_vm2, %v2177_v3, -inf  ;;  %v2505_v26 = vadd.f32 %v2504_v2, %v2503_v7 }
 0x487   : > { %v2421_v58 = vmul.f32 1.442695, %v2379_v38  ;;  %v2423_v45 = vmul.f32 1.442695, %v2380_v25  ;;  %v2281_v31 = vmax.f32 %v2279_v1, %v2280_v57  ;;  %2816 = vxpose.xlu2.b32.end [2/2] (short) (narrow) %v5530_v52, 8  ;;  %v2628_v32 = vmul.f32 %v4802_v24, %v2500_v46  ;;  %v4804_v14 = vpop.eup %4803 }
 0x488   : > { %v2506_v33 = vrot.slane %v2505_v26, 2 }
 0x489   : > { %4807 = vpow2.f32 %v2421_v58  ;;  %v2282_v28 = vrot.slane %v2281_v31, 4  ;;  %v2644_v0 = vsub.f32 2.0, %v2628_v32 }
 0x48a   : > { %4809 = vpow2.f32 %v2423_v45  ;;  %v2507_v53 = vadd.f32 %v2506_v33, %v2505_v26 }
 0x48b   : > { %v4806_v9 = vpop.eup %4805  ;;  %v2283_v21 = vmax.f32 %v2281_v31, %v2282_v28  ;;  %v2179_v40 = vpop.f32.mrf.mxu1  ;;  %v2660_v43 = vmul.f32 %v4802_v24, %v2644_v0 }
 0x48c   : > { %v2074_v37 = vpack.c.bf16 %v4806_v9, %v4804_v14  ;;  %v2508_v16 = vrot.slane %v2507_v53, 1  ;;  %v2180_v1 = vadd.f32 %v5408_v50, %v2179_v40 }
 0x48d   : > { %v2284_v7 = vrot.slane %v2283_v21, 2  ;;  %v5536_v51 = vmul.f32 %v5491_v20, %v2660_v43  ;;  %v5551_v33 = vmul.f32 %v5488_v15, %v2660_v43 }
 0x48e   : > { %4626 = vmatmul.msk.bf16.gmra.mxu1 %vm791_vm1, %v2074_v37  ;;  %v2509_v46 = vadd.f32 %v2508_v16, %v2507_v53  ;;  %v2288_v0 = vsel %vm2224_vm2, %v2180_v1, -inf }
 0x48f   : > { %6211 = vst [vmem:[#allocation2_spill] sm:$0xff] %v5536_v51  ;;  %v5539_v35 = vpop.eup %4807  ;;  %v2285_v54 = vmax.f32 %v2283_v21, %v2284_v7  ;;  %2870 = vxpose.xlu0.b32.start [1/2] (short) (narrow) %v5536_v51, 8 }
 0x490   : > { %v5542_v2 = vpop.eup %4809  ;;  %v2510_v38 = vsel %vm2224_vm2, %v5539_v35, 0.0  ;;  %4811 = vrcp.f32 %v2509_v46  ;;  %6212 = vst [vmem:[#allocation3_spill] sm:$0xff] %v5551_v33 }
 0x491   : > { %v2511_v25 = vsel %vm2224_vm2, %v5542_v2, 0.0  ;;  %v2286_v24 = vrot.slane %v2285_v54, 1 }
 0x492   : > { %v2512_v20 = vadd.f32 %v2511_v25, %v2510_v38 }
 0x493   : > { %v2287_v57 = vmax.f32 %v2285_v54, %v2286_v24  ;;  %v2181_v26 = vpop.f32.mrf.mxu1 }
 0x494   : > { %v2513_v58 = vrot.slane %v2512_v20, 4  ;;  %v2182_v45 = vadd.f32 %v5408_v50, %v2181_v26 }
 0x495   : > { %v2381_v31 = vsub.f32 %v2175_v41, %v2287_v57  ;;  %v2382_v32 = vsub.f32 %v2177_v3, %v2287_v57 }
 0x496   : > { %v4812_v28 = vpop.eup %4811  ;;  %v2289_v14 = vsel %vm2224_vm2, %v2182_v45, -inf  ;;  %v2514_v53 = vadd.f32 %v2513_v58, %v2512_v20 }
 0x497   : > { %v2425_v9 = vmul.f32 1.442695, %v2381_v31  ;;  %v2427_v21 = vmul.f32 1.442695, %v2382_v32  ;;  %v2290_v37 = vmax.f32 %v2288_v0, %v2289_v14  ;;  %2871 = vxpose.xlu0.b32.end [2/2] (short) (narrow) %v5551_v33, 8  ;;  %v2629_v40 = vmul.f32 %v4812_v28, %v2509_v46 }
 0x498   : > { %v2515_v16 = vrot.slane %v2514_v53, 2 }
 0x499   : > { %4813 = vpow2.f32 %v2425_v9  ;;  %v2291_v7 = vrot.slane %v2290_v37, 4  ;;  %v2645_v41 = vsub.f32 2.0, %v2629_v40 }
 0x49a   : > { %4815 = vpow2.f32 %v2427_v21  ;;  %v2516_v3 = vadd.f32 %v2515_v16, %v2514_v53 }
 0x49b   : > { %v2292_v15 = vmax.f32 %v2290_v37, %v2291_v7  ;;  %v2184_v43 = vpop.f32.mrf.mxu1  ;;  %v2661_v54 = vmul.f32 %v4812_v28, %v2645_v41 }
 0x49c   : > { %v2517_v38 = vrot.slane %v2516_v3, 1 }
 0x49d   : > { %v2293_v25 = vrot.slane %v2292_v15, 2  ;;  %v5557_v24 = vmul.f32 %v5515_v39, %v2661_v54  ;;  %v2185_v39 = vadd.f32 %v5408_v50, %v2184_v43  ;;  %v5571_v40 = vmul.f32 %v5518_v8, %v2661_v54 }
 0x49e   : > { %v2518_v20 = vadd.f32 %v2517_v38, %v2516_v3 }
 0x49f   : > { %v5559_v57 = vpop.eup %4813  ;;  %v2294_v26 = vmax.f32 %v2292_v15, %v2293_v25  ;;  %2925 = vxpose.xlu1.b32.start [1/2] (short) (narrow) %v5557_v24, 8  ;;  %v2297_v7 = vsel %vm2224_vm2, %v2185_v39, -inf }
 0x4a0   : > { %v5562_v46 = vpop.eup %4815  ;;  %v2519_v58 = vsel %vm2224_vm2, %v5559_v57, 0.0  ;;  %4817 = vrcp.f32 %v2518_v20 }
 0x4a1   : > { %v2520_v31 = vsel %vm2224_vm2, %v5562_v46, 0.0  ;;  %v2295_v32 = vrot.slane %v2294_v26, 1 }
 0x4a2   : > { %v2521_v28 = vadd.f32 %v2520_v31, %v2519_v58 }
 0x4a3   : > { %v2296_v0 = vmax.f32 %v2294_v26, %v2295_v32  ;;  %v2186_v14 = vpop.f32.mrf.mxu1 }
 0x4a4   : > { %v2522_v53 = vrot.slane %v2521_v28, 4  ;;  %v2187_v9 = vadd.f32 %v5408_v50, %v2186_v14 }
 0x4a5   : > { %v2383_v21 = vsub.f32 %v2180_v1, %v2296_v0  ;;  %v2384_v37 = vsub.f32 %v2182_v45, %v2296_v0 }
 0x4a6   : > { %v4818_v16 = vpop.eup %4817  ;;  %v2298_v41 = vsel %vm2224_vm2, %v2187_v9, -inf  ;;  %v2523_v3 = vadd.f32 %v2522_v53, %v2521_v28 }
 0x4a7   : > { %v2429_v15 = vmul.f32 1.442695, %v2383_v21  ;;  %v2431_v38 = vmul.f32 1.442695, %v2384_v37  ;;  %v2299_v25 = vmax.f32 %v2297_v7, %v2298_v41  ;;  %2926 = vxpose.xlu1.b32.end [2/2] (short) (narrow) %v5571_v40, 8  ;;  %v2630_v43 = vmul.f32 %v4818_v16, %v2518_v20 }
 0x4a8   : > { %v2524_v26 = vrot.slane %v2523_v3, 2 }
 0x4a9   : > { %4819 = vpow2.f32 %v2429_v15  ;;  %v2300_v58 = vrot.slane %v2299_v25, 4  ;;  %v2646_v1 = vsub.f32 2.0, %v2630_v43 }
 0x4aa   : > { %4821 = vpow2.f32 %v2431_v38  ;;  %v2525_v45 = vadd.f32 %v2524_v26, %v2523_v3 }
 0x4ab   : > { %v2301_v8 = vmax.f32 %v2299_v25, %v2300_v58  ;;  %v2189_v54 = vpop.f32.mrf.mxu1  ;;  %v2662_v31 = vmul.f32 %v4818_v16, %v2646_v1 }
 0x4ac   : > { %v2526_v32 = vrot.slane %v2525_v45, 1 }
 0x4ad   : > { %v2302_v0 = vrot.slane %v2301_v8, 2  ;;  %v5577_v14 = vmul.f32 %v5539_v35, %v2662_v31  ;;  %v2190_v35 = vadd.f32 %v5408_v50, %v2189_v54  ;;  %v5591_v58 = vmul.f32 %v5542_v2, %v2662_v31 }
 0x4ae   : > { %v2527_v28 = vadd.f32 %v2526_v32, %v2525_v45 }
 0x4af   : > { %6213 = vst [vmem:[#allocation4_spill] sm:$0xff] %v5577_v14  ;;  %v5579_v53 = vpop.eup %4819  ;;  %v2303_v21 = vmax.f32 %v2301_v8, %v2302_v0  ;;  %2980 = vxpose.xlu2.b32.start [1/2] (short) (narrow) %v5577_v14, 8  ;;  %v2306_v45 = vsel %vm2224_vm2, %v2190_v35, -inf }
 0x4b0   : > { %v5582_v20 = vpop.eup %4821  ;;  %v2528_v37 = vsel %vm2224_vm2, %v5579_v53, 0.0  ;;  %4823 = vrcp.f32 %v2527_v28  ;;  %6214 = vst [vmem:[#allocation5_spill] sm:$0xff] %v5591_v58 }
 0x4b1   : > { %v2529_v16 = vsel %vm2224_vm2, %v5582_v20, 0.0  ;;  %v2304_v7 = vrot.slane %v2303_v21, 1 }
 0x4b2   : > { %v2530_v41 = vadd.f32 %v2529_v16, %v2528_v37 }
 0x4b3   : > { %v2305_v3 = vmax.f32 %v2303_v21, %v2304_v7  ;;  %v2191_v15 = vpop.f32.mrf.mxu1 }
 0x4b4   : > { %v2531_v38 = vrot.slane %v2530_v41, 4  ;;  %v2192_v25 = vadd.f32 %v5408_v50, %v2191_v15 }
 0x4b5   : > { %v2385_v43 = vsub.f32 %v2185_v39, %v2305_v3  ;;  %v2386_v26 = vsub.f32 %v2187_v9, %v2305_v3 }
 0x4b6   : > { %v4824_v1 = vpop.eup %4823  ;;  %v2307_v8 = vsel %vm2224_vm2, %v2192_v25, -inf  ;;  %v2532_v32 = vadd.f32 %v2531_v38, %v2530_v41 }
 0x4b7   : > { %v2433_v0 = vmul.f32 1.442695, %v2385_v43  ;;  %v2435_v37 = vmul.f32 1.442695, %v2386_v26  ;;  %v2308_v16 = vmax.f32 %v2306_v45, %v2307_v8  ;;  %2981 = vxpose.xlu2.b32.end [2/2] (short) (narrow) %v5591_v58, 8  ;;  %v2631_v54 = vmul.f32 %v4824_v1, %v2527_v28 }
 0x4b8   : > { %v2533_v21 = vrot.slane %v2532_v32, 2 }
 0x4b9   : > { %4825 = vpow2.f32 %v2433_v0  ;;  %v2309_v7 = vrot.slane %v2308_v16, 4  ;;  %v2647_v39 = vsub.f32 2.0, %v2631_v54 }
 0x4ba   : > { %4827 = vpow2.f32 %v2435_v37  ;;  %v2534_v9 = vadd.f32 %v2533_v21, %v2532_v32 }
 0x4bb   : > { %v2310_v2 = vmax.f32 %v2308_v16, %v2309_v7  ;;  %v2194_v31 = vpop.f32.mrf.mxu1  ;;  %v2663_v3 = vmul.f32 %v4824_v1, %v2647_v39 }
 0x4bc   : > { %v2535_v15 = vrot.slane %v2534_v9, 1 }
 0x4bd   : > { %v2311_v14 = vrot.slane %v2310_v2, 2  ;;  %v5597_v51 = vmul.f32 %v5559_v57, %v2663_v3  ;;  %v2195_v57 = vadd.f32 %v5408_v50, %v2194_v31  ;;  %v5611_v21 = vmul.f32 %v5562_v46, %v2663_v3 }
 0x4be   : > { %v2536_v41 = vadd.f32 %v2535_v15, %v2534_v9 }
 0x4bf   : > { %6215 = vst [vmem:[#allocation6_spill] sm:$0xff] %v5597_v51  ;;  %v5599_v38 = vpop.eup %4825  ;;  %v2312_v43 = vmax.f32 %v2310_v2, %v2311_v14  ;;  %3035 = vxpose.xlu0.b32.start [1/2] (short) (narrow) %v5597_v51, 8  ;;  %v2315_v39 = vsel %vm2224_vm2, %v2195_v57, -inf }
 0x4c0   : > { %v5602_v28 = vpop.eup %4827  ;;  %v2537_v26 = vsel %vm2224_vm2, %v5599_v38, 0.0  ;;  %4829 = vrcp.f32 %v2536_v41 }
 0x4c1   : > { %v2538_v1 = vsel %vm2224_vm2, %v5602_v28, 0.0  ;;  %v2313_v45 = vrot.slane %v2312_v43, 1 }
 0x4c2   : > { %v2539_v8 = vadd.f32 %v2538_v1, %v2537_v26 }
 0x4c3   : > { %v2314_v32 = vmax.f32 %v2312_v43, %v2313_v45  ;;  %v2196_v0 = vpop.f32.mrf.mxu1 }
 0x4c4   : > { %v2540_v37 = vrot.slane %v2539_v8, 4  ;;  %v2197_v14 = vadd.f32 %v5408_v50, %v2196_v0 }
 0x4c5   : > { %v2387_v16 = vsub.f32 %v2190_v35, %v2314_v32  ;;  %v2388_v54 = vsub.f32 %v2192_v25, %v2314_v32 }
 0x4c6   : > { %v4830_v7 = vpop.eup %4829  ;;  %v2316_v9 = vsel %vm2224_vm2, %v2197_v14, -inf  ;;  %v2541_v2 = vadd.f32 %v2540_v37, %v2539_v8 }
 0x4c7   : > { %v2437_v15 = vmul.f32 1.442695, %v2387_v16  ;;  %v2439_v26 = vmul.f32 1.442695, %v2388_v54  ;;  %v2317_v1 = vmax.f32 %v2315_v39, %v2316_v9  ;;  %3036 = vxpose.xlu0.b32.end [2/2] (short) (narrow) %v5611_v21, 8  ;;  %v2632_v31 = vmul.f32 %v4830_v7, %v2536_v41 }
 0x4c8   : > { %v2542_v43 = vrot.slane %v2541_v2, 2 }
 0x4c9   : > { %4831 = vpow2.f32 %v2437_v15  ;;  %v2318_v45 = vrot.slane %v2317_v1, 4  ;;  %v2648_v35 = vsub.f32 2.0, %v2632_v31 }
 0x4ca   : > { %4833 = vpow2.f32 %v2439_v26  ;;  %v2543_v25 = vadd.f32 %v2542_v43, %v2541_v2 }
 0x4cb   : > { %v2319_v46 = vmax.f32 %v2317_v1, %v2318_v45  ;;  %v2199_v3 = vpop.f32.mrf.mxu1  ;;  %v2664_v32 = vmul.f32 %v4830_v7, %v2648_v35 }
 0x4cc   : > { %v2544_v0 = vrot.slane %v2543_v25, 1 }
 0x4cd   : > { %v2320_v58 = vrot.slane %v2319_v46, 2  ;;  %v5617_v33 = vmul.f32 %v5579_v53, %v2664_v32  ;;  %v2200_v53 = vadd.f32 %v5408_v50, %v2199_v3  ;;  %v5631_v43 = vmul.f32 %v5582_v20, %v2664_v32 }
 0x4ce   : > { %v2545_v8 = vadd.f32 %v2544_v0, %v2543_v25 }
 0x4cf   : > { %6216 = vst [vmem:[#allocation7_spill] sm:$0xff] %v5617_v33  ;;  %v5619_v37 = vpop.eup %4831  ;;  %v2321_v16 = vmax.f32 %v2319_v46, %v2320_v58  ;;  %3090 = vxpose.xlu1.b32.start [1/2] (short) (narrow) %v5617_v33, 8  ;;  %v2324_v35 = vsel %vm2224_vm2, %v2200_v53, -inf }
 0x4d0   : > { %v5622_v41 = vpop.eup %4833  ;;  %v2546_v54 = vsel %vm2224_vm2, %v5619_v37, 0.0  ;;  %4835 = vrcp.f32 %v2545_v8  ;;  %6217 = vst [vmem:[#allocation8_spill] sm:$0xff] %v5631_v43 }
 0x4d1   : > { %v2547_v7 = vsel %vm2224_vm2, %v5622_v41, 0.0  ;;  %v2322_v39 = vrot.slane %v2321_v16, 1 }
 0x4d2   : > { %v2548_v9 = vadd.f32 %v2547_v7, %v2546_v54 }
 0x4d3   : > { %v2323_v2 = vmax.f32 %v2321_v16, %v2322_v39  ;;  %v2201_v15 = vpop.f32.mrf.mxu1 }
 0x4d4   : > { %v2549_v26 = vrot.slane %v2548_v9, 4  ;;  %v2202_v58 = vadd.f32 %v5408_v50, %v2201_v15 }
 0x4d5   : > { %v2389_v1 = vsub.f32 %v2195_v57, %v2323_v2  ;;  %v2390_v31 = vsub.f32 %v2197_v14, %v2323_v2 }
 0x4d6   : > { %v4836_v45 = vpop.eup %4835  ;;  %v2325_v25 = vsel %vm2224_vm2, %v2202_v58, -inf  ;;  %v2550_v46 = vadd.f32 %v2549_v26, %v2548_v9 }
 0x4d7   : > { %v2441_v0 = vmul.f32 1.442695, %v2389_v1  ;;  %v2443_v54 = vmul.f32 1.442695, %v2390_v31  ;;  %v2326_v7 = vmax.f32 %v2324_v35, %v2325_v25  ;;  %3091 = vxpose.xlu1.b32.end [2/2] (short) (narrow) %v5631_v43, 8  ;;  %v2633_v3 = vmul.f32 %v4836_v45, %v2545_v8 }
 0x4d8   : > { %v2551_v16 = vrot.slane %v2550_v46, 2 }
 0x4d9   : > { %4837 = vpow2.f32 %v2441_v0  ;;  %v2327_v39 = vrot.slane %v2326_v7, 4  ;;  %v2649_v57 = vsub.f32 2.0, %v2633_v3 }
 0x4da   : > { %4839 = vpow2.f32 %v2443_v54  ;;  %v2552_v14 = vadd.f32 %v2551_v16, %v2550_v46 }
 0x4db   : > { %v2328_v20 = vmax.f32 %v2326_v7, %v2327_v39  ;;  %v2204_v32 = vpop.f32.mrf.mxu1  ;;  %v2665_v2 = vmul.f32 %v4836_v45, %v2649_v57 }
 0x4dc   : > { %v2553_v15 = vrot.slane %v2552_v14, 1 }
 0x4dd   : > { %v2329_v33 = vrot.slane %v2328_v20, 2  ;;  %v5637_v51 = vmul.f32 %v5599_v38, %v2665_v2  ;;  %v2205_v38 = vadd.f32 %v5408_v50, %v2204_v32  ;;  %v5651_v16 = vmul.f32 %v5602_v28, %v2665_v2 }
 0x4de   : > { %v2554_v9 = vadd.f32 %v2553_v15, %v2552_v14 }
 0x4df   : > { %6218 = vst [vmem:[#allocation9_spill] sm:$0xff] %v5637_v51  ;;  %v5639_v26 = vpop.eup %4837  ;;  %v2330_v1 = vmax.f32 %v2328_v20, %v2329_v33  ;;  %3145 = vxpose.xlu2.b32.start [1/2] (short) (narrow) %v5637_v51, 8  ;;  %v2333_v57 = vsel %vm2224_vm2, %v2205_v38, -inf }
 0x4e0   : > { %v5642_v8 = vpop.eup %4839  ;;  %v2555_v31 = vsel %vm2224_vm2, %v5639_v26, 0.0  ;;  %4841 = vrcp.f32 %v2554_v9  ;;  %6219 = vst [vmem:[#allocation10_spill] sm:$0xff] %v5651_v16 }
 0x4e1   : > { %v2556_v45 = vsel %vm2224_vm2, %v5642_v8, 0.0  ;;  %v2331_v35 = vrot.slane %v2330_v1, 1 }
 0x4e2   : > { %v2557_v25 = vadd.f32 %v2556_v45, %v2555_v31 }
 0x4e3   : > { %v2332_v46 = vmax.f32 %v2330_v1, %v2331_v35  ;;  %v2206_v0 = vpop.f32.mrf.mxu1 }
 0x4e4   : > { %v2558_v54 = vrot.slane %v2557_v25, 4  ;;  %v2207_v33 = vadd.f32 %v5408_v50, %v2206_v0 }
 0x4e5   : > { %v2391_v7 = vsub.f32 %v2200_v53, %v2332_v46  ;;  %v2392_v3 = vsub.f32 %v2202_v58, %v2332_v46 }
 0x4e6   : > { %v4842_v39 = vpop.eup %4841  ;;  %v2334_v14 = vsel %vm2224_vm2, %v2207_v33, -inf  ;;  %v2559_v20 = vadd.f32 %v2558_v54, %v2557_v25 }
 0x4e7   : > { %v2445_v15 = vmul.f32 1.442695, %v2391_v7  ;;  %v2447_v31 = vmul.f32 1.442695, %v2392_v3  ;;  %v2335_v45 = vmax.f32 %v2333_v57, %v2334_v14  ;;  %3146 = vxpose.xlu2.b32.end [2/2] (short) (narrow) %v5651_v16, 8  ;;  %v2634_v32 = vmul.f32 %v4842_v39, %v2554_v9 }
 0x4e8   : > { %v2560_v1 = vrot.slane %v2559_v20, 2 }
 0x4e9   : > { %4843 = vpow2.f32 %v2445_v15  ;;  %v2336_v50 = vrot.slane %v2335_v45, 4  ;;  %v2650_v53 = vsub.f32 2.0, %v2634_v32 }
 0x4ea   : > { %4845 = vpow2.f32 %v2447_v31  ;;  %v2561_v58 = vadd.f32 %v2560_v1, %v2559_v20 }
 0x4eb   : > { %v2337_v28 = vmax.f32 %v2335_v45, %v2336_v50  ;;  %v2209_v2 = vpop.f32.mrf.mxu1  ;;  %v2666_v35 = vmul.f32 %v4842_v39, %v2650_v53 }
 0x4ec   : > { %v2562_v46 = vrot.slane %v2561_v58, 1 }
 0x4ed   : > { %v2338_v0 = vrot.slane %v2337_v28, 2  ;;  %v5657_v43 = vmul.f32 %v5619_v37, %v2666_v35  ;;  %v5671_v37 = vld [vmem:[%s6196_s9] ss:$0 sm:$0xff]  ;;  %v5676_v53 = vmul.f32 %v5622_v41, %v2666_v35 }
 0x4ee   : > { %v2563_v25 = vadd.f32 %v2562_v46, %v2561_v58  ;;  %v2210_v20 = vadd.f32 %v5671_v37, %v2209_v2 }
 0x4ef   : > { %6220 = vst [vmem:[#allocation11_spill] sm:$0xff] %v5657_v43  ;;  %v5659_v54 = vpop.eup %4843  ;;  %v2339_v7 = vmax.f32 %v2337_v28, %v2338_v0  ;;  %3200 = vxpose.xlu0.b32.start [1/2] (short) (narrow) %v5657_v43, 8 }
 0x4f0   : > { %v5662_v9 = vpop.eup %4845  ;;  %v2564_v3 = vsel %vm2224_vm2, %v5659_v54, 0.0  ;;  %4847 = vrcp.f32 %v2563_v25  ;;  %6221 = vst [vmem:[#allocation12_spill] sm:$0xff] %v5676_v53  ;;  %v2342_v28 = vsel %vm2224_vm2, %v2210_v20, -inf }
 0x4f1   : > { %v2565_v39 = vsel %vm2224_vm2, %v5662_v9, 0.0  ;;  %v2340_v57 = vrot.slane %v2339_v7, 1 }
 0x4f2   : > { %v2566_v14 = vadd.f32 %v2565_v39, %v2564_v3 }
 0x4f3   : > { %v2341_v15 = vmax.f32 %v2339_v7, %v2340_v57  ;;  %v2211_v31 = vpop.f32.mrf.mxu1 }
 0x4f4   : > { %v2567_v45 = vrot.slane %v2566_v14, 4  ;;  %v2212_v32 = vadd.f32 %v5671_v37, %v2211_v31 }
 0x4f5   : > { %v2393_v1 = vsub.f32 %v2205_v38, %v2341_v15  ;;  %v2394_v50 = vsub.f32 %v2207_v33, %v2341_v15 }
 0x4f6   : > { %v4848_v58 = vpop.eup %4847  ;;  %v2343_v46 = vsel %vm2224_vm2, %v2212_v32, -inf  ;;  %v2568_v0 = vadd.f32 %v2567_v45, %v2566_v14 }
 0x4f7   : > { %v2449_v3 = vmul.f32 1.442695, %v2393_v1  ;;  %v2451_v39 = vmul.f32 1.442695, %v2394_v50  ;;  %v2344_v43 = vmax.f32 %v2342_v28, %v2343_v46  ;;  %3201 = vxpose.xlu0.b32.end [2/2] (short) (narrow) %v5676_v53, 8  ;;  %v2635_v2 = vmul.f32 %v4848_v58, %v2563_v25 }
 0x4f8   : > { %v2569_v7 = vrot.slane %v2568_v0, 2 }
 0x4f9   : > { %4849 = vpow2.f32 %v2449_v3  ;;  %v2345_v57 = vrot.slane %v2344_v43, 4  ;;  %v2651_v38 = vsub.f32 2.0, %v2635_v2 }
 0x4fa   : > { %4851 = vpow2.f32 %v2451_v39  ;;  %v2570_v33 = vadd.f32 %v2569_v7, %v2568_v0 }
 0x4fb   : > { %v2346_v41 = vmax.f32 %v2344_v43, %v2345_v57  ;;  %v2214_v35 = vpop.f32.mrf.mxu1  ;;  %v2667_v15 = vmul.f32 %v4848_v58, %v2651_v38 }
 0x4fc   : > { %v2571_v31 = vrot.slane %v2570_v33, 1 }
 0x4fd   : > { %v2347_v51 = vrot.slane %v2346_v41, 2  ;;  %v5682_v16 = vmul.f32 %v5639_v26, %v2667_v15  ;;  %v2215_v26 = vadd.f32 %v5671_v37, %v2214_v35  ;;  %v5701_v57 = vmul.f32 %v5642_v8, %v2667_v15 }
 0x4fe   : > { %v2572_v14 = vadd.f32 %v2571_v31, %v2570_v33 }
 0x4ff   : > { %v5684_v45 = vpop.eup %4849  ;;  %v2348_v1 = vmax.f32 %v2346_v41, %v2347_v51  ;;  %3255 = vxpose.xlu1.b32.start [1/2] (short) (narrow) %v5682_v16, 8  ;;  %v2351_v33 = vsel %vm2224_vm2, %v2215_v26, -inf }
 0x500   : > { %v5687_v25 = vpop.eup %4851  ;;  %v2573_v50 = vsel %vm2224_vm2, %v5684_v45, 0.0  ;;  %4853 = vrcp.f32 %v2572_v14 }
 0x501   : > { %v2574_v43 = vsel %vm2224_vm2, %v5687_v25, 0.0  ;;  %v2349_v58 = vrot.slane %v2348_v1, 1 }
 0x502   : > { %v2575_v28 = vadd.f32 %v2574_v43, %v2573_v50 }
 0x503   : > { %v2350_v46 = vmax.f32 %v2348_v1, %v2349_v58  ;;  %v5694_v0 = vpop.trf.xlu0  ;;  %v2216_v3 = vpop.f32.mrf.mxu1 }
 0x504   : > { %v2576_v51 = vrot.slane %v2575_v28, 4  ;;  %v2217_v39 = vadd.f32 %v5671_v37, %v2216_v3  ;;  %4627 = vmatmul.msk.f32.vlgmr.msra.gmra.mxu0 %vm791_vm1, %v5694_v0 }
 0x505   : > { %v2395_v2 = vsub.f32 %v2210_v20, %v2350_v46  ;;  %v2396_v7 = vsub.f32 %v2212_v32, %v2350_v46  ;;  %2864 = vmatpush.msra.mxu0 %v5237_v56 }
 0x506   : > { %v4854_v38 = vpop.eup %4853  ;;  %v2352_v41 = vsel %vm2224_vm2, %v2217_v39, -inf  ;;  %v2577_v35 = vadd.f32 %v2576_v51, %v2575_v28 }
 0x507   : > { %v2453_v31 = vmul.f32 1.442695, %v2395_v2  ;;  %v2455_v1 = vmul.f32 1.442695, %v2396_v7  ;;  %v2353_v50 = vmax.f32 %v2351_v33, %v2352_v41  ;;  %2865 = vmatpush.msra.mxu0 %v5234_v55  ;;  %3256 = vxpose.xlu1.b32.end [2/2] (short) (narrow) %v5701_v57, 8  ;;  %v2636_v20 = vmul.f32 %v4854_v38, %v2572_v14 }
 0x508   : > { %v2578_v32 = vrot.slane %v2577_v35, 2 }
 0x509   : > { %4855 = vpow2.f32 %v2453_v31  ;;  %v2354_v56 = vrot.slane %v2353_v50, 4  ;;  %v2652_v43 = vsub.f32 2.0, %v2636_v20 }
 0x50a   : > { %4857 = vpow2.f32 %v2455_v1  ;;  %v2579_v8 = vadd.f32 %v2578_v32, %v2577_v35 }
 0x50b   : > { %v2355_v15 = vmax.f32 %v2353_v50, %v2354_v56  ;;  %v2219_v58 = vpop.f32.mrf.mxu1  ;;  %v2668_v46 = vmul.f32 %v4854_v38, %v2652_v43 }
 0x50c   : > { %v2580_v3 = vrot.slane %v2579_v8, 1 }
 0x50d   : > { %v2356_v53 = vrot.slane %v2355_v15, 2  ;;  %v5708_v28 = vmul.f32 %v5659_v54, %v2668_v46  ;;  %v2220_v54 = vadd.f32 %v5671_v37, %v2219_v58  ;;  %v5727_v56 = vmul.f32 %v5662_v9, %v2668_v46 }
 0x50e   : > { %v2581_v51 = vadd.f32 %v2580_v3, %v2579_v8 }
 0x50f   : > { %v5710_v2 = vpop.eup %4855  ;;  %v2357_v55 = vmax.f32 %v2355_v15, %v2356_v53  ;;  %3310 = vxpose.xlu2.b32.start [1/2] (short) (narrow) %v5708_v28, 8  ;;  %v2360_v8 = vsel %vm2224_vm2, %v2220_v54, -inf }
 0x510   : > { %v5713_v14 = vpop.eup %4857  ;;  %v2582_v7 = vsel %vm2224_vm2, %v5710_v2, 0.0  ;;  %4859 = vrcp.f32 %v2581_v51 }
 0x511   : > { %v2583_v38 = vsel %vm2224_vm2, %v5713_v14, 0.0  ;;  %v2358_v33 = vrot.slane %v2357_v55, 1 }
 0x512   : > { %v2584_v41 = vadd.f32 %v2583_v38, %v2582_v7 }
 0x513   : > { %v2359_v35 = vmax.f32 %v2357_v55, %v2358_v33  ;;  %v5720_v31 = vpop.trf.xlu1  ;;  %v2221_v1 = vpop.f32.mrf.mxu1 }
 0x514   : > { %v2585_v53 = vrot.slane %v2584_v41, 4  ;;  %v2222_v50 = vadd.f32 %v5671_v37, %v2221_v1  ;;  %4628 = vmatmul.msk.f32.vlgmr.msrb.gmra.mxu0 %vm791_vm1, %v5720_v31 }
 0x515   : > { %v2397_v20 = vsub.f32 %v2215_v26, %v2359_v35  ;;  %v2398_v32 = vsub.f32 %v2217_v39, %v2359_v35  ;;  %2919 = vmatpush.msrb.mxu0 %v5246_v63 }
 0x516   : > { %v4860_v43 = vpop.eup %4859  ;;  %v2361_v15 = vsel %vm2224_vm2, %v2222_v50, -inf  ;;  %v2586_v58 = vadd.f32 %v2585_v53, %v2584_v41 }
 0x517   : > { %v2457_v3 = vmul.f32 1.442695, %v2397_v20  ;;  %v2459_v55 = vmul.f32 1.442695, %v2398_v32  ;;  %v2362_v7 = vmax.f32 %v2360_v8, %v2361_v15  ;;  %2920 = vmatpush.msrb.mxu0 %v5243_v62  ;;  %3311 = vxpose.xlu2.b32.end [2/2] (short) (narrow) %v5727_v56, 8  ;;  %v2637_v37 = vmul.f32 %v4860_v43, %v2581_v51 }
 0x518   : > { %v2587_v26 = vrot.slane %v2586_v58, 2  ;;  %v5733_v39 = vpop.trf.xlu2 }
 0x519   : > { %4861 = vpow2.f32 %v2457_v3  ;;  %v2363_v63 = vrot.slane %v2362_v7, 4  ;;  %v2653_v9 = vsub.f32 2.0, %v2637_v37 }
 0x51a   : > { %4863 = vpow2.f32 %v2459_v55  ;;  %v2588_v46 = vadd.f32 %v2587_v26, %v2586_v58 }
 0x51b   : > { %v2364_v38 = vmax.f32 %v2362_v7, %v2363_v63  ;;  %v2669_v33 = vmul.f32 %v4860_v43, %v2653_v9 }
 0x51c   : > { %4629 = vmatmul.msk.f32.vlgmr.msra.gmra.mxu0 %vm791_vm1, %v5733_v39  ;;  %v2589_v41 = vrot.slane %v2588_v46, 1 }
 0x51d   : > { %v2365_v35 = vrot.slane %v2364_v38, 2  ;;  %2974 = vmatpush.msra.mxu0 %v5257_v11  ;;  %v5739_v62 = vmul.f32 %v5684_v45, %v2669_v33  ;;  %v5746_v55 = vmul.f32 %v5687_v25, %v2669_v33 }
 0x51e   : > { %v2590_v51 = vadd.f32 %v2589_v41, %v2588_v46 }
 0x51f   : > { %v4862_v1 = vpop.eup %4861  ;;  %v2366_v53 = vmax.f32 %v2364_v38, %v2365_v35  ;;  %2975 = vmatpush.msra.mxu0 %v5254_v10  ;;  %3365 = vxpose.xlu0.b32.start [1/2] (short) (narrow) %v5739_v62, 8 }
 0x520   : > { %v4864_v20 = vpop.eup %4863  ;;  %v2591_v32 = vsel %vm2224_vm2, %v4862_v1, 0.0  ;;  %4865 = vrcp.f32 %v2590_v51 }
 0x521   : > { %v2592_v43 = vsel %vm2224_vm2, %v4864_v20, 0.0  ;;  %v2367_v8 = vrot.slane %v2366_v53, 1 }
 0x522   : > { %v2593_v15 = vadd.f32 %v2592_v43, %v2591_v32 }
 0x523   : > { %v2368_v58 = vmax.f32 %v2366_v53, %v2367_v8 }
 0x524   : > { %v2594_v11 = vrot.slane %v2593_v15, 4 }
 0x525   : > { %v2399_v3 = vsub.f32 %v2220_v54, %v2368_v58  ;;  %v2400_v45 = vsub.f32 %v2222_v50, %v2368_v58 }
 0x526   : > { %v4866_v7 = vpop.eup %4865  ;;  %v2595_v37 = vadd.f32 %v2594_v11, %v2593_v15 }
 0x527   : > { %v2461_v10 = vmul.f32 1.442695, %v2399_v3  ;;  %v2463_v26 = vmul.f32 1.442695, %v2400_v45  ;;  %3366 = vxpose.xlu0.b32.end [2/2] (short) (narrow) %v5746_v55, 8  ;;  %v2638_v63 = vmul.f32 %v4866_v7, %v2590_v51 }
 0x528   : > { %v2596_v9 = vrot.slane %v2595_v37, 2 }
 0x529   : > { %4867 = vpow2.f32 %v2461_v10  ;;  %v2654_v46 = vsub.f32 2.0, %v2638_v63 }
 0x52a   : > { %4869 = vpow2.f32 %v2463_v26  ;;  %v2597_v38 = vadd.f32 %v2596_v9, %v2595_v37 }
 0x52b   : > { %v2670_v41 = vmul.f32 %v4866_v7, %v2654_v46 }
 0x52c   : > { %v2598_v35 = vrot.slane %v2597_v38, 1 }
 0x52d   : > { %v5750_v54 = vmul.f32 %v5710_v2, %v2670_v41  ;;  %v5761_v2 = vmul.f32 %v5713_v14, %v2670_v41 }
 0x52e   : > { %v2599_v50 = vadd.f32 %v2598_v35, %v2597_v38 }
 0x52f   : > { %v4868_v25 = vpop.eup %4867  ;;  %3420 = vxpose.xlu1.b32.start [1/2] (short) (narrow) %v5750_v54, 8 }
 0x530   : > { %v4870_v33 = vpop.eup %4869  ;;  %v2600_v53 = vsel %vm2224_vm2, %v4868_v25, 0.0  ;;  %4871 = vrcp.f32 %v2599_v50 }
 0x531   : > { %v2601_v51 = vsel %vm2224_vm2, %v4870_v33, 0.0 }
 0x532   : > { %v2602_v32 = vadd.f32 %v2601_v51, %v2600_v53 }
 0x533   : > { %v5755_v43 = vpop.trf.xlu0 }
 0x534   : > { %v2603_v8 = vrot.slane %v2602_v32, 4  ;;  %4630 = vmatmul.msk.f32.vlgmr.msrb.gmra.mxu0 %vm791_vm1, %v5755_v43 }
 0x535   : > { %3029 = vmatpush.msrb.mxu0 %v5266_v17 }
 0x536   : > { %v4872_v15 = vpop.eup %4871  ;;  %v2604_v58 = vadd.f32 %v2603_v8, %v2602_v32 }
 0x537   : > { %3030 = vmatpush.msrb.mxu0 %v5263_v19  ;;  %3421 = vxpose.xlu1.b32.end [2/2] (short) (narrow) %v5761_v2, 8  ;;  %v2639_v11 = vmul.f32 %v4872_v15, %v2599_v50  ;;  %v5920_v50 = vld [vmem:[%s6197_s10] sm:$0xff] }
 0x538   : > { %v2605_v3 = vrot.slane %v2604_v58, 2 }
 0x539   : > { %v2655_v45 = vsub.f32 2.0, %v2639_v11 }
 0x53a   : > { %v2606_v7 = vadd.f32 %v2605_v3, %v2604_v58 }
 0x53b   : > { %v2671_v37 = vmul.f32 %v4872_v15, %v2655_v45 }
 0x53c   : > { %v2607_v10 = vrot.slane %v2606_v7, 1 }
 0x53d   : > { %v5765_v26 = vmul.f32 %v4862_v1, %v2671_v37  ;;  %v5773_v19 = vmul.f32 %v4864_v20, %v2671_v37 }
 0x53e   : > { %v2608_v63 = vadd.f32 %v2607_v10, %v2606_v7 }
 0x53f   : > { %3475 = vxpose.xlu2.b32.start [1/2] (short) (narrow) %v5765_v26, 8 }
 0x540   : > { %4873 = vrcp.f32 %v2608_v63 }
 0x543   : > { %v5768_v17 = vpop.trf.xlu1 }
 0x544   : > { %4631 = vmatmul.msk.f32.vlgmr.msra.gmra.mxu0 %vm791_vm1, %v5768_v17 }
 0x545   : > { %3084 = vmatpush.msra.mxu0 %v5275_v23 }
 0x546   : > { %v4874_v14 = vpop.eup %4873 }
 0x547   : > { %3085 = vmatpush.msra.mxu0 %v5272_v22  ;;  %3476 = vxpose.xlu2.b32.end [2/2] (short) (narrow) %v5773_v19, 8  ;;  %v2640_v1 = vmul.f32 %v4874_v14, %v2608_v63 }
 0x548   : > { %v5777_v9 = vpop.trf.xlu2 }
 0x549   : > { %v2656_v46 = vsub.f32 2.0, %v2640_v1 }
 0x54b   : > { %v2672_v38 = vmul.f32 %v4874_v14, %v2656_v46 }
 0x54c   : > { %4632 = vmatmul.msk.f32.vlgmr.msrb.gmra.mxu0 %vm791_vm1, %v5777_v9 }
 0x54d   : > { %3139 = vmatpush.msrb.mxu0 %v5294_v18  ;;  %v5782_v41 = vmul.f32 %v4868_v25, %v2672_v38  ;;  %v5786_v23 = vmul.f32 %v4870_v33, %v2672_v38 }
 0x54f   : > { %3140 = vmatpush.msrb.mxu0 %v5291_v30  ;;  %3530 = vxpose.xlu0.b32.start [1/2] (short) (narrow) %v5782_v41, 8 }
 0x557   : > { %3531 = vxpose.xlu0.b32.end [2/2] (short) (narrow) %v5786_v23, 8 }
 0x563   : > { %v3051_v22 = vpop.trf.xlu0 }
 0x564   : > { %4633 = vmatmul.msk.f32.vlgmr.msra.gmra.mxu0 %vm791_vm1, %v3051_v22 }
 0x565   : > { %3194 = vmatpush.msra.mxu0 %v5306_v42 }
 0x567   : > { %3195 = vmatpush.msra.mxu0 %v5303_v34 }
 0x573   : > { %v5792_v20 = vpop.trf.xlu1 }
 0x574   : > { %4634 = vmatmul.msk.f32.vlgmr.msrb.gmra.mxu0 %vm791_vm1, %v5792_v20 }
 0x575   : > { %3249 = vmatpush.msrb.mxu0 %v5331_v48 }
 0x577   : > { %3250 = vmatpush.msrb.mxu0 %v5328_v5 }
 0x578   : > { %v3161_v30 = vpop.trf.xlu2 }
 0x57c   : > { %4635 = vmatmul.msk.f32.vlgmr.msra.gmra.mxu0 %vm791_vm1, %v3161_v30 }
 0x57d   : > { %3304 = vmatpush.msra.mxu0 %v5343_v27 }
 0x57f   : > { %3305 = vmatpush.msra.mxu0 %v5340_v60 }
 0x581   : > { %v2757_v27 = vpop.f32.mrf.mxu0 }
 0x582   : > { %3585 = vst.msk [vmem:[%s5835_s27] sm:$0xff] %vm610_vm0, %v2757_v27 }
 0x593   : > { %v5801_v18 = vpop.trf.xlu0 }
 0x594   : > { %4636 = vmatmul.msk.f32.vlgmr.msrb.gmra.mxu0 %vm791_vm1, %v5801_v18 }
 0x595   : > { %3359 = vmatpush.msrb.mxu0 %v5355_v13  ;;  %v2812_v13 = vpop.f32.mrf.mxu0 }
 0x596   : > { %3586 = vst.msk [vmem:[%s5835_s27 + $0x8] sm:$0xff] %vm610_vm0, %v2812_v13 }
 0x597   : > { %3360 = vmatpush.msrb.mxu0 %v5352_v12  ;;  %v6222_v12 = vld [vmem:[#allocation6_spill] sm:$0xff] }
 0x5a3   : > { %v3271_v34 = vpop.trf.xlu1 }
 0x5a4   : > { %4637 = vmatmul.msk.f32.vlgmr.msra.gmra.mxu0 %vm791_vm1, %v3271_v34 }
 0x5a5   : > { %3469 = vmatpush.msra.mxu0 %v5374_v49 }
 0x5a7   : > { %3470 = vmatpush.msra.mxu0 %v5371_v47  ;;  %v6223_v47 = vld [vmem:[#allocation10_spill] sm:$0xff] }
 0x5a8   : > { %v5810_v42 = vpop.trf.xlu2 }
 0x5ac   : > { %4638 = vmatmul.msk.f32.vlgmr.msrb.gmra.mxu0 %vm791_vm1, %v5810_v42 }
 0x5ad   : > { %3579 = vmatpush.msrb.mxu0 %v5393_v6  ;;  %v2867_v6 = vpop.f32.mrf.mxu0 }
 0x5ae   : > { %3587 = vst.msk [vmem:[%s5835_s27 + $0x10] sm:$0xff] %vm610_vm0, %v2867_v6 }
 0x5af   : > { %3580 = vmatpush.msrb.mxu0 %v5390_v4  ;;  %v6224_v4 = vld [vmem:[#allocation9_spill] sm:$0xff] }
 0x5c3   : > { %v3381_v5 = vpop.trf.xlu0 }
 0x5c4   : > { %4639 = vmatmul.msk.f32.vlgmr.msra.gmra.mxu2 %vm791_vm1, %v3381_v5 }
 0x5c5   : > { %3615 = vmatpush.msra.mxu2 %v5478_v29  ;;  %v6226_v29 = vld [vmem:[#allocation2_spill] sm:$0xff] }
 0x5c7   : > { %3616 = vmatpush.msra.mxu2 %v5458_v59  ;;  %v6225_v59 = vld [vmem:[#allocation3_spill] sm:$0xff] }
 0x5d3   : > { %v5819_v48 = vpop.trf.xlu1 }
 0x5d4   : > { %4640 = vmatmul.msk.f32.vlgmr.msra.gmra.mxu0 %vm791_vm1, %v5819_v48 }
 0x5d5   : > { %3635 = vmatpush.msra.mxu0 %v5505_v61  ;;  %v6227_v61 = vld [vmem:[#allocation5_spill] sm:$0xff] }
 0x5d7   : > { %3636 = vmatpush.msra.mxu0 %v5485_v44  ;;  %v2922_v44 = vpop.f32.mrf.mxu0 }
 0x5d8   : > { %v3491_v60 = vpop.trf.xlu2  ;;  %3588 = vst.msk [vmem:[%s5835_s27 + $0x18] sm:$0xff] %vm610_vm0, %v2922_v44 }
 0x5d9   : > { %4641 = vmatmul.msk.f32.vlgmr.msrb.gmra.mxu2 %vm791_vm1, %v3491_v60 }
 0x5da   : > { %3655 = vmatpush.msrb.mxu2 %v5530_v52 }
 0x5dc   : > { %3656 = vmatpush.msrb.mxu2 %v5512_v36  ;;  %v6228_v36 = vld [vmem:[#allocation4_spill] sm:$0xff] }
 0x5df   : > { %v2977_v52 = vpop.f32.mrf.mxu0 }
 0x5e0   : > { %3589 = vst.msk [vmem:[%s5835_s27 + $0x20] sm:$0xff] %vm610_vm0, %v2977_v52 }
 0x5e1   : > { %4643 = vmatmul.msk.f32.vlgmr.msra.gmra.mxu2 %vm791_vm1, %v5694_v0  ;;  %v6232_v0 = vld [vmem:[#allocation11_spill] sm:$0xff] }
 0x5e2   : > { %3695 = vmatpush.msra.mxu2 %v5571_v40  ;;  %v6230_v40 = vld [vmem:[#allocation7_spill] sm:$0xff] }
 0x5e4   : > { %3696 = vmatpush.msra.mxu2 %v5557_v24  ;;  %v6229_v24 = vld [vmem:[#allocation8_spill] sm:$0xff] }
 0x5e9   : > { %4645 = vmatmul.msk.f32.vlgmr.msrb.gmra.mxu2 %vm791_vm1, %v5733_v39 }
 0x5ea   : > { %3735 = vmatpush.msrb.mxu2 %v5611_v21  ;;  %v3032_v21 = vpop.f32.mrf.mxu0 }
 0x5eb   : > { %3590 = vst.msk [vmem:[%s5835_s27 + $0x28] sm:$0xff] %vm610_vm0, %v3032_v21 }
 0x5ec   : > { %3736 = vmatpush.msrb.mxu2 %v6222_v12 }
 0x5f1   : > { %4647 = vmatmul.msk.f32.vlgmr.msra.gmra.mxu2 %vm791_vm1, %v5768_v17 }
 0x5f2   : > { %3775 = vmatpush.msra.mxu2 %v6223_v47 }
 0x5f3   : > { %v3546_v49 = vpop.trf.xlu0 }
 0x5f4   : > { %3776 = vmatpush.msra.mxu2 %v6224_v4  ;;  %4642 = vmatmul.msk.f32.vlgmr.msrb.gmra.mxu0 %vm791_vm1, %v3546_v49 }
 0x5f5   : > { %3675 = vmatpush.msrb.mxu0 %v6225_v59 }
 0x5f7   : > { %3676 = vmatpush.msrb.mxu0 %v6226_v29 }
 0x5f9   : > { %4649 = vmatmul.msk.f32.vlgmr.msrb.gmra.mxu2 %vm791_vm1, %v3051_v22 }
 0x5fa   : > { %3815 = vmatpush.msrb.mxu2 %v5701_v57  ;;  %v3087_v57 = vpop.f32.mrf.mxu0 }
 0x5fb   : > { %3591 = vst.msk [vmem:[%s5835_s27 + $0x30] sm:$0xff] %vm610_vm0, %v3087_v57 }
 0x5fc   : > { %3816 = vmatpush.msrb.mxu2 %v5682_v16  ;;  %4644 = vmatmul.msk.f32.vlgmr.msra.gmra.mxu0 %vm791_vm1, %v5720_v31  ;;  %v6231_v16 = vld [vmem:[#allocation12_spill] sm:$0xff] }
 0x5fd   : > { %3715 = vmatpush.msra.mxu0 %v6227_v61 }
 0x5ff   : > { %3716 = vmatpush.msra.mxu0 %v6228_v36 }
 0x601   : > { %4651 = vmatmul.msk.f32.vlgmr.msra.gmra.mxu2 %vm791_vm1, %v3161_v30 }
 0x602   : > { %3855 = vmatpush.msra.mxu2 %v5746_v55  ;;  %v3142_v31 = vpop.f32.mrf.mxu0 }
 0x603   : > { %3592 = vst.msk [vmem:[%s5835_s27 + $0x38] sm:$0xff] %vm610_vm0, %v3142_v31 }
 0x604   : > { %3856 = vmatpush.msra.mxu2 %v5739_v62  ;;  %4646 = vmatmul.msk.f32.vlgmr.msrb.gmra.mxu0 %vm791_vm1, %v5755_v43 }
 0x605   : > { %3755 = vmatpush.msrb.mxu0 %v6229_v24 }
 0x607   : > { %3756 = vmatpush.msrb.mxu0 %v6230_v40 }
 0x609   : > { %4653 = vmatmul.msk.f32.vlgmr.msrb.gmra.mxu2 %vm791_vm1, %v3271_v34 }
 0x60a   : > { %3895 = vmatpush.msrb.mxu2 %v5773_v19 }
 0x60c   : > { %3896 = vmatpush.msrb.mxu2 %v5765_v26  ;;  %4648 = vmatmul.msk.f32.vlgmr.msra.gmra.mxu0 %vm791_vm1, %v5777_v9 }
 0x60d   : > { %3795 = vmatpush.msra.mxu0 %v6231_v16 }
 0x60f   : > { %3796 = vmatpush.msra.mxu0 %v6232_v0 }
 0x611   : > { %4655 = vmatmul.msk.f32.vlgmr.msra.gmra.mxu2 %vm791_vm1, %v3381_v5 }
 0x614   : > { %4650 = vmatmul.msk.f32.vlgmr.msrb.gmra.mxu0 %vm791_vm1, %v5792_v20 }
 0x615   : > { %3835 = vmatpush.msrb.mxu0 %v5727_v56 }
 0x617   : > { %3836 = vmatpush.msrb.mxu0 %v5708_v28  ;;  %v3197_v28 = vpop.f32.mrf.mxu0 }
 0x618   : > { %3593 = vst.msk [vmem:[%s5835_s27 + $0x40] sm:$0xff] %vm610_vm0, %v3197_v28 }
 0x619   : > { %4657 = vmatmul.msk.f32.vlgmr.msrb.gmra.mxu2 %vm791_vm1, %v3491_v60 }
 0x61c   : > { %4652 = vmatmul.msk.f32.vlgmr.msra.gmra.mxu0 %vm791_vm1, %v5801_v18 }
 0x61d   : > { %3875 = vmatpush.msra.mxu0 %v5761_v2 }
 0x61f   : > { %3876 = vmatpush.msra.mxu0 %v5750_v54  ;;  %v3252_v56 = vpop.f32.mrf.mxu0 }
 0x620   : > { %3594 = vst.msk [vmem:[%s5835_s27 + $0x48] sm:$0xff] %vm610_vm0, %v3252_v56 }
 0x624   : > { %4654 = vmatmul.msk.f32.vlgmr.msrb.gmra.mxu0 %vm791_vm1, %v5810_v42 }
 0x625   : > { %3915 = vmatpush.msrb.mxu0 %v5786_v23 }
 0x627   : > { %3916 = vmatpush.msrb.mxu0 %v5782_v41  ;;  %v3307_v39 = vpop.f32.mrf.mxu0 }
 0x628   : > { %3595 = vst.msk [vmem:[%s5835_s27 + $0x50] sm:$0xff] %vm610_vm0, %v3307_v39 }
 0x62c   : > { %4656 = vmatmul.msk.f32.vlgmr.msra.gmra.mxu0 %vm791_vm1, %v5819_v48 }
 0x62f   : > { %v3362_v62 = vpop.f32.mrf.mxu0 }
 0x630   : > { %3596 = vst.msk [vmem:[%s5835_s27 + $0x58] sm:$0xff] %vm610_vm0, %v3362_v62 }
 0x634   : > { %4658 = vmatmul.msk.f32.vlgmr.msrb.gmra.mxu0 %vm791_vm1, %v3546_v49 }
 0x647   : > { %v3417_v55 = vpop.f32.mrf.mxu2 }
 0x648   : > { %3597 = vst.msk [vmem:[%s5835_s27 + $0x60] sm:$0xff] %vm610_vm0, %v3417_v55 }
 0x651   : > { %v3472_v35 = vpop.f32.mrf.mxu0 }
 0x652   : > { %3598 = vst.msk [vmem:[%s5835_s27 + $0x68] sm:$0xff] %vm610_vm0, %v3472_v35 }
 0x65c   : > { %v3527_v54 = vpop.f32.mrf.mxu2 }
 0x65d   : > { %3599 = vst.msk [vmem:[%s5835_s27 + $0x70] sm:$0xff] %vm610_vm0, %v3527_v54 }
 0x664   : > { %v3618_v25 = vpop.f32.mrf.mxu2 }
 0x665   : > { %v3922_v33 = vsub.f32 %v3618_v25, %v5920_v50 }
 0x667   : > { %v3938_v53 = vmul.f32 %v3922_v33, %v3922_v33 }
 0x669   : > { %v3954_v51 = vsel %vm2224_vm2, %v3938_v53, 0.0 }
 0x66a   : > { %3955 = vadd.xlane.f32.xlu1 %v3954_v51 }
 0x66c   : > { %v3658_v32 = vpop.f32.mrf.mxu2 }
 0x66d   : > { %v3924_v43 = vsub.f32 %v3658_v32, %v5920_v50 }
 0x66f   : > { %v3940_v8 = vmul.f32 %v3924_v43, %v3924_v43 }
 0x671   : > { %v3582_v2 = vpop.f32.mrf.mxu0  ;;  %v3960_v15 = vsel %vm2224_vm2, %v3940_v8, 0.0 }
 0x672   : > { %3600 = vst.msk [vmem:[%s5835_s27 + $0x78] sm:$0xff] %vm610_vm0, %v3582_v2  ;;  %3961 = vadd.xlane.f32.xlu0 %v3960_v15  ;;  %vm4232_vm0 = vcmask 1043459  }
 0x674   : > { %v3698_v58 = vpop.f32.mrf.mxu2 }
 0x675   : > { %v3926_v11 = vsub.f32 %v3698_v58, %v5920_v50 }
 0x677   : > { %v3942_v3 = vmul.f32 %v3926_v11, %v3926_v11 }
 0x679   : > { %v3638_v45 = vpop.f32.mrf.mxu0  ;;  %v3966_v7 = vsel %vm2224_vm2, %v3942_v3, 0.0 }
 0x67a   : > { %v3923_v37 = vsub.f32 %v3638_v45, %v5920_v50  ;;  %3967 = vadd.xlane.f32.xlu1 %v3966_v7 }
 0x67c   : > { %v3738_v10 = vpop.f32.mrf.mxu2  ;;  %v3939_v26 = vmul.f32 %v3923_v37, %v3923_v37 }
 0x67d   : > { %v3928_v63 = vsub.f32 %v3738_v10, %v5920_v50 }
 0x67e   : > { %v3957_v17 = vsel %vm2224_vm2, %v3939_v26, 0.0 }
 0x67f   : > { %3958 = vadd.xlane.f32.xlu2 %v3957_v17  ;;  %v3944_v14 = vmul.f32 %v3928_v63, %v3928_v63 }
 0x681   : > { %v3678_v19 = vpop.f32.mrf.mxu0  ;;  %v3972_v41 = vsel %vm2224_vm2, %v3944_v14, 0.0 }
 0x682   : > { %v3925_v1 = vsub.f32 %v3678_v19, %v5920_v50 }
 0x684   : > { %v3778_v9 = vpop.f32.mrf.mxu2  ;;  %v3941_v46 = vmul.f32 %v3925_v1, %v3925_v1 }
 0x685   : > { %v3930_v34 = vsub.f32 %v3778_v9, %v5920_v50 }
 0x686   : > { %v3963_v38 = vsel %vm2224_vm2, %v3941_v46, 0.0 }
 0x687   : > { %3964 = vadd.xlane.f32.xlu1 %v3963_v38  ;;  %3973 = vadd.xlane.f32.xlu2 %v3972_v41  ;;  %v3946_v27 = vmul.f32 %v3930_v34, %v3930_v34 }
 0x689   : > { %v3718_v23 = vpop.f32.mrf.mxu0  ;;  %v3978_v47 = vsel %vm2224_vm2, %v3946_v27, 0.0 }
 0x68a   : > { %v3927_v22 = vsub.f32 %v3718_v23, %v5920_v50 }
 0x68c   : > { %v3818_v20 = vpop.f32.mrf.mxu2  ;;  %v3943_v30 = vmul.f32 %v3927_v22, %v3927_v22 }
 0x68d   : > { %v3932_v18 = vsub.f32 %v3818_v20, %v5920_v50 }
 0x68e   : > { %v3969_v42 = vsel %vm2224_vm2, %v3943_v30, 0.0 }
 0x68f   : > { %v3948_v5 = vmul.f32 %v3932_v18, %v3932_v18  ;;  %3970 = vadd.xlane.f32.xlu1 %v3969_v42 }
 0x691   : > { %v3758_v48 = vpop.f32.mrf.mxu0  ;;  %v3984_v60 = vsel %vm2224_vm2, %v3948_v5, 0.0 }
 0x692   : > { %3985 = vadd.xlane.f32.xlu2 %v3984_v60  ;;  %v3929_v6 = vsub.f32 %v3758_v48, %v5920_v50  ;;  %v4210_v48 = vlaneseq }
 0x694   : > { %v3858_v12 = vpop.f32.mrf.mxu2  ;;  %v3945_v61 = vmul.f32 %v3929_v6, %v3929_v6 }
 0x695   : > { %v3934_v13 = vsub.f32 %v3858_v12, %v5920_v50 }
 0x696   : > { %v3975_v52 = vsel %vm2224_vm2, %v3945_v61, 0.0  ;;  %v5996_v61 = vand.u32 127, %v4210_v48 }
 0x697   : > { %v3950_v49 = vmul.f32 %v3934_v13, %v3934_v13  ;;  %3979 = vadd.xlane.f32.xlu1 %v3978_v47 }
 0x699   : > { %v3990_v4 = vsel %vm2224_vm2, %v3950_v49, 0.0  ;;  %v3798_v59 = vpop.f32.mrf.mxu0 }
 0x69a   : > { %3991 = vadd.xlane.f32.xlu0 %v3990_v4  ;;  %v3931_v29 = vsub.f32 %v3798_v59, %v5920_v50 }
 0x69c   : > { %v3947_v44 = vmul.f32 %v3931_v29, %v3931_v29  ;;  %v3898_v21 = vpop.f32.mrf.mxu2 }
 0x69d   : > { %v3936_v57 = vsub.f32 %v3898_v21, %v5920_v50 }
 0x69e   : > { %v3981_v36 = vsel %vm2224_vm2, %v3947_v44, 0.0 }
 0x69f   : > { %3982 = vadd.xlane.f32.xlu1 %v3981_v36  ;;  %v3952_v56 = vmul.f32 %v3936_v57, %v3936_v57 }
 0x6a1   : > { %v3838_v24 = vpop.f32.mrf.mxu0  ;;  %v3996_v55 = vsel %vm2224_vm2, %v3952_v56, 0.0 }
 0x6a2   : > { %3976 = vadd.xlane.f32.xlu0 %v3975_v52  ;;  %v3933_v40 = vsub.f32 %v3838_v24, %v5920_v50 }
 0x6a4   : > { %v3949_v16 = vmul.f32 %v3933_v40, %v3933_v40 }
 0x6a6   : > { %v3987_v0 = vsel %vm2224_vm2, %v3949_v16, 0.0 }
 0x6a7   : > { %3988 = vadd.xlane.f32.xlu2 %v3987_v0 }
 0x6a9   : > { %v3878_v31 = vpop.f32.mrf.mxu0 }
 0x6aa   : > { %v3935_v28 = vsub.f32 %v3878_v31, %v5920_v50 }
 0x6ac   : > { %v3951_v39 = vmul.f32 %v3935_v28, %v3935_v28 }
 0x6ae   : > { %v3993_v62 = vsel %vm2224_vm2, %v3951_v39, 0.0 }
 0x6af   : > { %3994 = vadd.xlane.f32.xlu1 %v3993_v62  ;;  %3997 = vadd.xlane.f32.xlu2 %v3996_v55 }
 0x6b1   : > { %v3918_v35 = vpop.f32.mrf.mxu0 }
 0x6b2   : > { %v3937_v54 = vsub.f32 %v3918_v35, %v5920_v50 }
 0x6b4   : > { %v3953_v25 = vmul.f32 %v3937_v54, %v3937_v54 }
 0x6b6   : > { %v3999_v33 = vsel %vm2224_vm2, %v3953_v25, 0.0 }
 0x6b7   : > { %4000 = vadd.xlane.f32.xlu1 %v3999_v33 }
 0x6dd   : > { %v5956_v53 = vpop.xlane.xlu1 %3955 }
 0x6de   : > { %4875 = vrsqrt.f32 %v5956_v53  ;;  %vm4009_vm3 = vcmp.eq.f32.partialorder %v5956_v53, inf  ;;  %vm4011_vm4 = vcmp.eq.f32.partialorder %v5956_v53, 0.0  ;;  %v4012_v40 = vand.u32 2147483648, %v5956_v53 }
 0x6e4   : > { %v4876_v8 = vpop.eup %4875 }
 0x6e5   : > { %v5958_v51 = vpop.xlane.xlu0 %3961  ;;  %v4003_v15 = vmul.f32 %v4876_v8, %v5956_v53 }
 0x6e6   : > { %4877 = vrsqrt.f32 %v5958_v51  ;;  %vm4033_vm5 = vcmp.eq.f32.partialorder %v5958_v51, inf  ;;  %vm4035_vm6 = vcmp.eq.f32.partialorder %v5958_v51, 0.0  ;;  %v4036_v31 = vand.u32 2147483648, %v5958_v51 }
 0x6e7   : > { %v4004_v7 = vmul.f32 %v4876_v8, %v4003_v15 }
 0x6e9   : > { %v4005_v17 = vmul.f32 0.5, %v4004_v7 }
 0x6eb   : > { %v4006_v41 = vsub.f32 1.5, %v4005_v17 }
 0x6ec   : > { %v4878_v50 = vpop.eup %4877 }
 0x6ed   : > { %v5961_v32 = vpop.xlane.xlu1 %3967  ;;  %v4027_v3 = vmul.f32 %v4878_v50, %v5958_v51  ;;  %v4007_v42 = vmul.f32 %v4876_v8, %v4006_v41 }
 0x6ee   : > { %vm4057_vm9 = vcmp.eq.f32.partialorder %v5961_v32, inf  ;;  %vm4059_vm10 = vcmp.eq.f32.partialorder %v5961_v32, 0.0 }
 0x6ef   : > { %v4028_v26 = vmul.f32 %v4878_v50, %v4027_v3  ;;  %v4008_v59 = vmul.f32 %v4007_v42, %v5956_v53 }
 0x6f1   : > { %v4029_v46 = vmul.f32 0.5, %v4028_v26  ;;  %v4010_v0 = vsel %vm4009_vm3, %v5956_v53, %v4008_v59  ;;  %vm4234_vm3 = vcmask 1044484  }
 0x6f2   : > { %v5964_v43 = vpop.xlane.xlu2 %3958  ;;  %v4013_v35 = vsel %vm4011_vm4, %v4012_v40, %v4010_v0 }
 0x6f3   : > { %4879 = vrsqrt.f32 %v5964_v43  ;;  %v4030_v30 = vsub.f32 1.5, %v4029_v46  ;;  %vm4021_vm7 = vcmp.eq.f32.partialorder %v5964_v43, inf  ;;  %v4024_v25 = vand.u32 2147483648, %v5964_v43 }
 0x6f4   : > { %4881 = vrsqrt.f32 %v5961_v32  ;;  %vm4023_vm11 = vcmp.eq.f32.partialorder %v5964_v43, 0.0  ;;  %v4212_v7 = vperm.slane %v4013_v35, %v5996_v61 }
 0x6f5   : > { %v4031_v47 = vmul.f32 %v4878_v50, %v4030_v30 }
 0x6f7   : > { %v4032_v21 = vmul.f32 %v4031_v47, %v5958_v51 }
 0x6f9   : > { %v4880_v2 = vpop.eup %4879  ;;  %v4034_v54 = vsel %vm4033_vm5, %v5958_v51, %v4032_v21  ;;  %vm4236_vm5 = vcmask 1045509  }
 0x6fa   : > { %v5969_v58 = vpop.xlane.xlu1 %3964  ;;  %v4015_v11 = vmul.f32 %v4880_v2, %v5964_v43  ;;  %v5974_v45 = vpop.xlane.xlu2 %3973 }
 0x6fb   : > { %4883 = vrsqrt.f32 %v5969_v58  ;;  %v4882_v37 = vpop.eup %4881  ;;  %vm4045_vm13 = vcmp.eq.f32.partialorder %v5969_v58, inf  ;;  %vm4047_vm14 = vcmp.eq.f32.partialorder %v5969_v58, 0.0  ;;  %vm4081_vm15 = vcmp.eq.f32.partialorder %v5974_v45, inf }
 0x6fc   : > { %v4016_v10 = vmul.f32 %v4880_v2, %v4015_v11  ;;  %4885 = vrsqrt.f32 %v5974_v45  ;;  %v4051_v19 = vmul.f32 %v4882_v37, %v5961_v32  ;;  %vm4083_vm1 = vcmp.eq.f32.partialorder %v5974_v45, 0.0 }
 0x6fe   : > { %v4017_v9 = vmul.f32 0.5, %v4016_v10  ;;  %v4052_v23 = vmul.f32 %v4882_v37, %v4051_v19 }
 0x700   : > { %v4018_v20 = vsub.f32 1.5, %v4017_v9  ;;  %v4053_v5 = vmul.f32 0.5, %v4052_v23 }
 0x701   : > { %v4884_v63 = vpop.eup %4883 }
 0x702   : > { %v4039_v14 = vmul.f32 %v4884_v63, %v5969_v58  ;;  %v5979_v1 = vpop.xlane.xlu1 %3970  ;;  %v5982_v38 = vpop.eup %4885  ;;  %v4019_v13 = vmul.f32 %v4880_v2, %v4018_v20  ;;  %v4054_v29 = vsub.f32 1.5, %v4053_v5  ;;  %v4084_v20 = vand.u32 2147483648, %v5974_v45 }
 0x703   : > { %4887 = vrsqrt.f32 %v5979_v1  ;;  %v4075_v18 = vmul.f32 %v5982_v38, %v5974_v45  ;;  %vm4069_vm4 = vcmp.eq.f32.partialorder %v5979_v1, inf  ;;  %v4072_v59 = vand.u32 2147483648, %v5979_v1 }
 0x704   : > { %v4040_v22 = vmul.f32 %v4884_v63, %v4039_v14  ;;  %v4020_v52 = vmul.f32 %v4019_v13, %v5964_v43  ;;  %v4055_v57 = vmul.f32 %v4882_v37, %v4054_v29  ;;  %v4060_v37 = vand.u32 2147483648, %v5961_v32 }
 0x705   : > { %v4076_v4 = vmul.f32 %v5982_v38, %v4075_v18  ;;  %v5990_v6 = vpop.xlane.xlu2 %3985  ;;  %v4048_v14 = vand.u32 2147483648, %v5969_v58 }
 0x706   : > { %v4041_v60 = vmul.f32 0.5, %v4040_v22  ;;  %v4022_v62 = vsel %vm4021_vm7, %v5964_v43, %v4020_v52  ;;  %v4056_v50 = vmul.f32 %v4055_v57, %v5961_v32  ;;  %v4037_v43 = vsel %vm4035_vm6, %v4036_v31, %v4034_v54 }
 0x707   : > { %v4077_v16 = vmul.f32 0.5, %v4076_v4  ;;  %v4025_v15 = vsel %vm4023_vm11, %v4024_v25, %v4022_v62  ;;  %v4214_v30 = vperm.slane %v4037_v43, %v5996_v61  ;;  %vm4071_vm6 = vcmp.eq.f32.partialorder %v5979_v1, 0.0 }
 0x708   : > { %v4042_v36 = vsub.f32 1.5, %v4041_v60  ;;  %v4058_v19 = vsel %vm4057_vm9, %v5961_v32, %v4056_v50  ;;  %v4213_v51 = vperm.slane %v4025_v15, %v5996_v61  ;;  %vm4238_vm7 = vcmask 1046534  }
 0x709   : > { %v4888_v34 = vpop.eup %4887  ;;  %v4078_v33 = vsub.f32 1.5, %v4077_v16  ;;  %v4132_v0 = vand.u32 2147483648, %v5990_v6  ;;  %vm4240_vm9 = vcmask 1047559   ;;  %vm4129_vm11 = vcmp.eq.f32.partialorder %v5990_v6, inf }
 0x70a   : > { %v4063_v27 = vmul.f32 %v4888_v34, %v5979_v1  ;;  %v5987_v12 = vpop.xlane.xlu1 %3979  ;;  %v4043_v28 = vmul.f32 %v4884_v63, %v4042_v36  ;;  %v4229_v47 = vsel %vm4228_vm8, %v4213_v51, %v4212_v7 }
 0x70b   : > { %4889 = vrsqrt.f32 %v5987_v12  ;;  %v4079_v26 = vmul.f32 %v5982_v38, %v4078_v33  ;;  %v4231_v16 = vsel %vm4230_vm12, %v4214_v30, %v4229_v47 }
 0x70c   : > { %v4064_v49 = vmul.f32 %v4888_v34, %v4063_v27  ;;  %4891 = vrsqrt.f32 %v5990_v6  ;;  %v4044_v53 = vmul.f32 %v4043_v28, %v5969_v58  ;;  %v4061_v27 = vsel %vm4059_vm10, %v4060_v37, %v4058_v19 }
 0x70d   : > { %v5993_v44 = vpop.xlane.xlu0 %3991  ;;  %v4216_v21 = vperm.slane %v4061_v27, %v5996_v61  ;;  %vm4105_vm10 = vcmp.eq.f32.partialorder %v5987_v12, inf }
 0x70e   : > { %v4065_v24 = vmul.f32 0.5, %v4064_v49  ;;  %4893 = vrsqrt.f32 %v5993_v44  ;;  %v4046_v9 = vsel %vm4045_vm13, %v5969_v58, %v4044_v53 }
 0x70f   : > { %v4049_v60 = vsel %vm4047_vm14, %v4048_v14, %v4046_v9 }
 0x710   : > { %v4066_v55 = vsub.f32 1.5, %v4065_v24  ;;  %v4215_v32 = vperm.slane %v4049_v60, %v5996_v61 }
 0x711   : > { %v6012_v39 = vpop.eup %4889 }
 0x712   : > { %v6010_v56 = vpop.xlane.xlu1 %3982  ;;  %v6020_v8 = vpop.eup %4891  ;;  %v4099_v11 = vmul.f32 %v6012_v39, %v5987_v12  ;;  %v4067_v10 = vmul.f32 %v4888_v34, %v4066_v55  ;;  %v4080_v34 = vmul.f32 %v4079_v26, %v5974_v45  ;;  %v4233_v33 = vsel %vm4232_vm0, %v4215_v32, %v4231_v16 }
 0x713   : > { %4895 = vrsqrt.f32 %v6010_v56  ;;  %v4123_v63 = vmul.f32 %v6020_v8, %v5990_v6  ;;  %vm4117_vm13 = vcmp.eq.f32.partialorder %v6010_v56, inf }
 0x714   : > { %v6032_v3 = vpop.eup %4893  ;;  %v4100_v38 = vmul.f32 %v6012_v39, %v4099_v11  ;;  %v4068_v22 = vmul.f32 %v4067_v10, %v5979_v1  ;;  %v4082_v58 = vsel %vm4081_vm15, %v5974_v45, %v4080_v34  ;;  %v4108_v10 = vand.u32 2147483648, %v5987_v12 }
 0x715   : > { %v6026_v2 = vpop.xlane.xlu0 %3976  ;;  %v4147_v46 = vmul.f32 %v6032_v3, %v5993_v44  ;;  %v4124_v42 = vmul.f32 %v6020_v8, %v4123_v63  ;;  %v4085_v35 = vsel %vm4083_vm1, %v4084_v20, %v4082_v58  ;;  %v4235_v63 = vsel %vm4234_vm3, %v4216_v21, %v4233_v33 }
 0x716   : > { %4897 = vrsqrt.f32 %v6026_v2  ;;  %v4101_v49 = vmul.f32 0.5, %v4100_v38  ;;  %v4070_v36 = vsel %vm4069_vm4, %v5979_v1, %v4068_v22  ;;  %v4218_v45 = vperm.slane %v4085_v35, %v5996_v61 }
 0x717   : > { %v4148_v13 = vmul.f32 %v6032_v3, %v4147_v46  ;;  %v4125_v52 = vmul.f32 0.5, %v4124_v42  ;;  %v4073_v28 = vsel %vm4071_vm6, %v4072_v59, %v4070_v36  ;;  %vm4093_vm14 = vcmp.eq.f32.partialorder %v6026_v2, inf }
 0x718   : > { %v4102_v1 = vsub.f32 1.5, %v4101_v49  ;;  %v4217_v11 = vperm.slane %v4073_v28, %v5996_v61  ;;  %v4096_v19 = vand.u32 2147483648, %v6026_v2  ;;  %vm4107_vm15 = vcmp.eq.f32.partialorder %v5987_v12, 0.0 }
 0x719   : > { %v4896_v17 = vpop.eup %4895  ;;  %v4149_v31 = vmul.f32 0.5, %v4148_v13  ;;  %v4126_v50 = vsub.f32 1.5, %v4125_v52  ;;  %vm4095_vm1 = vcmp.eq.f32.partialorder %v6026_v2, 0.0  ;;  %vm4131_vm4 = vcmp.eq.f32.partialorder %v5990_v6, 0.0 }
 0x71a   : > { %v4111_v41 = vmul.f32 %v4896_v17, %v6010_v56  ;;  %v6054_v23 = vpop.xlane.xlu2 %3988  ;;  %v4103_v43 = vmul.f32 %v6012_v39, %v4102_v1  ;;  %v4237_v46 = vsel %vm4236_vm5, %v4217_v11, %v4235_v63  ;;  %v4120_v13 = vand.u32 2147483648, %v6010_v56 }
 0x71b   : > { %4899 = vrsqrt.f32 %v6054_v23  ;;  %v4150_v37 = vsub.f32 1.5, %v4149_v31  ;;  %v4127_v14 = vmul.f32 %v6020_v8, %v4126_v50  ;;  %vm4119_vm6 = vcmp.eq.f32.partialorder %v6010_v56, 0.0 }
 0x71c   : > { %v4898_v18 = vpop.eup %4897  ;;  %v4112_v5 = vmul.f32 %v4896_v17, %v4111_v41  ;;  %v4104_v30 = vmul.f32 %v4103_v43, %v5987_v12 }
 0x71d   : > { %v4087_v48 = vmul.f32 %v4898_v18, %v6026_v2  ;;  %v4151_v22 = vmul.f32 %v6032_v3, %v4150_v37  ;;  %v4128_v3 = vmul.f32 %v4127_v14, %v5990_v6 }
 0x71e   : > { %v4113_v4 = vmul.f32 0.5, %v4112_v5  ;;  %v4239_v5 = vsel %vm4238_vm7, %v4218_v45, %v4237_v46  ;;  %v4106_v59 = vsel %vm4105_vm10, %v5987_v12, %v4104_v30  ;;  %vm4143_vm10 = vcmp.eq.f32.partialorder %v6054_v23, 0.0 }
 0x71f   : > { %v4088_v29 = vmul.f32 %v4898_v18, %v4087_v48  ;;  %v4152_v36 = vmul.f32 %v4151_v22, %v5993_v44  ;;  %v4130_v52 = vsel %vm4129_vm11, %v5990_v6, %v4128_v3  ;;  %v4109_v16 = vsel %vm4107_vm15, %v4108_v10, %v4106_v59 }
 0x720   : > { %v4114_v24 = vsub.f32 1.5, %v4113_v4  ;;  %v4220_v50 = vperm.slane %v4109_v16, %v5996_v61 }
 0x721   : > { %v4089_v40 = vmul.f32 0.5, %v4088_v29  ;;  %v4900_v57 = vpop.eup %4899 }
 0x722   : > { %v6081_v62 = vpop.xlane.xlu1 %3994  ;;  %v6083_v55 = vpop.xlane.xlu2 %3997  ;;  %v4135_v25 = vmul.f32 %v4900_v57, %v6054_v23  ;;  %v4115_v53 = vmul.f32 %v4896_v17, %v4114_v24 }
 0x723   : > { %v4090_v54 = vsub.f32 1.5, %v4089_v40  ;;  %4901 = vrsqrt.f32 %v6081_v62  ;;  %vm4165_vm11 = vcmp.eq.f32.partialorder %v6081_v62, inf  ;;  %vm4167_vm15 = vcmp.eq.f32.partialorder %v6081_v62, 0.0 }
 0x724   : > { %4903 = vrsqrt.f32 %v6083_v55  ;;  %v4136_v7 = vmul.f32 %v4900_v57, %v4135_v25  ;;  %v4116_v39 = vmul.f32 %v4115_v53, %v6010_v56  ;;  %v4133_v25 = vsel %vm4131_vm4, %v4132_v0, %v4130_v52 }
 0x725   : > { %v4091_v15 = vmul.f32 %v4898_v18, %v4090_v54  ;;  %vm4155_vm4 = vcmp.eq.f32.partialorder %v5993_v44, 0.0  ;;  %v4222_v10 = vperm.slane %v4133_v25, %v5996_v61 }
 0x726   : > { %v4137_v17 = vmul.f32 0.5, %v4136_v7  ;;  %v4118_v48 = vsel %vm4117_vm13, %v6010_v56, %v4116_v39  ;;  %vm4141_vm13 = vcmp.eq.f32.partialorder %v6054_v23, inf  ;;  %v4156_v56 = vand.u32 2147483648, %v5993_v44 }
 0x727   : > { %v4092_v26 = vmul.f32 %v4091_v15, %v6026_v2  ;;  %v4121_v58 = vsel %vm4119_vm6, %v4120_v13, %v4118_v48  ;;  %vm4179_vm6 = vcmp.eq.f32.partialorder %v6083_v55, 0.0 }
 0x728   : > { %v4138_v38 = vsub.f32 1.5, %v4137_v17  ;;  %v4221_v28 = vperm.slane %v4121_v58, %v5996_v61  ;;  %v4180_v17 = vand.u32 2147483648, %v6083_v55 }
 0x729   : > { %v4902_v51 = vpop.eup %4901  ;;  %v4094_v9 = vsel %vm4093_vm14, %v6026_v2, %v4092_v26  ;;  %vm4153_vm14 = vcmp.eq.f32.partialorder %v5993_v44, inf }
 0x72a   : > { %v4904_v41 = vpop.eup %4903  ;;  %v4097_v20 = vsel %vm4095_vm1, %v4096_v19, %v4094_v9  ;;  %v4159_v8 = vmul.f32 %v4902_v51, %v6081_v62  ;;  %v6112_v18 = vpop.xlane.xlu1 %4000  ;;  %v4139_v42 = vmul.f32 %v4900_v57, %v4138_v38  ;;  %v4144_v57 = vand.u32 2147483648, %v6054_v23 }
 0x72b   : > { %v4219_v34 = vperm.slane %v4097_v20, %v5996_v61  ;;  %v4171_v2 = vmul.f32 %v4904_v41, %v6083_v55  ;;  %4905 = vrsqrt.f32 %v6112_v18  ;;  %v4154_v54 = vsel %vm4153_vm14, %v5993_v44, %v4152_v36 }
 0x72c   : > { %v4160_v60 = vmul.f32 %v4902_v51, %v4159_v8  ;;  %v4140_v47 = vmul.f32 %v4139_v42, %v6054_v23  ;;  %vm4177_vm1 = vcmp.eq.f32.partialorder %v6083_v55, inf  ;;  %v4242_v37 = vsel %vm4228_vm8, %v4221_v28, %v4220_v50 }
 0x72d   : > { %v4241_v27 = vsel %vm4240_vm9, %v4219_v34, %v4239_v5  ;;  %v4172_v49 = vmul.f32 %v4904_v41, %v4171_v2  ;;  %v4157_v63 = vsel %vm4155_vm4, %v4156_v56, %v4154_v54  ;;  %v4243_v19 = vsel %vm4230_vm12, %v4222_v10, %v4242_v37 }
 0x72e   : > { %v4251_v4 = vsel %vm2224_vm2, %v4241_v27, 0.0  ;;  %v4161_v29 = vmul.f32 0.5, %v4160_v60  ;;  %v4142_v24 = vsel %vm4141_vm13, %v6054_v23, %v4140_v47  ;;  %v4168_v23 = vand.u32 2147483648, %v6081_v62 }
 0x72f   : > { %4252 = vadd.xlane.f32.xlu0 %v4251_v4  ;;  %v4173_v32 = vmul.f32 0.5, %v4172_v49  ;;  %v4145_v12 = vsel %vm4143_vm10, %v4144_v57, %v4142_v24  ;;  %v4224_v44 = vperm.slane %v4157_v63, %v5996_v61  ;;  %vm4189_vm8 = vcmp.eq.f32.partialorder %v6112_v18, inf }
 0x730   : > { %v4162_v40 = vsub.f32 1.5, %v4161_v29  ;;  %v4223_v0 = vperm.slane %v4145_v12, %v5996_v61  ;;  %v4192_v46 = vand.u32 2147483648, %v6112_v18  ;;  %vm4191_vm12 = vcmp.eq.f32.partialorder %v6112_v18, 0.0 }
 0x731   : > { %v4906_v21 = vpop.eup %4905  ;;  %v4174_v31 = vsub.f32 1.5, %v4173_v32 }
 0x732   : > { %v4163_v1 = vmul.f32 %v4902_v51, %v4162_v40  ;;  %v4183_v35 = vmul.f32 %v4906_v21, %v6112_v18  ;;  %v4244_v51 = vsel %vm4232_vm0, %v4223_v0, %v4243_v19  ;;  %vm4257_vm0 = vcmask 7168  }
 0x733   : > { %v4175_v33 = vmul.f32 %v4904_v41, %v4174_v31 }
 0x734   : > { %v4164_v53 = vmul.f32 %v4163_v1, %v6081_v62  ;;  %v4184_v15 = vmul.f32 %v4906_v21, %v4183_v35 }
 0x735   : > { %v4176_v11 = vmul.f32 %v4175_v33, %v6083_v55 }
 0x736   : > { %v4185_v7 = vmul.f32 0.5, %v4184_v15  ;;  %v4166_v6 = vsel %vm4165_vm11, %v6081_v62, %v4164_v53 }
 0x737   : > { %v4169_v45 = vsel %vm4167_vm15, %v4168_v23, %v4166_v6  ;;  %v4178_v43 = vsel %vm4177_vm1, %v6083_v55, %v4176_v11  ;;  %v4245_v55 = vsel %vm4234_vm3, %v4224_v44, %v4244_v51 }
 0x738   : > { %v4186_v26 = vsub.f32 1.5, %v4185_v7  ;;  %v4181_v14 = vsel %vm4179_vm6, %v4180_v17, %v4178_v43  ;;  %v4225_v39 = vperm.slane %v4169_v45, %v5996_v61 }
 0x739   : > { %v4226_v38 = vperm.slane %v4181_v14, %v5996_v61 }
 0x73a   : > { %v4187_v62 = vmul.f32 %v4906_v21, %v4186_v26  ;;  %v4246_v22 = vsel %vm4236_vm5, %v4225_v39, %v4245_v55 }
 0x73b   : > { %v4247_v8 = vsel %vm4238_vm7, %v4226_v38, %v4246_v22 }
 0x73c   : > { %v4188_v9 = vmul.f32 %v4187_v62, %v6112_v18 }
 0x73e   : > { %v4190_v41 = vsel %vm4189_vm8, %v6112_v18, %v4188_v9 }
 0x73f   : > { %v4193_v20 = vsel %vm4191_vm12, %v4192_v46, %v4190_v41 }
 0x740   : > { %v4227_v30 = vperm.slane %v4193_v20, %v5996_v61 }
 0x742   : > { %v4248_v34 = vsel %vm4240_vm9, %v4227_v30, %v4247_v8 }
 0x743   : > { %v4254_v42 = vsel %vm2224_vm2, %v4248_v34, 0.0 }
 0x744   : > { %4255 = vadd.xlane.f32.xlu2 %v4254_v42 }
 0x7a2   : > { %v4253_v18 = vpop.xlane.xlu0 %4252 }
 0x7a3   : > { %4258 = vst.msk [vmem:[%s447_s16] sm:$0xff] %vm4257_vm0, %v4253_v18 }
 0x7b7   : > { %v4256_v2 = vpop.xlane.xlu2 %4255 }
 0x7b8   : > { %4259 = vst.msk [vmem:[%s447_s16 + $0x8] sm:$0xff] %vm4257_vm0, %v4256_v2 }
 0x7b9 PF: > { %s23_s21 = sadd.s32 1, %s4914_s21  }
 0x7ba   : > { %p20_p6 = scmp.ge.s32.totalorder %s23_s21, 4  }
 0x7bc   :  { %22 = sbr.rel (!%p20_p6) target bundleno = 1 (0x1), region = 109 }

</bundles_post_ra>
